<compile_context>
chip_gen: v5e
topology: v5e:2x2
jax: 0.10.0
libtpu: 0.0.40
codegen_flags: <defaults>
</compile_context>

<pallas_src>
import functools

import numpy as np
import jax
import jax.numpy as jnp
from jax.experimental import pallas as pl
from jax.experimental.pallas import tpu as pltpu


# ----------------------------------- helpers -----------------------------------

def _row_tile(rows):
    """Row tile for the pipelined projections (256-512 rows ~ 85% of HBM roofline)."""
    for r in (512, 256, 128):
        if rows % r == 0:
            return r
    return rows


def _time_chunk(T, max_chunk=16):
    """Largest divisor of T that is <= max_chunk (bounds the in-kernel unroll)."""
    for c in range(min(T, max_chunk), 0, -1):
        if T % c == 0:
            return c
    return 1


def _clamp_vmem(need_bytes):
    """Explicit scoped-VMEM budget: resident tiles + double-buffer headroom, clamped so
    it also fits v7x's smaller physical VMEM."""
    return int(min(56 * 2 ** 20, max(8 * 2 ** 20, 2 * need_bytes)))


# ------------------------- row-tiled fused projection kernel -------------------------

def _proj_kernel(*refs, n_in):
    """out = sum_k x_k @ w_k + b  (bf16 MXU operands, f32 accumulation)."""
    xs = refs[:n_in]
    ws = refs[n_in:2 * n_in]
    b_ref = refs[2 * n_in]
    o_ref = refs[2 * n_in + 1]

    acc = jnp.dot(xs[0][...].astype(jnp.bfloat16), ws[0][...],
                  preferred_element_type=jnp.float32)
    for k in range(1, n_in):
        acc = acc + jnp.dot(xs[k][...].astype(jnp.bfloat16), ws[k][...],
                            preferred_element_type=jnp.float32)
    o_ref[...] = (acc + b_ref[...]).astype(o_ref.dtype)


def fused_projection(xs, ws, b, out_dtype):
    """xs: list of (rows, F_k) activations; ws: list of (F_k, OUT) bf16; b: (1, OUT) f32."""
    rows = xs[0].shape[0]
    out_dim = ws[0].shape[1]
    rt = _row_tile(rows)
    n_in = len(xs)

    in_specs = ([pl.BlockSpec((rt, x.shape[1]), lambda i: (i, 0)) for x in xs]
                + [pl.BlockSpec(w.shape, lambda i: (0, 0)) for w in ws]
                + [pl.BlockSpec(b.shape, lambda i: (0, 0))])

    stream_bytes = (sum(rt * x.shape[1] * x.dtype.itemsize for x in xs)
                    + rt * out_dim * jnp.dtype(out_dtype).itemsize) * 2      # double-buffered
    resident_bytes = sum(int(w.size) * w.dtype.itemsize for w in ws) * 2 + int(b.size) * 4 * 2

    return pl.pallas_call(
        functools.partial(_proj_kernel, n_in=n_in),
        out_shape=jax.ShapeDtypeStruct((rows, out_dim), out_dtype),
        grid=(rows // rt,),
        in_specs=in_specs,
        out_specs=pl.BlockSpec((rt, out_dim), lambda i: (i, 0)),
        compiler_params=pltpu.CompilerParams(
            dimension_semantics=("parallel",),
            vmem_limit_bytes=_clamp_vmem(stream_bytes + resident_bytes)),
    )(*xs, *ws, b)


# --------------------------- chunked bi-LSTM recurrence kernel ---------------------------

def _bilstm_recurrence_kernel(gxf_ref, gxb_ref, len_ref, whhf_ref, whhb_ref,
                              outf_ref, outb_ref,
                              hf_ref, cf_ref, hb_ref, cb_ref,
                              *, seq_len, batch, hidden, chunk):
    T, B, H, TC = seq_len, batch, hidden, chunk
    ci = pl.program_id(0)

    @pl.when(ci == 0)
    def _init():
        z = jnp.zeros((B, H), jnp.float32)
        hf_ref[...] = z
        cf_ref[...] = z
        hb_ref[...] = z
        cb_ref[...] = z

    lens = len_ref[...]                      # (B, 1) int32, resident
    whh_f = whhf_ref[...]                    # (H, 4H) bf16, resident
    whh_b = whhb_ref[...]

    def cell(pre, c_prev):
        # Gate order repacked to [i, f, o | g]: one sigmoid over a contiguous 3H slice,
        # one tanh over H (fewer EUP launches on the serial recurrence path).
        sig = jax.nn.sigmoid(pre[:, :3 * H])
        g = jnp.tanh(pre[:, 3 * H:])
        i_g = sig[:, :H]
        f_g = sig[:, H:2 * H]
        o_g = sig[:, 2 * H:]
        c_new = f_g * c_prev + i_g * g
        return o_g * jnp.tanh(c_new), c_new

    h_f = hf_ref[...]
    c_f = cf_ref[...]
    h_b = hb_ref[...]
    c_b = cb_ref[...]

    # Static chunk loop (TC <= 16): the chunked grid bounds the unroll, slices are static.
    for s in range(TC):
        r_f = s * B                          # row block of this chunk's forward step
        r_b = (TC - 1 - s) * B               # row block of this chunk's backward step
        t_f = ci * TC + s                    # global forward time
        t_b = T - 1 - t_f                    # global backward time

        # Two per-direction (B,H)x(H,4H) recurrent matmuls (no zero block through the MXU,
        # no per-step concat); bf16 operands, f32 accumulation.
        gh_f = jnp.dot(h_f.astype(jnp.bfloat16), whh_f, preferred_element_type=jnp.float32)
        gh_b = jnp.dot(h_b.astype(jnp.bfloat16), whh_b, preferred_element_type=jnp.float32)

        pre_f = gxf_ref[r_f:r_f + B, :].astype(jnp.float32) + gh_f
        pre_b = gxb_ref[r_b:r_b + B, :].astype(jnp.float32) + gh_b
        h_f_new, c_f_new = cell(pre_f, c_f)
        h_b_new, c_b_new = cell(pre_b, c_b)

        # Per-step validity masks from the resident lengths column (VPU compare; replaces
        # the old 128x-padded (T*B, 1) mask stream).
        m_f = (t_f < lens).astype(jnp.float32)       # (B, 1)
        m_b = (t_b < lens).astype(jnp.float32)

        # Forward: state free-runs past the end; zero-mask padded outputs
        # (== pad_packed_sequence zero padding).
        outf_ref[r_f:r_f + B, :] = m_f * h_f_new

        # Backward: freeze (h, c) on padded steps so the recurrence effectively starts at
        # each sequence's true last frame (packed bi-LSTM semantics); frozen state is the
        # zero init, so padded outputs are already zero.
        h_b = m_b * h_b_new + (1.0 - m_b) * h_b
        c_b = m_b * c_b_new + (1.0 - m_b) * c_b
        outb_ref[r_b:r_b + B, :] = h_b

        h_f, c_f = h_f_new, c_f_new

    hf_ref[...] = h_f
    cf_ref[...] = c_f
    hb_ref[...] = h_b
    cb_ref[...] = c_b


def bilstm_recurrence(gx, lengths, whh_f, whh_b, T, B, H):
    """gx: (T*B, 8H) bf16 pre-computed input gates (cols [4H fwd | 4H bwd]);
       lengths: (B,) int32  ->  (out_fwd, out_bwd) each (T*B, H) f32 (padded rows zero)."""
    TC = _time_chunk(T)
    NC = T // TC
    rows = T * B
    lens_col = lengths.reshape(B, 1).astype(jnp.int32)

    stream_bytes = (2 * TC * B * 4 * H * gx.dtype.itemsize      # two gx chunk windows
                    + 2 * TC * B * H * 4) * 2                   # two out chunk windows
    resident_bytes = 2 * H * 4 * H * 2 + 4 * B * H * 4 + 8 * 128 * 4

    out_f, out_b = pl.pallas_call(
        functools.partial(_bilstm_recurrence_kernel,
                          seq_len=T, batch=B, hidden=H, chunk=TC),
        out_shape=(jax.ShapeDtypeStruct((rows, H), jnp.float32),
                   jax.ShapeDtypeStruct((rows, H), jnp.float32)),
        grid=(NC,),
        in_specs=[
            pl.BlockSpec((TC * B, 4 * H), lambda i: (i, 0)),           # gx fwd gates, fwd chunks
            pl.BlockSpec((TC * B, 4 * H), lambda i: (NC - 1 - i, 1)),  # gx bwd gates, reversed
            pl.BlockSpec((B, 1), lambda i: (0, 0)),                    # lengths (resident)
            pl.BlockSpec((H, 4 * H), lambda i: (0, 0)),                # Whh fwd (resident)
            pl.BlockSpec((H, 4 * H), lambda i: (0, 0)),                # Whh bwd (resident)
        ],
        out_specs=(pl.BlockSpec((TC * B, H), lambda i: (i, 0)),
                   pl.BlockSpec((TC * B, H), lambda i: (NC - 1 - i, 0))),
        scratch_shapes=[pltpu.VMEM((B, H), jnp.float32)] * 4,          # h_f, c_f, h_b, c_b
        compiler_params=pltpu.CompilerParams(
            dimension_semantics=("arbitrary",),                        # sequential carries
            vmem_limit_bytes=_clamp_vmem(stream_bytes + resident_bytes)),
    )(gx, gx, lens_col, whh_f, whh_b)
    return out_f, out_b


# ------------------------------ pooling (plain JAX) ------------------------------

def _pool_pairs(h2d, T, B, F):
    """Mean over consecutive time pairs (drop last frame if T odd); matches _pool_packed
    (zero-padded frames participate in the mean).  Plain JAX reshape+add."""
    T2 = T // 2
    h = h2d.reshape(T, B, F)[: 2 * T2].reshape(T2, 2, B, F)
    return (0.5 * (h[:, 0] + h[:, 1])).reshape(T2 * B, F)


# --------------------------------- encoder forward ---------------------------------

def encoder_forward(x, lengths, params, key_size):
    T, B, _ = x.shape
    H = params["layers"][0]["whh_f"].shape[0]
    lengths = lengths.astype(jnp.int32)

    xs = [x.reshape(T * B, x.shape[-1])]
    for li, layer in enumerate(params["layers"]):
        if li > 0:
            # Pyramidal pair-pooling, applied per direction half (no (T,B,2H) concat).
            xs = [_pool_pairs(h, T, B, H) for h in xs]
            T = T // 2
            lengths = lengths // 2
        gx = fused_projection(xs, layer["wih"], layer["b"], out_dtype=jnp.bfloat16)
        out_f, out_b = bilstm_recurrence(gx, lengths, layer["whh_f"], layer["whh_b"], T, B, H)
        xs = [out_f, out_b]

    # Fused keys || values head over both direction halves.
    kv = fused_projection(xs, params["kv_w"], params["kv_b"], out_dtype=jnp.float32)
    kv = kv.reshape(T, B, 2 * key_size)
    return kv[..., :key_size], kv[..., key_size:], lengths


# --------------------------- deterministic parameter init ---------------------------

def init_bilstm(key, input_size, hidden_size, input_splits=None):
    """PyTorch-style LSTM init, repacked for the kernels:
       wih: list of (F_k, 8H) bf16 (one per input half), columns [4H fwd | 4H bwd],
            gate order [i, f, o, g] per direction
       whh_f / whh_b: (H, 4H) bf16, same gate order
       b: (1, 8H) f32 = (b_ih + b_hh) per direction."""
    H = hidden_size
    bound = 1.0 / np.sqrt(H)
    ks = jax.random.split(key, 8)

    def u(k, shape):
        return jax.random.uniform(k, shape, jnp.float32, -bound, bound)

    # PyTorch nn.LSTM layout: (4H, In) / (4H, H), gate row blocks [i, f, g, o].
    wih_f = u(ks[0], (4 * H, input_size)); whh_f = u(ks[1], (4 * H, H))
    b_f = u(ks[2], (4 * H,)) + u(ks[3], (4 * H,))
    wih_b = u(ks[4], (4 * H, input_size)); whh_b = u(ks[5], (4 * H, H))
    b_b = u(ks[6], (4 * H,)) + u(ks[7], (4 * H,))

    # Repack gates to [i, f, o | g] so the 3 sigmoid gates form one contiguous 3H slice.
    perm = np.concatenate([np.arange(0, 2 * H), np.arange(3 * H, 4 * H),
                           np.arange(2 * H, 3 * H)])

    wih = jnp.concatenate([wih_f[perm].T, wih_b[perm].T], axis=1)        # (In, 8H)
    b = jnp.concatenate([b_f[perm], b_b[perm]])[None, :]                 # (1, 8H)

    if input_splits is None:
        input_splits = (input_size,)
    offs = np.cumsum((0,) + tuple(input_splits))
    wih_list = [wih[int(offs[k]):int(offs[k + 1])].astype(jnp.bfloat16)
                for k in range(len(input_splits))]

    return {"wih": wih_list,
            "whh_f": whh_f[perm].T.astype(jnp.bfloat16),
            "whh_b": whh_b[perm].T.astype(jnp.bfloat16),
            "b": b}


def init_kv(key, hidden_size, key_size):
    """Fused keys||values head split into fwd/bwd input halves.
    NOTE: reproduces the reference module, where linear_values also maps to key_size."""
    H, K = hidden_size, key_size
    bound = 1.0 / np.sqrt(2 * H)
    k1, k2, k3, k4 = jax.random.split(key, 4)

    def u(k, shape):
        return jax.random.uniform(k, shape, jnp.float32, -bound, bound)

    wk = u(k1, (K, 2 * H)); bk = u(k2, (K,))       # nn.Linear layout (out, in)
    wv = u(k3, (K, 2 * H)); bv = u(k4, (K,))

    w_f = jnp.concatenate([wk[:, :H].T, wv[:, :H].T], axis=1).astype(jnp.bfloat16)  # (H, 2K)
    w_b = jnp.concatenate([wk[:, H:].T, wv[:, H:].T], axis=1).astype(jnp.bfloat16)
    b = jnp.concatenate([bk, bv])[None, :]                                          # (1, 2K)
    return [w_f, w_b], b


# ---------------------------------------- main ----------------------------------------

if __name__ == "__main__":
    T, B = 8, 2
    input_size, hidden_size, key_size = 16, 32, 16
    p_layers = 2                    # bidirectional=True

    root = jax.random.PRNGKey(0)
    k_x, k_l0, k_p0, k_p1, k_kv = jax.random.split(root, 5)

    params = {
        "layers": [
            init_bilstm(k_l0, input_size, hidden_size),
            init_bilstm(k_p0, 2 * hidden_size, hidden_size,
                        input_splits=(hidden_size, hidden_size)),
            init_bilstm(k_p1, 2 * hidden_size, hidden_size,
                        input_splits=(hidden_size, hidden_size)),
        ],
    }
    params["kv_w"], params["kv_b"] = init_kv(k_kv, hidden_size, key_size)

    x = jax.random.normal(k_x, (T, B, input_size), jnp.float32)    # time-major, like nn.LSTM
    input_lengths = jnp.array([8, 6], dtype=jnp.int32)             # sorted descending

    fwd = jax.jit(encoder_forward, static_argnums=(3,))
    keys_out, values_out, out_lengths = fwd(x, input_lengths, params, key_size)
    jax.block_until_ready((keys_out, values_out, out_lengths))

    assert keys_out.shape == (T // 2 ** p_layers, B, key_size)
    assert values_out.shape == (T // 2 ** p_layers, B, key_size)
    print("KERNEL_OK")
</pallas_src>

<mosaic_0001>
module attributes {stable_mosaic.version = 11 : i64} {
  func.func @_proj_kernel(%arg0: i32, %arg1: memref<16x16xf32, #tpu.memory_space<vmem>>, %arg2: memref<16x256xbf16, #tpu.memory_space<vmem>>, %arg3: memref<1x256xf32, #tpu.memory_space<vmem>>, %arg4: memref<16x256xbf16, #tpu.memory_space<vmem>>) attributes {dimension_semantics = [#tpu.dimension_semantics<parallel>], iteration_bounds = array<i64: 1>, scalar_prefetch = 0 : i64, scratch_operands = 0 : i64, tpu.core_type = #tpu.core_type<tc>, window_params = [{transform_indices = @transform_0, window_bounds = array<i64: 16, 16>}, {pipeline_mode = #tpu.pipeline_mode<synchronous>, transform_indices = @transform_1, window_bounds = array<i64: 16, 256>}, {pipeline_mode = #tpu.pipeline_mode<synchronous>, transform_indices = @transform_2, window_bounds = array<i64: 1, 256>}, {transform_indices = @transform_3, window_bounds = array<i64: 16, 256>}]} {
    %c0 = arith.constant 0 : index
    %c0_0 = arith.constant 0 : index
    %0 = vector.load %arg1[%c0, %c0_0] : memref<16x16xf32, #tpu.memory_space<vmem>>, vector<16x16xf32>
    %1 = arith.truncf %0 : vector<16x16xf32> to vector<16x16xbf16>
    %c0_1 = arith.constant 0 : index
    %c0_2 = arith.constant 0 : index
    %2 = vector.load %arg2[%c0_1, %c0_2] : memref<16x256xbf16, #tpu.memory_space<vmem>>, vector<16x256xbf16>
    %cst = arith.constant dense<0.000000e+00> : vector<16x256xf32>
    %3 = tpu.matmul %1, %2, %cst {dimension_numbers = #tpu.dot_dimension_numbers<[1], [0], [0], [1], [0, 0, 1, 1], [], []>} : vector<16x16xbf16>, vector<16x256xbf16>, vector<16x256xf32> -> vector<16x256xf32>
    %c0_3 = arith.constant 0 : index
    %c0_4 = arith.constant 0 : index
    %4 = vector.load %arg3[%c0_3, %c0_4] : memref<1x256xf32, #tpu.memory_space<vmem>>, vector<1x256xf32>
    %5 = vector.broadcast %4 : vector<1x256xf32> to vector<16x256xf32>
    %6 = arith.addf %3, %5 : vector<16x256xf32>
    %7 = arith.truncf %6 : vector<16x256xf32> to vector<16x256xbf16>
    %c0_5 = arith.constant 0 : index
    %c0_6 = arith.constant 0 : index
    %8 = vector.load %arg4[%c0_5, %c0_6] : memref<16x256xbf16, #tpu.memory_space<vmem>>, vector<16x256xbf16>
    tpu.vector_store %arg4[%c0_5, %c0_6], %7 {strides = array<i32>} : memref<16x256xbf16, #tpu.memory_space<vmem>>, vector<16x256xbf16>,
    return
  }
  func.func @transform_0(%arg0: i32) -> (i32, i32) {
    %c0_i32 = arith.constant 0 : i32
    %c0_i32_0 = arith.constant 0 : i32
    return %arg0, %c0_i32 : i32, i32
  }
  func.func @transform_1(%arg0: i32) -> (i32, i32) {
    %c0_i32 = arith.constant 0 : i32
    %c0_i32_0 = arith.constant 0 : i32
    %c0_i32_1 = arith.constant 0 : i32
    return %c0_i32, %c0_i32_0 : i32, i32
  }
  func.func @transform_2(%arg0: i32) -> (i32, i32) {
    %c0_i32 = arith.constant 0 : i32
    %c0_i32_0 = arith.constant 0 : i32
    %c0_i32_1 = arith.constant 0 : i32
    return %c0_i32, %c0_i32_0 : i32, i32
  }
  func.func @transform_3(%arg0: i32) -> (i32, i32) {
    %c0_i32 = arith.constant 0 : i32
    %c0_i32_0 = arith.constant 0 : i32
    return %arg0, %c0_i32 : i32, i32
  }
}

module attributes {stable_mosaic.version = 11 : i64} {
  func.func @_bilstm_recurrence_kernel(%arg0: i32, %arg1: memref<16x128xbf16, #tpu.memory_space<vmem>>, %arg2: memref<16x128xbf16, #tpu.memory_space<vmem>>, %arg3: memref<2x1xi32, #tpu.memory_space<vmem>>, %arg4: memref<32x128xbf16, #tpu.memory_space<vmem>>, %arg5: memref<32x128xbf16, #tpu.memory_space<vmem>>, %arg6: memref<16x32xf32, #tpu.memory_space<vmem>>, %arg7: memref<16x32xf32, #tpu.memory_space<vmem>>, %arg8: memref<2x32xf32, #tpu.memory_space<vmem>>, %arg9: memref<2x32xf32, #tpu.memory_space<vmem>>, %arg10: memref<2x32xf32, #tpu.memory_space<vmem>>, %arg11: memref<2x32xf32, #tpu.memory_space<vmem>>) attributes {dimension_semantics = [#tpu.dimension_semantics<arbitrary>], iteration_bounds = array<i64: 1>, scalar_prefetch = 0 : i64, scratch_operands = 4 : i64, tpu.core_type = #tpu.core_type<tc>, window_params = [{transform_indices = @transform_0, window_bounds = array<i64: 16, 128>}, {transform_indices = @transform_1, window_bounds = array<i64: 16, 128>}, {pipeline_mode = #tpu.pipeline_mode<synchronous>, transform_indices = @transform_2, window_bounds = array<i64: 2, 1>}, {pipeline_mode = #tpu.pipeline_mode<synchronous>, transform_indices = @transform_3, window_bounds = array<i64: 32, 128>}, {pipeline_mode = #tpu.pipeline_mode<synchronous>, transform_indices = @transform_4, window_bounds = array<i64: 32, 128>}, {transform_indices = @transform_5, window_bounds = array<i64: 16, 32>}, {transform_indices = @transform_6, window_bounds = array<i64: 16, 32>}]} {
    %c0_i32 = arith.constant 0 : i32
    %0 = arith.cmpi eq, %arg0, %c0_i32 : i32
    %1 = arith.extui %0 : i1 to i32
    %c0_i32_0 = arith.constant 0 : i32
    %2 = arith.cmpi ne, %1, %c0_i32_0 : i32
    scf.if %2 {
      %cst_142 = arith.constant 0.000000e+00 : f32
      %582 = vector.broadcast %cst_142 : f32 to vector<2x32xf32>
      %c0_143 = arith.constant 0 : index
      %c0_144 = arith.constant 0 : index
      %583 = vector.load %arg8[%c0_143, %c0_144] : memref<2x32xf32, #tpu.memory_space<vmem>>, vector<2x32xf32>
      tpu.vector_store %arg8[%c0_143, %c0_144], %582 {strides = array<i32>} : memref<2x32xf32, #tpu.memory_space<vmem>>, vector<2x32xf32>,
      %c0_145 = arith.constant 0 : index
      %c0_146 = arith.constant 0 : index
      %584 = vector.load %arg9[%c0_145, %c0_146] : memref<2x32xf32, #tpu.memory_space<vmem>>, vector<2x32xf32>
      tpu.vector_store %arg9[%c0_145, %c0_146], %582 {strides = array<i32>} : memref<2x32xf32, #tpu.memory_space<vmem>>, vector<2x32xf32>,
      %c0_147 = arith.constant 0 : index
      %c0_148 = arith.constant 0 : index
      %585 = vector.load %arg10[%c0_147, %c0_148] : memref<2x32xf32, #tpu.memory_space<vmem>>, vector<2x32xf32>
      tpu.vector_store %arg10[%c0_147, %c0_148], %582 {strides = array<i32>} : memref<2x32xf32, #tpu.memory_space<vmem>>, vector<2x32xf32>,
      %c0_149 = arith.constant 0 : index
      %c0_150 = arith.constant 0 : index
      %586 = vector.load %arg11[%c0_149, %c0_150] : memref<2x32xf32, #tpu.memory_space<vmem>>, vector<2x32xf32>
      tpu.vector_store %arg11[%c0_149, %c0_150], %582 {strides = array<i32>} : memref<2x32xf32, #tpu.memory_space<vmem>>, vector<2x32xf32>,
    } else {
    }
    %c0 = arith.constant 0 : index
    %c0_1 = arith.constant 0 : index
    %3 = vector.load %arg3[%c0, %c0_1] : memref<2x1xi32, #tpu.memory_space<vmem>>, vector<2x1xi32>
    %c0_2 = arith.constant 0 : index
    %c0_3 = arith.constant 0 : index
    %4 = vector.load %arg4[%c0_2, %c0_3] : memref<32x128xbf16, #tpu.memory_space<vmem>>, vector<32x128xbf16>
    %c0_4 = arith.constant 0 : index
    %c0_5 = arith.constant 0 : index
    %5 = vector.load %arg5[%c0_4, %c0_5] : memref<32x128xbf16, #tpu.memory_space<vmem>>, vector<32x128xbf16>
    %c0_6 = arith.constant 0 : index
    %c0_7 = arith.constant 0 : index
    %6 = vector.load %arg8[%c0_6, %c0_7] : memref<2x32xf32, #tpu.memory_space<vmem>>, vector<2x32xf32>
    %c0_8 = arith.constant 0 : index
    %c0_9 = arith.constant 0 : index
    %7 = vector.load %arg9[%c0_8, %c0_9] : memref<2x32xf32, #tpu.memory_space<vmem>>, vector<2x32xf32>
    %c0_10 = arith.constant 0 : index
    %c0_11 = arith.constant 0 : index
    %8 = vector.load %arg10[%c0_10, %c0_11] : memref<2x32xf32, #tpu.memory_space<vmem>>, vector<2x32xf32>
    %c0_12 = arith.constant 0 : index
    %c0_13 = arith.constant 0 : index
    %9 = vector.load %arg11[%c0_12, %c0_13] : memref<2x32xf32, #tpu.memory_space<vmem>>, vector<2x32xf32>
    %c8_i32 = arith.constant 8 : i32
    %10 = arith.muli %arg0, %c8_i32 : i32
    %c0_i32_14 = arith.constant 0 : i32
    %11 = arith.addi %10, %c0_i32_14 : i32
    %c7_i32 = arith.constant 7 : i32
    %12 = arith.subi %c7_i32, %11 : i32
    %13 = arith.truncf %6 : vector<2x32xf32> to vector<2x32xbf16>
    %cst = arith.constant dense<0.000000e+00> : vector<2x128xf32>
    %14 = tpu.matmul %13, %4, %cst {dimension_numbers = #tpu.dot_dimension_numbers<[1], [0], [0], [1], [0, 0, 1, 1], [], []>} : vector<2x32xbf16>, vector<32x128xbf16>, vector<2x128xf32> -> vector<2x128xf32>
    %15 = arith.truncf %8 : vector<2x32xf32> to vector<2x32xbf16>
    %cst_15 = arith.constant dense<0.000000e+00> : vector<2x128xf32>
    %16 = tpu.matmul %15, %5, %cst_15 {dimension_numbers = #tpu.dot_dimension_numbers<[1], [0], [0], [1], [0, 0, 1, 1], [], []>} : vector<2x32xbf16>, vector<32x128xbf16>, vector<2x128xf32> -> vector<2x128xf32>
    %c0_16 = arith.constant 0 : index
    %c0_17 = arith.constant 0 : index
    %17 = vector.load %arg1[%c0_16, %c0_17] : memref<16x128xbf16, #tpu.memory_space<vmem>>, vector<2x128xbf16>
    %18 = arith.extf %17 : vector<2x128xbf16> to vector<2x128xf32>
    %19 = arith.addf %18, %14 : vector<2x128xf32>
    %c14 = arith.constant 14 : index
    %c0_18 = arith.constant 0 : index
    %20 = vector.load %arg2[%c14, %c0_18] : memref<16x128xbf16, #tpu.memory_space<vmem>>, vector<2x128xbf16>
    %21 = arith.extf %20 : vector<2x128xbf16> to vector<2x128xf32>
    %22 = arith.addf %21, %16 : vector<2x128xf32>
    %23 = vector.extract_strided_slice %19 {offsets = [0, 0], sizes = [2, 96], strides = [1, 1]} : vector<2x128xf32> to vector<2x96xf32>
    %24 = arith.negf %23 : vector<2x96xf32>
    %25 = math.exp %24 : vector<2x96xf32>
    %cst_19 = arith.constant 1.000000e+00 : f32
    %26 = vector.broadcast %cst_19 : f32 to vector<2x96xf32>
    %27 = arith.addf %26, %25 : vector<2x96xf32>
    %28 = arith.divf %26, %27 : vector<2x96xf32>
    %29 = vector.extract_strided_slice %19 {offsets = [0, 96], sizes = [2, 32], strides = [1, 1]} : vector<2x128xf32> to vector<2x32xf32>
    %30 = math.tanh %29 : vector<2x32xf32>
    %31 = vector.extract_strided_slice %28 {offsets = [0, 0], sizes = [2, 32], strides = [1, 1]} : vector<2x96xf32> to vector<2x32xf32>
    %32 = vector.extract_strided_slice %28 {offsets = [0, 32], sizes = [2, 32], strides = [1, 1]} : vector<2x96xf32> to vector<2x32xf32>
    %33 = vector.extract_strided_slice %28 {offsets = [0, 64], sizes = [2, 32], strides = [1, 1]} : vector<2x96xf32> to vector<2x32xf32>
    %34 = arith.mulf %32, %7 : vector<2x32xf32>
    %35 = arith.mulf %31, %30 : vector<2x32xf32>
    %36 = arith.addf %34, %35 : vector<2x32xf32>
    %37 = math.tanh %36 : vector<2x32xf32>
    %38 = arith.mulf %33, %37 : vector<2x32xf32>
    %39 = vector.extract_strided_slice %22 {offsets = [0, 0], sizes = [2, 96], strides = [1, 1]} : vector<2x128xf32> to vector<2x96xf32>
    %40 = arith.negf %39 : vector<2x96xf32>
    %41 = math.exp %40 : vector<2x96xf32>
    %cst_20 = arith.constant 1.000000e+00 : f32
    %42 = vector.broadcast %cst_20 : f32 to vector<2x96xf32>
    %43 = arith.addf %42, %41 : vector<2x96xf32>
    %44 = arith.divf %42, %43 : vector<2x96xf32>
    %45 = vector.extract_strided_slice %22 {offsets = [0, 96], sizes = [2, 32], strides = [1, 1]} : vector<2x128xf32> to vector<2x32xf32>
    %46 = math.tanh %45 : vector<2x32xf32>
    %47 = vector.extract_strided_slice %44 {offsets = [0, 0], sizes = [2, 32], strides = [1, 1]} : vector<2x96xf32> to vector<2x32xf32>
    %48 = vector.extract_strided_slice %44 {offsets = [0, 32], sizes = [2, 32], strides = [1, 1]} : vector<2x96xf32> to vector<2x32xf32>
    %49 = vector.extract_strided_slice %44 {offsets = [0, 64], sizes = [2, 32], strides = [1, 1]} : vector<2x96xf32> to vector<2x32xf32>
    %50 = arith.mulf %48, %9 : vector<2x32xf32>
    %51 = arith.mulf %47, %46 : vector<2x32xf32>
    %52 = arith.addf %50, %51 : vector<2x32xf32>
    %53 = math.tanh %52 : vector<2x32xf32>
    %54 = arith.mulf %49, %53 : vector<2x32xf32>
    %55 = vector.broadcast %11 : i32 to vector<2x1xi32>
    %56 = arith.cmpi slt, %55, %3 : vector<2x1xi32>
    %57 = arith.extui %56 : vector<2x1xi1> to vector<2x1xi32>
    %58 = arith.sitofp %57 : vector<2x1xi32> to vector<2x1xf32>
    %59 = vector.broadcast %12 : i32 to vector<2x1xi32>
    %60 = arith.cmpi slt, %59, %3 : vector<2x1xi32>
    %61 = arith.extui %60 : vector<2x1xi1> to vector<2x1xi32>
    %62 = arith.sitofp %61 : vector<2x1xi32> to vector<2x1xf32>
    %63 = vector.broadcast %58 : vector<2x1xf32> to vector<2x32xf32>
    %64 = arith.mulf %63, %38 : vector<2x32xf32>
    %c0_21 = arith.constant 0 : index
    %c0_22 = arith.constant 0 : index
    %65 = vector.load %arg6[%c0_21, %c0_22] : memref<16x32xf32, #tpu.memory_space<vmem>>, vector<2x32xf32>
    tpu.vector_store %arg6[%c0_21, %c0_22], %64 {strides = array<i32>} : memref<16x32xf32, #tpu.memory_space<vmem>>, vector<2x32xf32>,
    %66 = vector.broadcast %62 : vector<2x1xf32> to vector<2x32xf32>
    %67 = arith.mulf %66, %54 : vector<2x32xf32>
    %cst_23 = arith.constant 1.000000e+00 : f32
    %68 = vector.broadcast %cst_23 : f32 to vector<2x1xf32>
    %69 = arith.subf %68, %62 : vector<2x1xf32>
    %70 = vector.broadcast %69 : vector<2x1xf32> to vector<2x32xf32>
    %71 = arith.mulf %70, %8 : vector<2x32xf32>
    %72 = arith.addf %67, %71 : vector<2x32xf32>
    %73 = vector.broadcast %62 : vector<2x1xf32> to vector<2x32xf32>
    %74 = arith.mulf %73, %52 : vector<2x32xf32>
    %cst_24 = arith.constant 1.000000e+00 : f32
    %75 = vector.broadcast %cst_24 : f32 to vector<2x1xf32>
    %76 = arith.subf %75, %62 : vector<2x1xf32>
    %77 = vector.broadcast %76 : vector<2x1xf32> to vector<2x32xf32>
    %78 = arith.mulf %77, %9 : vector<2x32xf32>
    %79 = arith.addf %74, %78 : vector<2x32xf32>
    %c14_25 = arith.constant 14 : index
    %c0_26 = arith.constant 0 : index
    %80 = vector.load %arg7[%c14_25, %c0_26] : memref<16x32xf32, #tpu.memory_space<vmem>>, vector<2x32xf32>
    tpu.vector_store %arg7[%c14_25, %c0_26], %72 {strides = array<i32>} : memref<16x32xf32, #tpu.memory_space<vmem>>, vector<2x32xf32>,
    %c8_i32_27 = arith.constant 8 : i32
    %81 = arith.muli %arg0, %c8_i32_27 : i32
    %c1_i32 = arith.constant 1 : i32
    %82 = arith.addi %81, %c1_i32 : i32
    %c7_i32_28 = arith.constant 7 : i32
    %83 = arith.subi %c7_i32_28, %82 : i32
    %84 = arith.truncf %38 : vector<2x32xf32> to vector<2x32xbf16>
    %cst_29 = arith.constant dense<0.000000e+00> : vector<2x128xf32>
    %85 = tpu.matmul %84, %4, %cst_29 {dimension_numbers = #tpu.dot_dimension_numbers<[1], [0], [0], [1], [0, 0, 1, 1], [], []>} : vector<2x32xbf16>, vector<32x128xbf16>, vector<2x128xf32> -> vector<2x128xf32>
    %86 = arith.truncf %72 : vector<2x32xf32> to vector<2x32xbf16>
    %cst_30 = arith.constant dense<0.000000e+00> : vector<2x128xf32>
    %87 = tpu.matmul %86, %5, %cst_30 {dimension_numbers = #tpu.dot_dimension_numbers<[1], [0], [0], [1], [0, 0, 1, 1], [], []>} : vector<2x32xbf16>, vector<32x128xbf16>, vector<2x128xf32> -> vector<2x128xf32>
    %c2 = arith.constant 2 : index
    %c0_31 = arith.constant 0 : index
    %88 = vector.load %arg1[%c2, %c0_31] : memref<16x128xbf16, #tpu.memory_space<vmem>>, vector<2x128xbf16>
    %89 = arith.extf %88 : vector<2x128xbf16> to vector<2x128xf32>
    %90 = arith.addf %89, %85 : vector<2x128xf32>
    %c12 = arith.constant 12 : index
    %c0_32 = arith.constant 0 : index
    %91 = vector.load %arg2[%c12, %c0_32] : memref<16x128xbf16, #tpu.memory_space<vmem>>, vector<2x128xbf16>
    %92 = arith.extf %91 : vector<2x128xbf16> to vector<2x128xf32>
    %93 = arith.addf %92, %87 : vector<2x128xf32>
    %94 = vector.extract_strided_slice %90 {offsets = [0, 0], sizes = [2, 96], strides = [1, 1]} : vector<2x128xf32> to vector<2x96xf32>
    %95 = arith.negf %94 : vector<2x96xf32>
    %96 = math.exp %95 : vector<2x96xf32>
    %cst_33 = arith.constant 1.000000e+00 : f32
    %97 = vector.broadcast %cst_33 : f32 to vector<2x96xf32>
    %98 = arith.addf %97, %96 : vector<2x96xf32>
    %99 = arith.divf %97, %98 : vector<2x96xf32>
    %100 = vector.extract_strided_slice %90 {offsets = [0, 96], sizes = [2, 32], strides = [1, 1]} : vector<2x128xf32> to vector<2x32xf32>
    %101 = math.tanh %100 : vector<2x32xf32>
    %102 = vector.extract_strided_slice %99 {offsets = [0, 0], sizes = [2, 32], strides = [1, 1]} : vector<2x96xf32> to vector<2x32xf32>
    %103 = vector.extract_strided_slice %99 {offsets = [0, 32], sizes = [2, 32], strides = [1, 1]} : vector<2x96xf32> to vector<2x32xf32>
    %104 = vector.extract_strided_slice %99 {offsets = [0, 64], sizes = [2, 32], strides = [1, 1]} : vector<2x96xf32> to vector<2x32xf32>
    %105 = arith.mulf %103, %36 : vector<2x32xf32>
    %106 = arith.mulf %102, %101 : vector<2x32xf32>
    %107 = arith.addf %105, %106 : vector<2x32xf32>
    %108 = math.tanh %107 : vector<2x32xf32>
    %109 = arith.mulf %104, %108 : vector<2x32xf32>
    %110 = vector.extract_strided_slice %93 {offsets = [0, 0], sizes = [2, 96], strides = [1, 1]} : vector<2x128xf32> to vector<2x96xf32>
    %111 = arith.negf %110 : vector<2x96xf32>
    %112 = math.exp %111 : vector<2x96xf32>
    %cst_34 = arith.constant 1.000000e+00 : f32
    %113 = vector.broadcast %cst_34 : f32 to vector<2x96xf32>
    %114 = arith.addf %113, %112 : vector<2x96xf32>
    %115 = arith.divf %113, %114 : vector<2x96xf32>
    %116 = vector.extract_strided_slice %93 {offsets = [0, 96], sizes = [2, 32], strides = [1, 1]} : vector<2x128xf32> to vector<2x32xf32>
    %117 = math.tanh %116 : vector<2x32xf32>
    %118 = vector.extract_strided_slice %115 {offsets = [0, 0], sizes = [2, 32], strides = [1, 1]} : vector<2x96xf32> to vector<2x32xf32>
    %119 = vector.extract_strided_slice %115 {offsets = [0, 32], sizes = [2, 32], strides = [1, 1]} : vector<2x96xf32> to vector<2x32xf32>
    %120 = vector.extract_strided_slice %115 {offsets = [0, 64], sizes = [2, 32], strides = [1, 1]} : vector<2x96xf32> to vector<2x32xf32>
    %121 = arith.mulf %119, %79 : vector<2x32xf32>
    %122 = arith.mulf %118, %117 : vector<2x32xf32>
    %123 = arith.addf %121, %122 : vector<2x32xf32>
    %124 = math.tanh %123 : vector<2x32xf32>
    %125 = arith.mulf %120, %124 : vector<2x32xf32>
    %126 = vector.broadcast %82 : i32 to vector<2x1xi32>
    %127 = arith.cmpi slt, %126, %3 : vector<2x1xi32>
    %128 = arith.extui %127 : vector<2x1xi1> to vector<2x1xi32>
    %129 = arith.sitofp %128 : vector<2x1xi32> to vector<2x1xf32>
    %130 = vector.broadcast %83 : i32 to vector<2x1xi32>
    %131 = arith.cmpi slt, %130, %3 : vector<2x1xi32>
    %132 = arith.extui %131 : vector<2x1xi1> to vector<2x1xi32>
    %133 = arith.sitofp %132 : vector<2x1xi32> to vector<2x1xf32>
    %134 = vector.broadcast %129 : vector<2x1xf32> to vector<2x32xf32>
    %135 = arith.mulf %134, %109 : vector<2x32xf32>
    %c2_35 = arith.constant 2 : index
    %c0_36 = arith.constant 0 : index
    %136 = vector.load %arg6[%c2_35, %c0_36] : memref<16x32xf32, #tpu.memory_space<vmem>>, vector<2x32xf32>
    tpu.vector_store %arg6[%c2_35, %c0_36], %135 {strides = array<i32>} : memref<16x32xf32, #tpu.memory_space<vmem>>, vector<2x32xf32>,
    %137 = vector.broadcast %133 : vector<2x1xf32> to vector<2x32xf32>
    %138 = arith.mulf %137, %125 : vector<2x32xf32>
    %cst_37 = arith.constant 1.000000e+00 : f32
    %139 = vector.broadcast %cst_37 : f32 to vector<2x1xf32>
    %140 = arith.subf %139, %133 : vector<2x1xf32>
    %141 = vector.broadcast %140 : vector<2x1xf32> to vector<2x32xf32>
    %142 = arith.mulf %141, %72 : vector<2x32xf32>
    %143 = arith.addf %138, %142 : vector<2x32xf32>
    %144 = vector.broadcast %133 : vector<2x1xf32> to vector<2x32xf32>
    %145 = arith.mulf %144, %123 : vector<2x32xf32>
    %cst_38 = arith.constant 1.000000e+00 : f32
    %146 = vector.broadcast %cst_38 : f32 to vector<2x1xf32>
    %147 = arith.subf %146, %133 : vector<2x1xf32>
    %148 = vector.broadcast %147 : vector<2x1xf32> to vector<2x32xf32>
    %149 = arith.mulf %148, %79 : vector<2x32xf32>
    %150 = arith.addf %145, %149 : vector<2x32xf32>
    %c12_39 = arith.constant 12 : index
    %c0_40 = arith.constant 0 : index
    %151 = vector.load %arg7[%c12_39, %c0_40] : memref<16x32xf32, #tpu.memory_space<vmem>>, vector<2x32xf32>
    tpu.vector_store %arg7[%c12_39, %c0_40], %143 {strides = array<i32>} : memref<16x32xf32, #tpu.memory_space<vmem>>, vector<2x32xf32>,
    %c8_i32_41 = arith.constant 8 : i32
    %152 = arith.muli %arg0, %c8_i32_41 : i32
    %c2_i32 = arith.constant 2 : i32
    %153 = arith.addi %152, %c2_i32 : i32
    %c7_i32_42 = arith.constant 7 : i32
    %154 = arith.subi %c7_i32_42, %153 : i32
    %155 = arith.truncf %109 : vector<2x32xf32> to vector<2x32xbf16>
    %cst_43 = arith.constant dense<0.000000e+00> : vector<2x128xf32>
    %156 = tpu.matmul %155, %4, %cst_43 {dimension_numbers = #tpu.dot_dimension_numbers<[1], [0], [0], [1], [0, 0, 1, 1], [], []>} : vector<2x32xbf16>, vector<32x128xbf16>, vector<2x128xf32> -> vector<2x128xf32>
    %157 = arith.truncf %143 : vector<2x32xf32> to vector<2x32xbf16>
    %cst_44 = arith.constant dense<0.000000e+00> : vector<2x128xf32>
    %158 = tpu.matmul %157, %5, %cst_44 {dimension_numbers = #tpu.dot_dimension_numbers<[1], [0], [0], [1], [0, 0, 1, 1], [], []>} : vector<2x32xbf16>, vector<32x128xbf16>, vector<2x128xf32> -> vector<2x128xf32>
    %c4 = arith.constant 4 : index
    %c0_45 = arith.constant 0 : index
    %159 = vector.load %arg1[%c4, %c0_45] : memref<16x128xbf16, #tpu.memory_space<vmem>>, vector<2x128xbf16>
    %160 = arith.extf %159 : vector<2x128xbf16> to vector<2x128xf32>
    %161 = arith.addf %160, %156 : vector<2x128xf32>
    %c10 = arith.constant 10 : index
    %c0_46 = arith.constant 0 : index
    %162 = vector.load %arg2[%c10, %c0_46] : memref<16x128xbf16, #tpu.memory_space<vmem>>, vector<2x128xbf16>
    %163 = arith.extf %162 : vector<2x128xbf16> to vector<2x128xf32>
    %164 = arith.addf %163, %158 : vector<2x128xf32>
    %165 = vector.extract_strided_slice %161 {offsets = [0, 0], sizes = [2, 96], strides = [1, 1]} : vector<2x128xf32> to vector<2x96xf32>
    %166 = arith.negf %165 : vector<2x96xf32>
    %167 = math.exp %166 : vector<2x96xf32>
    %cst_47 = arith.constant 1.000000e+00 : f32
    %168 = vector.broadcast %cst_47 : f32 to vector<2x96xf32>
    %169 = arith.addf %168, %167 : vector<2x96xf32>
    %170 = arith.divf %168, %169 : vector<2x96xf32>
    %171 = vector.extract_strided_slice %161 {offsets = [0, 96], sizes = [2, 32], strides = [1, 1]} : vector<2x128xf32> to vector<2x32xf32>
    %172 = math.tanh %171 : vector<2x32xf32>
    %173 = vector.extract_strided_slice %170 {offsets = [0, 0], sizes = [2, 32], strides = [1, 1]} : vector<2x96xf32> to vector<2x32xf32>
    %174 = vector.extract_strided_slice %170 {offsets = [0, 32], sizes = [2, 32], strides = [1, 1]} : vector<2x96xf32> to vector<2x32xf32>
    %175 = vector.extract_strided_slice %170 {offsets = [0, 64], sizes = [2, 32], strides = [1, 1]} : vector<2x96xf32> to vector<2x32xf32>
    %176 = arith.mulf %174, %107 : vector<2x32xf32>
    %177 = arith.mulf %173, %172 : vector<2x32xf32>
    %178 = arith.addf %176, %177 : vector<2x32xf32>
    %179 = math.tanh %178 : vector<2x32xf32>
    %180 = arith.mulf %175, %179 : vector<2x32xf32>
    %181 = vector.extract_strided_slice %164 {offsets = [0, 0], sizes = [2, 96], strides = [1, 1]} : vector<2x128xf32> to vector<2x96xf32>
    %182 = arith.negf %181 : vector<2x96xf32>
    %183 = math.exp %182 : vector<2x96xf32>
    %cst_48 = arith.constant 1.000000e+00 : f32
    %184 = vector.broadcast %cst_48 : f32 to vector<2x96xf32>
    %185 = arith.addf %184, %183 : vector<2x96xf32>
    %186 = arith.divf %184, %185 : vector<2x96xf32>
    %187 = vector.extract_strided_slice %164 {offsets = [0, 96], sizes = [2, 32], strides = [1, 1]} : vector<2x128xf32> to vector<2x32xf32>
    %188 = math.tanh %187 : vector<2x32xf32>
    %189 = vector.extract_strided_slice %186 {offsets = [0, 0], sizes = [2, 32], strides = [1, 1]} : vector<2x96xf32> to vector<2x32xf32>
    %190 = vector.extract_strided_slice %186 {offsets = [0, 32], sizes = [2, 32], strides = [1, 1]} : vector<2x96xf32> to vector<2x32xf32>
    %191 = vector.extract_strided_slice %186 {offsets = [0, 64], sizes = [2, 32], strides = [1, 1]} : vector<2x96xf32> to vector<2x32xf32>
    %192 = arith.mulf %190, %150 : vector<2x32xf32>
    %193 = arith.mulf %189, %188 : vector<2x32xf32>
    %194 = arith.addf %192, %193 : vector<2x32xf32>
    %195 = math.tanh %194 : vector<2x32xf32>
    %196 = arith.mulf %191, %195 : vector<2x32xf32>
    %197 = vector.broadcast %153 : i32 to vector<2x1xi32>
    %198 = arith.cmpi slt, %197, %3 : vector<2x1xi32>
    %199 = arith.extui %198 : vector<2x1xi1> to vector<2x1xi32>
    %200 = arith.sitofp %199 : vector<2x1xi32> to vector<2x1xf32>
    %201 = vector.broadcast %154 : i32 to vector<2x1xi32>
    %202 = arith.cmpi slt, %201, %3 : vector<2x1xi32>
    %203 = arith.extui %202 : vector<2x1xi1> to vector<2x1xi32>
    %204 = arith.sitofp %203 : vector<2x1xi32> to vector<2x1xf32>
    %205 = vector.broadcast %200 : vector<2x1xf32> to vector<2x32xf32>
    %206 = arith.mulf %205, %180 : vector<2x32xf32>
    %c4_49 = arith.constant 4 : index
    %c0_50 = arith.constant 0 : index
    %207 = vector.load %arg6[%c4_49, %c0_50] : memref<16x32xf32, #tpu.memory_space<vmem>>, vector<2x32xf32>
    tpu.vector_store %arg6[%c4_49, %c0_50], %206 {strides = array<i32>} : memref<16x32xf32, #tpu.memory_space<vmem>>, vector<2x32xf32>,
    %208 = vector.broadcast %204 : vector<2x1xf32> to vector<2x32xf32>
    %209 = arith.mulf %208, %196 : vector<2x32xf32>
    %cst_51 = arith.constant 1.000000e+00 : f32
    %210 = vector.broadcast %cst_51 : f32 to vector<2x1xf32>
    %211 = arith.subf %210, %204 : vector<2x1xf32>
    %212 = vector.broadcast %211 : vector<2x1xf32> to vector<2x32xf32>
    %213 = arith.mulf %212, %143 : vector<2x32xf32>
    %214 = arith.addf %209, %213 : vector<2x32xf32>
    %215 = vector.broadcast %204 : vector<2x1xf32> to vector<2x32xf32>
    %216 = arith.mulf %215, %194 : vector<2x32xf32>
    %cst_52 = arith.constant 1.000000e+00 : f32
    %217 = vector.broadcast %cst_52 : f32 to vector<2x1xf32>
    %218 = arith.subf %217, %204 : vector<2x1xf32>
    %219 = vector.broadcast %218 : vector<2x1xf32> to vector<2x32xf32>
    %220 = arith.mulf %219, %150 : vector<2x32xf32>
    %221 = arith.addf %216, %220 : vector<2x32xf32>
    %c10_53 = arith.constant 10 : index
    %c0_54 = arith.constant 0 : index
    %222 = vector.load %arg7[%c10_53, %c0_54] : memref<16x32xf32, #tpu.memory_space<vmem>>, vector<2x32xf32>
    tpu.vector_store %arg7[%c10_53, %c0_54], %214 {strides = array<i32>} : memref<16x32xf32, #tpu.memory_space<vmem>>, vector<2x32xf32>,
    %c8_i32_55 = arith.constant 8 : i32
    %223 = arith.muli %arg0, %c8_i32_55 : i32
    %c3_i32 = arith.constant 3 : i32
    %224 = arith.addi %223, %c3_i32 : i32
    %c7_i32_56 = arith.constant 7 : i32
    %225 = arith.subi %c7_i32_56, %224 : i32
    %226 = arith.truncf %180 : vector<2x32xf32> to vector<2x32xbf16>
    %cst_57 = arith.constant dense<0.000000e+00> : vector<2x128xf32>
    %227 = tpu.matmul %226, %4, %cst_57 {dimension_numbers = #tpu.dot_dimension_numbers<[1], [0], [0], [1], [0, 0, 1, 1], [], []>} : vector<2x32xbf16>, vector<32x128xbf16>, vector<2x128xf32> -> vector<2x128xf32>
    %228 = arith.truncf %214 : vector<2x32xf32> to vector<2x32xbf16>
    %cst_58 = arith.constant dense<0.000000e+00> : vector<2x128xf32>
    %229 = tpu.matmul %228, %5, %cst_58 {dimension_numbers = #tpu.dot_dimension_numbers<[1], [0], [0], [1], [0, 0, 1, 1], [], []>} : vector<2x32xbf16>, vector<32x128xbf16>, vector<2x128xf32> -> vector<2x128xf32>
    %c6 = arith.constant 6 : index
    %c0_59 = arith.constant 0 : index
    %230 = vector.load %arg1[%c6, %c0_59] : memref<16x128xbf16, #tpu.memory_space<vmem>>, vector<2x128xbf16>
    %231 = arith.extf %230 : vector<2x128xbf16> to vector<2x128xf32>
    %232 = arith.addf %231, %227 : vector<2x128xf32>
    %c8 = arith.constant 8 : index
    %c0_60 = arith.constant 0 : index
    %233 = vector.load %arg2[%c8, %c0_60] : memref<16x128xbf16, #tpu.memory_space<vmem>>, vector<2x128xbf16>
    %234 = arith.extf %233 : vector<2x128xbf16> to vector<2x128xf32>
    %235 = arith.addf %234, %229 : vector<2x128xf32>
    %236 = vector.extract_strided_slice %232 {offsets = [0, 0], sizes = [2, 96], strides = [1, 1]} : vector<2x128xf32> to vector<2x96xf32>
    %237 = arith.negf %236 : vector<2x96xf32>
    %238 = math.exp %237 : vector<2x96xf32>
    %cst_61 = arith.constant 1.000000e+00 : f32
    %239 = vector.broadcast %cst_61 : f32 to vector<2x96xf32>
    %240 = arith.addf %239, %238 : vector<2x96xf32>
    %241 = arith.divf %239, %240 : vector<2x96xf32>
    %242 = vector.extract_strided_slice %232 {offsets = [0, 96], sizes = [2, 32], strides = [1, 1]} : vector<2x128xf32> to vector<2x32xf32>
    %243 = math.tanh %242 : vector<2x32xf32>
    %244 = vector.extract_strided_slice %241 {offsets = [0, 0], sizes = [2, 32], strides = [1, 1]} : vector<2x96xf32> to vector<2x32xf32>
    %245 = vector.extract_strided_slice %241 {offsets = [0, 32], sizes = [2, 32], strides = [1, 1]} : vector<2x96xf32> to vector<2x32xf32>
    %246 = vector.extract_strided_slice %241 {offsets = [0, 64], sizes = [2, 32], strides = [1, 1]} : vector<2x96xf32> to vector<2x32xf32>
    %247 = arith.mulf %245, %178 : vector<2x32xf32>
    %248 = arith.mulf %244, %243 : vector<2x32xf32>
    %249 = arith.addf %247, %248 : vector<2x32xf32>
    %250 = math.tanh %249 : vector<2x32xf32>
    %251 = arith.mulf %246, %250 : vector<2x32xf32>
    %252 = vector.extract_strided_slice %235 {offsets = [0, 0], sizes = [2, 96], strides = [1, 1]} : vector<2x128xf32> to vector<2x96xf32>
    %253 = arith.negf %252 : vector<2x96xf32>
    %254 = math.exp %253 : vector<2x96xf32>
    %cst_62 = arith.constant 1.000000e+00 : f32
    %255 = vector.broadcast %cst_62 : f32 to vector<2x96xf32>
    %256 = arith.addf %255, %254 : vector<2x96xf32>
    %257 = arith.divf %255, %256 : vector<2x96xf32>
    %258 = vector.extract_strided_slice %235 {offsets = [0, 96], sizes = [2, 32], strides = [1, 1]} : vector<2x128xf32> to vector<2x32xf32>
    %259 = math.tanh %258 : vector<2x32xf32>
    %260 = vector.extract_strided_slice %257 {offsets = [0, 0], sizes = [2, 32], strides = [1, 1]} : vector<2x96xf32> to vector<2x32xf32>
    %261 = vector.extract_strided_slice %257 {offsets = [0, 32], sizes = [2, 32], strides = [1, 1]} : vector<2x96xf32> to vector<2x32xf32>
    %262 = vector.extract_strided_slice %257 {offsets = [0, 64], sizes = [2, 32], strides = [1, 1]} : vector<2x96xf32> to vector<2x32xf32>
    %263 = arith.mulf %261, %221 : vector<2x32xf32>
    %264 = arith.mulf %260, %259 : vector<2x32xf32>
    %265 = arith.addf %263, %264 : vector<2x32xf32>
    %266 = math.tanh %265 : vector<2x32xf32>
    %267 = arith.mulf %262, %266 : vector<2x32xf32>
    %268 = vector.broadcast %224 : i32 to vector<2x1xi32>
    %269 = arith.cmpi slt, %268, %3 : vector<2x1xi32>
    %270 = arith.extui %269 : vector<2x1xi1> to vector<2x1xi32>
    %271 = arith.sitofp %270 : vector<2x1xi32> to vector<2x1xf32>
    %272 = vector.broadcast %225 : i32 to vector<2x1xi32>
    %273 = arith.cmpi slt, %272, %3 : vector<2x1xi32>
    %274 = arith.extui %273 : vector<2x1xi1> to vector<2x1xi32>
    %275 = arith.sitofp %274 : vector<2x1xi32> to vector<2x1xf32>
    %276 = vector.broadcast %271 : vector<2x1xf32> to vector<2x32xf32>
    %277 = arith.mulf %276, %251 : vector<2x32xf32>
    %c6_63 = arith.constant 6 : index
    %c0_64 = arith.constant 0 : index
    %278 = vector.load %arg6[%c6_63, %c0_64] : memref<16x32xf32, #tpu.memory_space<vmem>>, vector<2x32xf32>
    tpu.vector_store %arg6[%c6_63, %c0_64], %277 {strides = array<i32>} : memref<16x32xf32, #tpu.memory_space<vmem>>, vector<2x32xf32>,
    %279 = vector.broadcast %275 : vector<2x1xf32> to vector<2x32xf32>
    %280 = arith.mulf %279, %267 : vector<2x32xf32>
    %cst_65 = arith.constant 1.000000e+00 : f32
    %281 = vector.broadcast %cst_65 : f32 to vector<2x1xf32>
    %282 = arith.subf %281, %275 : vector<2x1xf32>
    %283 = vector.broadcast %282 : vector<2x1xf32> to vector<2x32xf32>
    %284 = arith.mulf %283, %214 : vector<2x32xf32>
    %285 = arith.addf %280, %284 : vector<2x32xf32>
    %286 = vector.broadcast %275 : vector<2x1xf32> to vector<2x32xf32>
    %287 = arith.mulf %286, %265 : vector<2x32xf32>
    %cst_66 = arith.constant 1.000000e+00 : f32
    %288 = vector.broadcast %cst_66 : f32 to vector<2x1xf32>
    %289 = arith.subf %288, %275 : vector<2x1xf32>
    %290 = vector.broadcast %289 : vector<2x1xf32> to vector<2x32xf32>
    %291 = arith.mulf %290, %221 : vector<2x32xf32>
    %292 = arith.addf %287, %291 : vector<2x32xf32>
    %c8_67 = arith.constant 8 : index
    %c0_68 = arith.constant 0 : index
    %293 = vector.load %arg7[%c8_67, %c0_68] : memref<16x32xf32, #tpu.memory_space<vmem>>, vector<2x32xf32>
    tpu.vector_store %arg7[%c8_67, %c0_68], %285 {strides = array<i32>} : memref<16x32xf32, #tpu.memory_space<vmem>>, vector<2x32xf32>,
    %c8_i32_69 = arith.constant 8 : i32
    %294 = arith.muli %arg0, %c8_i32_69 : i32
    %c4_i32 = arith.constant 4 : i32
    %295 = arith.addi %294, %c4_i32 : i32
    %c7_i32_70 = arith.constant 7 : i32
    %296 = arith.subi %c7_i32_70, %295 : i32
    %297 = arith.truncf %251 : vector<2x32xf32> to vector<2x32xbf16>
    %cst_71 = arith.constant dense<0.000000e+00> : vector<2x128xf32>
    %298 = tpu.matmul %297, %4, %cst_71 {dimension_numbers = #tpu.dot_dimension_numbers<[1], [0], [0], [1], [0, 0, 1, 1], [], []>} : vector<2x32xbf16>, vector<32x128xbf16>, vector<2x128xf32> -> vector<2x128xf32>
    %299 = arith.truncf %285 : vector<2x32xf32> to vector<2x32xbf16>
    %cst_72 = arith.constant dense<0.000000e+00> : vector<2x128xf32>
    %300 = tpu.matmul %299, %5, %cst_72 {dimension_numbers = #tpu.dot_dimension_numbers<[1], [0], [0], [1], [0, 0, 1, 1], [], []>} : vector<2x32xbf16>, vector<32x128xbf16>, vector<2x128xf32> -> vector<2x128xf32>
    %c8_73 = arith.constant 8 : index
    %c0_74 = arith.constant 0 : index
    %301 = vector.load %arg1[%c8_73, %c0_74] : memref<16x128xbf16, #tpu.memory_space<vmem>>, vector<2x128xbf16>
    %302 = arith.extf %301 : vector<2x128xbf16> to vector<2x128xf32>
    %303 = arith.addf %302, %298 : vector<2x128xf32>
    %c6_75 = arith.constant 6 : index
    %c0_76 = arith.constant 0 : index
    %304 = vector.load %arg2[%c6_75, %c0_76] : memref<16x128xbf16, #tpu.memory_space<vmem>>, vector<2x128xbf16>
    %305 = arith.extf %304 : vector<2x128xbf16> to vector<2x128xf32>
    %306 = arith.addf %305, %300 : vector<2x128xf32>
    %307 = vector.extract_strided_slice %303 {offsets = [0, 0], sizes = [2, 96], strides = [1, 1]} : vector<2x128xf32> to vector<2x96xf32>
    %308 = arith.negf %307 : vector<2x96xf32>
    %309 = math.exp %308 : vector<2x96xf32>
    %cst_77 = arith.constant 1.000000e+00 : f32
    %310 = vector.broadcast %cst_77 : f32 to vector<2x96xf32>
    %311 = arith.addf %310, %309 : vector<2x96xf32>
    %312 = arith.divf %310, %311 : vector<2x96xf32>
    %313 = vector.extract_strided_slice %303 {offsets = [0, 96], sizes = [2, 32], strides = [1, 1]} : vector<2x128xf32> to vector<2x32xf32>
    %314 = math.tanh %313 : vector<2x32xf32>
    %315 = vector.extract_strided_slice %312 {offsets = [0, 0], sizes = [2, 32], strides = [1, 1]} : vector<2x96xf32> to vector<2x32xf32>
    %316 = vector.extract_strided_slice %312 {offsets = [0, 32], sizes = [2, 32], strides = [1, 1]} : vector<2x96xf32> to vector<2x32xf32>
    %317 = vector.extract_strided_slice %312 {offsets = [0, 64], sizes = [2, 32], strides = [1, 1]} : vector<2x96xf32> to vector<2x32xf32>
    %318 = arith.mulf %316, %249 : vector<2x32xf32>
    %319 = arith.mulf %315, %314 : vector<2x32xf32>
    %320 = arith.addf %318, %319 : vector<2x32xf32>
    %321 = math.tanh %320 : vector<2x32xf32>
    %322 = arith.mulf %317, %321 : vector<2x32xf32>
    %323 = vector.extract_strided_slice %306 {offsets = [0, 0], sizes = [2, 96], strides = [1, 1]} : vector<2x128xf32> to vector<2x96xf32>
    %324 = arith.negf %323 : vector<2x96xf32>
    %325 = math.exp %324 : vector<2x96xf32>
    %cst_78 = arith.constant 1.000000e+00 : f32
    %326 = vector.broadcast %cst_78 : f32 to vector<2x96xf32>
    %327 = arith.addf %326, %325 : vector<2x96xf32>
    %328 = arith.divf %326, %327 : vector<2x96xf32>
    %329 = vector.extract_strided_slice %306 {offsets = [0, 96], sizes = [2, 32], strides = [1, 1]} : vector<2x128xf32> to vector<2x32xf32>
    %330 = math.tanh %329 : vector<2x32xf32>
    %331 = vector.extract_strided_slice %328 {offsets = [0, 0], sizes = [2, 32], strides = [1, 1]} : vector<2x96xf32> to vector<2x32xf32>
    %332 = vector.extract_strided_slice %328 {offsets = [0, 32], sizes = [2, 32], strides = [1, 1]} : vector<2x96xf32> to vector<2x32xf32>
    %333 = vector.extract_strided_slice %328 {offsets = [0, 64], sizes = [2, 32], strides = [1, 1]} : vector<2x96xf32> to vector<2x32xf32>
    %334 = arith.mulf %332, %292 : vector<2x32xf32>
    %335 = arith.mulf %331, %330 : vector<2x32xf32>
    %336 = arith.addf %334, %335 : vector<2x32xf32>
    %337 = math.tanh %336 : vector<2x32xf32>
    %338 = arith.mulf %333, %337 : vector<2x32xf32>
    %339 = vector.broadcast %295 : i32 to vector<2x1xi32>
    %340 = arith.cmpi slt, %339, %3 : vector<2x1xi32>
    %341 = arith.extui %340 : vector<2x1xi1> to vector<2x1xi32>
    %342 = arith.sitofp %341 : vector<2x1xi32> to vector<2x1xf32>
    %343 = vector.broadcast %296 : i32 to vector<2x1xi32>
    %344 = arith.cmpi slt, %343, %3 : vector<2x1xi32>
    %345 = arith.extui %344 : vector<2x1xi1> to vector<2x1xi32>
    %346 = arith.sitofp %345 : vector<2x1xi32> to vector<2x1xf32>
    %347 = vector.broadcast %342 : vector<2x1xf32> to vector<2x32xf32>
    %348 = arith.mulf %347, %322 : vector<2x32xf32>
    %c8_79 = arith.constant 8 : index
    %c0_80 = arith.constant 0 : index
    %349 = vector.load %arg6[%c8_79, %c0_80] : memref<16x32xf32, #tpu.memory_space<vmem>>, vector<2x32xf32>
    tpu.vector_store %arg6[%c8_79, %c0_80], %348 {strides = array<i32>} : memref<16x32xf32, #tpu.memory_space<vmem>>, vector<2x32xf32>,
    %350 = vector.broadcast %346 : vector<2x1xf32> to vector<2x32xf32>
    %351 = arith.mulf %350, %338 : vector<2x32xf32>
    %cst_81 = arith.constant 1.000000e+00 : f32
    %352 = vector.broadcast %cst_81 : f32 to vector<2x1xf32>
    %353 = arith.subf %352, %346 : vector<2x1xf32>
    %354 = vector.broadcast %353 : vector<2x1xf32> to vector<2x32xf32>
    %355 = arith.mulf %354, %285 : vector<2x32xf32>
    %356 = arith.addf %351, %355 : vector<2x32xf32>
    %357 = vector.broadcast %346 : vector<2x1xf32> to vector<2x32xf32>
    %358 = arith.mulf %357, %336 : vector<2x32xf32>
    %cst_82 = arith.constant 1.000000e+00 : f32
    %359 = vector.broadcast %cst_82 : f32 to vector<2x1xf32>
    %360 = arith.subf %359, %346 : vector<2x1xf32>
    %361 = vector.broadcast %360 : vector<2x1xf32> to vector<2x32xf32>
    %362 = arith.mulf %361, %292 : vector<2x32xf32>
    %363 = arith.addf %358, %362 : vector<2x32xf32>
    %c6_83 = arith.constant 6 : index
    %c0_84 = arith.constant 0 : index
    %364 = vector.load %arg7[%c6_83, %c0_84] : memref<16x32xf32, #tpu.memory_space<vmem>>, vector<2x32xf32>
    tpu.vector_store %arg7[%c6_83, %c0_84], %356 {strides = array<i32>} : memref<16x32xf32, #tpu.memory_space<vmem>>, vector<2x32xf32>,
    %c8_i32_85 = arith.constant 8 : i32
    %365 = arith.muli %arg0, %c8_i32_85 : i32
    %c5_i32 = arith.constant 5 : i32
    %366 = arith.addi %365, %c5_i32 : i32
    %c7_i32_86 = arith.constant 7 : i32
    %367 = arith.subi %c7_i32_86, %366 : i32
    %368 = arith.truncf %322 : vector<2x32xf32> to vector<2x32xbf16>
    %cst_87 = arith.constant dense<0.000000e+00> : vector<2x128xf32>
    %369 = tpu.matmul %368, %4, %cst_87 {dimension_numbers = #tpu.dot_dimension_numbers<[1], [0], [0], [1], [0, 0, 1, 1], [], []>} : vector<2x32xbf16>, vector<32x128xbf16>, vector<2x128xf32> -> vector<2x128xf32>
    %370 = arith.truncf %356 : vector<2x32xf32> to vector<2x32xbf16>
    %cst_88 = arith.constant dense<0.000000e+00> : vector<2x128xf32>
    %371 = tpu.matmul %370, %5, %cst_88 {dimension_numbers = #tpu.dot_dimension_numbers<[1], [0], [0], [1], [0, 0, 1, 1], [], []>} : vector<2x32xbf16>, vector<32x128xbf16>, vector<2x128xf32> -> vector<2x128xf32>
    %c10_89 = arith.constant 10 : index
    %c0_90 = arith.constant 0 : index
    %372 = vector.load %arg1[%c10_89, %c0_90] : memref<16x128xbf16, #tpu.memory_space<vmem>>, vector<2x128xbf16>
    %373 = arith.extf %372 : vector<2x128xbf16> to vector<2x128xf32>
    %374 = arith.addf %373, %369 : vector<2x128xf32>
    %c4_91 = arith.constant 4 : index
    %c0_92 = arith.constant 0 : index
    %375 = vector.load %arg2[%c4_91, %c0_92] : memref<16x128xbf16, #tpu.memory_space<vmem>>, vector<2x128xbf16>
    %376 = arith.extf %375 : vector<2x128xbf16> to vector<2x128xf32>
    %377 = arith.addf %376, %371 : vector<2x128xf32>
    %378 = vector.extract_strided_slice %374 {offsets = [0, 0], sizes = [2, 96], strides = [1, 1]} : vector<2x128xf32> to vector<2x96xf32>
    %379 = arith.negf %378 : vector<2x96xf32>
    %380 = math.exp %379 : vector<2x96xf32>
    %cst_93 = arith.constant 1.000000e+00 : f32
    %381 = vector.broadcast %cst_93 : f32 to vector<2x96xf32>
    %382 = arith.addf %381, %380 : vector<2x96xf32>
    %383 = arith.divf %381, %382 : vector<2x96xf32>
    %384 = vector.extract_strided_slice %374 {offsets = [0, 96], sizes = [2, 32], strides = [1, 1]} : vector<2x128xf32> to vector<2x32xf32>
    %385 = math.tanh %384 : vector<2x32xf32>
    %386 = vector.extract_strided_slice %383 {offsets = [0, 0], sizes = [2, 32], strides = [1, 1]} : vector<2x96xf32> to vector<2x32xf32>
    %387 = vector.extract_strided_slice %383 {offsets = [0, 32], sizes = [2, 32], strides = [1, 1]} : vector<2x96xf32> to vector<2x32xf32>
    %388 = vector.extract_strided_slice %383 {offsets = [0, 64], sizes = [2, 32], strides = [1, 1]} : vector<2x96xf32> to vector<2x32xf32>
    %389 = arith.mulf %387, %320 : vector<2x32xf32>
    %390 = arith.mulf %386, %385 : vector<2x32xf32>
    %391 = arith.addf %389, %390 : vector<2x32xf32>
    %392 = math.tanh %391 : vector<2x32xf32>
    %393 = arith.mulf %388, %392 : vector<2x32xf32>
    %394 = vector.extract_strided_slice %377 {offsets = [0, 0], sizes = [2, 96], strides = [1, 1]} : vector<2x128xf32> to vector<2x96xf32>
    %395 = arith.negf %394 : vector<2x96xf32>
    %396 = math.exp %395 : vector<2x96xf32>
    %cst_94 = arith.constant 1.000000e+00 : f32
    %397 = vector.broadcast %cst_94 : f32 to vector<2x96xf32>
    %398 = arith.addf %397, %396 : vector<2x96xf32>
    %399 = arith.divf %397, %398 : vector<2x96xf32>
    %400 = vector.extract_strided_slice %377 {offsets = [0, 96], sizes = [2, 32], strides = [1, 1]} : vector<2x128xf32> to vector<2x32xf32>
    %401 = math.tanh %400 : vector<2x32xf32>
    %402 = vector.extract_strided_slice %399 {offsets = [0, 0], sizes = [2, 32], strides = [1, 1]} : vector<2x96xf32> to vector<2x32xf32>
    %403 = vector.extract_strided_slice %399 {offsets = [0, 32], sizes = [2, 32], strides = [1, 1]} : vector<2x96xf32> to vector<2x32xf32>
    %404 = vector.extract_strided_slice %399 {offsets = [0, 64], sizes = [2, 32], strides = [1, 1]} : vector<2x96xf32> to vector<2x32xf32>
    %405 = arith.mulf %403, %363 : vector<2x32xf32>
    %406 = arith.mulf %402, %401 : vector<2x32xf32>
    %407 = arith.addf %405, %406 : vector<2x32xf32>
    %408 = math.tanh %407 : vector<2x32xf32>
    %409 = arith.mulf %404, %408 : vector<2x32xf32>
    %410 = vector.broadcast %366 : i32 to vector<2x1xi32>
    %411 = arith.cmpi slt, %410, %3 : vector<2x1xi32>
    %412 = arith.extui %411 : vector<2x1xi1> to vector<2x1xi32>
    %413 = arith.sitofp %412 : vector<2x1xi32> to vector<2x1xf32>
    %414 = vector.broadcast %367 : i32 to vector<2x1xi32>
    %415 = arith.cmpi slt, %414, %3 : vector<2x1xi32>
    %416 = arith.extui %415 : vector<2x1xi1> to vector<2x1xi32>
    %417 = arith.sitofp %416 : vector<2x1xi32> to vector<2x1xf32>
    %418 = vector.broadcast %413 : vector<2x1xf32> to vector<2x32xf32>
    %419 = arith.mulf %418, %393 : vector<2x32xf32>
    %c10_95 = arith.constant 10 : index
    %c0_96 = arith.constant 0 : index
    %420 = vector.load %arg6[%c10_95, %c0_96] : memref<16x32xf32, #tpu.memory_space<vmem>>, vector<2x32xf32>
    tpu.vector_store %arg6[%c10_95, %c0_96], %419 {strides = array<i32>} : memref<16x32xf32, #tpu.memory_space<vmem>>, vector<2x32xf32>,
    %421 = vector.broadcast %417 : vector<2x1xf32> to vector<2x32xf32>
    %422 = arith.mulf %421, %409 : vector<2x32xf32>
    %cst_97 = arith.constant 1.000000e+00 : f32
    %423 = vector.broadcast %cst_97 : f32 to vector<2x1xf32>
    %424 = arith.subf %423, %417 : vector<2x1xf32>
    %425 = vector.broadcast %424 : vector<2x1xf32> to vector<2x32xf32>
    %426 = arith.mulf %425, %356 : vector<2x32xf32>
    %427 = arith.addf %422, %426 : vector<2x32xf32>
    %428 = vector.broadcast %417 : vector<2x1xf32> to vector<2x32xf32>
    %429 = arith.mulf %428, %407 : vector<2x32xf32>
    %cst_98 = arith.constant 1.000000e+00 : f32
    %430 = vector.broadcast %cst_98 : f32 to vector<2x1xf32>
    %431 = arith.subf %430, %417 : vector<2x1xf32>
    %432 = vector.broadcast %431 : vector<2x1xf32> to vector<2x32xf32>
    %433 = arith.mulf %432, %363 : vector<2x32xf32>
    %434 = arith.addf %429, %433 : vector<2x32xf32>
    %c4_99 = arith.constant 4 : index
    %c0_100 = arith.constant 0 : index
    %435 = vector.load %arg7[%c4_99, %c0_100] : memref<16x32xf32, #tpu.memory_space<vmem>>, vector<2x32xf32>
    tpu.vector_store %arg7[%c4_99, %c0_100], %427 {strides = array<i32>} : memref<16x32xf32, #tpu.memory_space<vmem>>, vector<2x32xf32>,
    %c8_i32_101 = arith.constant 8 : i32
    %436 = arith.muli %arg0, %c8_i32_101 : i32
    %c6_i32 = arith.constant 6 : i32
    %437 = arith.addi %436, %c6_i32 : i32
    %c7_i32_102 = arith.constant 7 : i32
    %438 = arith.subi %c7_i32_102, %437 : i32
    %439 = arith.truncf %393 : vector<2x32xf32> to vector<2x32xbf16>
    %cst_103 = arith.constant dense<0.000000e+00> : vector<2x128xf32>
    %440 = tpu.matmul %439, %4, %cst_103 {dimension_numbers = #tpu.dot_dimension_numbers<[1], [0], [0], [1], [0, 0, 1, 1], [], []>} : vector<2x32xbf16>, vector<32x128xbf16>, vector<2x128xf32> -> vector<2x128xf32>
    %441 = arith.truncf %427 : vector<2x32xf32> to vector<2x32xbf16>
    %cst_104 = arith.constant dense<0.000000e+00> : vector<2x128xf32>
    %442 = tpu.matmul %441, %5, %cst_104 {dimension_numbers = #tpu.dot_dimension_numbers<[1], [0], [0], [1], [0, 0, 1, 1], [], []>} : vector<2x32xbf16>, vector<32x128xbf16>, vector<2x128xf32> -> vector<2x128xf32>
    %c12_105 = arith.constant 12 : index
    %c0_106 = arith.constant 0 : index
    %443 = vector.load %arg1[%c12_105, %c0_106] : memref<16x128xbf16, #tpu.memory_space<vmem>>, vector<2x128xbf16>
    %444 = arith.extf %443 : vector<2x128xbf16> to vector<2x128xf32>
    %445 = arith.addf %444, %440 : vector<2x128xf32>
    %c2_107 = arith.constant 2 : index
    %c0_108 = arith.constant 0 : index
    %446 = vector.load %arg2[%c2_107, %c0_108] : memref<16x128xbf16, #tpu.memory_space<vmem>>, vector<2x128xbf16>
    %447 = arith.extf %446 : vector<2x128xbf16> to vector<2x128xf32>
    %448 = arith.addf %447, %442 : vector<2x128xf32>
    %449 = vector.extract_strided_slice %445 {offsets = [0, 0], sizes = [2, 96], strides = [1, 1]} : vector<2x128xf32> to vector<2x96xf32>
    %450 = arith.negf %449 : vector<2x96xf32>
    %451 = math.exp %450 : vector<2x96xf32>
    %cst_109 = arith.constant 1.000000e+00 : f32
    %452 = vector.broadcast %cst_109 : f32 to vector<2x96xf32>
    %453 = arith.addf %452, %451 : vector<2x96xf32>
    %454 = arith.divf %452, %453 : vector<2x96xf32>
    %455 = vector.extract_strided_slice %445 {offsets = [0, 96], sizes = [2, 32], strides = [1, 1]} : vector<2x128xf32> to vector<2x32xf32>
    %456 = math.tanh %455 : vector<2x32xf32>
    %457 = vector.extract_strided_slice %454 {offsets = [0, 0], sizes = [2, 32], strides = [1, 1]} : vector<2x96xf32> to vector<2x32xf32>
    %458 = vector.extract_strided_slice %454 {offsets = [0, 32], sizes = [2, 32], strides = [1, 1]} : vector<2x96xf32> to vector<2x32xf32>
    %459 = vector.extract_strided_slice %454 {offsets = [0, 64], sizes = [2, 32], strides = [1, 1]} : vector<2x96xf32> to vector<2x32xf32>
    %460 = arith.mulf %458, %391 : vector<2x32xf32>
    %461 = arith.mulf %457, %456 : vector<2x32xf32>
    %462 = arith.addf %460, %461 : vector<2x32xf32>
    %463 = math.tanh %462 : vector<2x32xf32>
    %464 = arith.mulf %459, %463 : vector<2x32xf32>
    %465 = vector.extract_strided_slice %448 {offsets = [0, 0], sizes = [2, 96], strides = [1, 1]} : vector<2x128xf32> to vector<2x96xf32>
    %466 = arith.negf %465 : vector<2x96xf32>
    %467 = math.exp %466 : vector<2x96xf32>
    %cst_110 = arith.constant 1.000000e+00 : f32
    %468 = vector.broadcast %cst_110 : f32 to vector<2x96xf32>
    %469 = arith.addf %468, %467 : vector<2x96xf32>
    %470 = arith.divf %468, %469 : vector<2x96xf32>
    %471 = vector.extract_strided_slice %448 {offsets = [0, 96], sizes = [2, 32], strides = [1, 1]} : vector<2x128xf32> to vector<2x32xf32>
    %472 = math.tanh %471 : vector<2x32xf32>
    %473 = vector.extract_strided_slice %470 {offsets = [0, 0], sizes = [2, 32], strides = [1, 1]} : vector<2x96xf32> to vector<2x32xf32>
    %474 = vector.extract_strided_slice %470 {offsets = [0, 32], sizes = [2, 32], strides = [1, 1]} : vector<2x96xf32> to vector<2x32xf32>
    %475 = vector.extract_strided_slice %470 {offsets = [0, 64], sizes = [2, 32], strides = [1, 1]} : vector<2x96xf32> to vector<2x32xf32>
    %476 = arith.mulf %474, %434 : vector<2x32xf32>
    %477 = arith.mulf %473, %472 : vector<2x32xf32>
    %478 = arith.addf %476, %477 : vector<2x32xf32>
    %479 = math.tanh %478 : vector<2x32xf32>
    %480 = arith.mulf %475, %479 : vector<2x32xf32>
    %481 = vector.broadcast %437 : i32 to vector<2x1xi32>
    %482 = arith.cmpi slt, %481, %3 : vector<2x1xi32>
    %483 = arith.extui %482 : vector<2x1xi1> to vector<2x1xi32>
    %484 = arith.sitofp %483 : vector<2x1xi32> to vector<2x1xf32>
    %485 = vector.broadcast %438 : i32 to vector<2x1xi32>
    %486 = arith.cmpi slt, %485, %3 : vector<2x1xi32>
    %487 = arith.extui %486 : vector<2x1xi1> to vector<2x1xi32>
    %488 = arith.sitofp %487 : vector<2x1xi32> to vector<2x1xf32>
    %489 = vector.broadcast %484 : vector<2x1xf32> to vector<2x32xf32>
    %490 = arith.mulf %489, %464 : vector<2x32xf32>
    %c12_111 = arith.constant 12 : index
    %c0_112 = arith.constant 0 : index
    %491 = vector.load %arg6[%c12_111, %c0_112] : memref<16x32xf32, #tpu.memory_space<vmem>>, vector<2x32xf32>
    tpu.vector_store %arg6[%c12_111, %c0_112], %490 {strides = array<i32>} : memref<16x32xf32, #tpu.memory_space<vmem>>, vector<2x32xf32>,
    %492 = vector.broadcast %488 : vector<2x1xf32> to vector<2x32xf32>
    %493 = arith.mulf %492, %480 : vector<2x32xf32>
    %cst_113 = arith.constant 1.000000e+00 : f32
    %494 = vector.broadcast %cst_113 : f32 to vector<2x1xf32>
    %495 = arith.subf %494, %488 : vector<2x1xf32>
    %496 = vector.broadcast %495 : vector<2x1xf32> to vector<2x32xf32>
    %497 = arith.mulf %496, %427 : vector<2x32xf32>
    %498 = arith.addf %493, %497 : vector<2x32xf32>
    %499 = vector.broadcast %488 : vector<2x1xf32> to vector<2x32xf32>
    %500 = arith.mulf %499, %478 : vector<2x32xf32>
    %cst_114 = arith.constant 1.000000e+00 : f32
    %501 = vector.broadcast %cst_114 : f32 to vector<2x1xf32>
    %502 = arith.subf %501, %488 : vector<2x1xf32>
    %503 = vector.broadcast %502 : vector<2x1xf32> to vector<2x32xf32>
    %504 = arith.mulf %503, %434 : vector<2x32xf32>
    %505 = arith.addf %500, %504 : vector<2x32xf32>
    %c2_115 = arith.constant 2 : index
    %c0_116 = arith.constant 0 : index
    %506 = vector.load %arg7[%c2_115, %c0_116] : memref<16x32xf32, #tpu.memory_space<vmem>>, vector<2x32xf32>
    tpu.vector_store %arg7[%c2_115, %c0_116], %498 {strides = array<i32>} : memref<16x32xf32, #tpu.memory_space<vmem>>, vector<2x32xf32>,
    %c8_i32_117 = arith.constant 8 : i32
    %507 = arith.muli %arg0, %c8_i32_117 : i32
    %c7_i32_118 = arith.constant 7 : i32
    %508 = arith.addi %507, %c7_i32_118 : i32
    %c7_i32_119 = arith.constant 7 : i32
    %509 = arith.subi %c7_i32_119, %508 : i32
    %510 = arith.truncf %464 : vector<2x32xf32> to vector<2x32xbf16>
    %cst_120 = arith.constant dense<0.000000e+00> : vector<2x128xf32>
    %511 = tpu.matmul %510, %4, %cst_120 {dimension_numbers = #tpu.dot_dimension_numbers<[1], [0], [0], [1], [0, 0, 1, 1], [], []>} : vector<2x32xbf16>, vector<32x128xbf16>, vector<2x128xf32> -> vector<2x128xf32>
    %512 = arith.truncf %498 : vector<2x32xf32> to vector<2x32xbf16>
    %cst_121 = arith.constant dense<0.000000e+00> : vector<2x128xf32>
    %513 = tpu.matmul %512, %5, %cst_121 {dimension_numbers = #tpu.dot_dimension_numbers<[1], [0], [0], [1], [0, 0, 1, 1], [], []>} : vector<2x32xbf16>, vector<32x128xbf16>, vector<2x128xf32> -> vector<2x128xf32>
    %c14_122 = arith.constant 14 : index
    %c0_123 = arith.constant 0 : index
    %514 = vector.load %arg1[%c14_122, %c0_123] : memref<16x128xbf16, #tpu.memory_space<vmem>>, vector<2x128xbf16>
    %515 = arith.extf %514 : vector<2x128xbf16> to vector<2x128xf32>
    %516 = arith.addf %515, %511 : vector<2x128xf32>
    %c0_124 = arith.constant 0 : index
    %c0_125 = arith.constant 0 : index
    %517 = vector.load %arg2[%c0_124, %c0_125] : memref<16x128xbf16, #tpu.memory_space<vmem>>, vector<2x128xbf16>
    %518 = arith.extf %517 : vector<2x128xbf16> to vector<2x128xf32>
    %519 = arith.addf %518, %513 : vector<2x128xf32>
    %520 = vector.extract_strided_slice %516 {offsets = [0, 0], sizes = [2, 96], strides = [1, 1]} : vector<2x128xf32> to vector<2x96xf32>
    %521 = arith.negf %520 : vector<2x96xf32>
    %522 = math.exp %521 : vector<2x96xf32>
    %cst_126 = arith.constant 1.000000e+00 : f32
    %523 = vector.broadcast %cst_126 : f32 to vector<2x96xf32>
    %524 = arith.addf %523, %522 : vector<2x96xf32>
    %525 = arith.divf %523, %524 : vector<2x96xf32>
    %526 = vector.extract_strided_slice %516 {offsets = [0, 96], sizes = [2, 32], strides = [1, 1]} : vector<2x128xf32> to vector<2x32xf32>
    %527 = math.tanh %526 : vector<2x32xf32>
    %528 = vector.extract_strided_slice %525 {offsets = [0, 0], sizes = [2, 32], strides = [1, 1]} : vector<2x96xf32> to vector<2x32xf32>
    %529 = vector.extract_strided_slice %525 {offsets = [0, 32], sizes = [2, 32], strides = [1, 1]} : vector<2x96xf32> to vector<2x32xf32>
    %530 = vector.extract_strided_slice %525 {offsets = [0, 64], sizes = [2, 32], strides = [1, 1]} : vector<2x96xf32> to vector<2x32xf32>
    %531 = arith.mulf %529, %462 : vector<2x32xf32>
    %532 = arith.mulf %528, %527 : vector<2x32xf32>
    %533 = arith.addf %531, %532 : vector<2x32xf32>
    %534 = math.tanh %533 : vector<2x32xf32>
    %535 = arith.mulf %530, %534 : vector<2x32xf32>
    %536 = vector.extract_strided_slice %519 {offsets = [0, 0], sizes = [2, 96], strides = [1, 1]} : vector<2x128xf32> to vector<2x96xf32>
    %537 = arith.negf %536 : vector<2x96xf32>
    %538 = math.exp %537 : vector<2x96xf32>
    %cst_127 = arith.constant 1.000000e+00 : f32
    %539 = vector.broadcast %cst_127 : f32 to vector<2x96xf32>
    %540 = arith.addf %539, %538 : vector<2x96xf32>
    %541 = arith.divf %539, %540 : vector<2x96xf32>
    %542 = vector.extract_strided_slice %519 {offsets = [0, 96], sizes = [2, 32], strides = [1, 1]} : vector<2x128xf32> to vector<2x32xf32>
    %543 = math.tanh %542 : vector<2x32xf32>
    %544 = vector.extract_strided_slice %541 {offsets = [0, 0], sizes = [2, 32], strides = [1, 1]} : vector<2x96xf32> to vector<2x32xf32>
    %545 = vector.extract_strided_slice %541 {offsets = [0, 32], sizes = [2, 32], strides = [1, 1]} : vector<2x96xf32> to vector<2x32xf32>
    %546 = vector.extract_strided_slice %541 {offsets = [0, 64], sizes = [2, 32], strides = [1, 1]} : vector<2x96xf32> to vector<2x32xf32>
    %547 = arith.mulf %545, %505 : vector<2x32xf32>
    %548 = arith.mulf %544, %543 : vector<2x32xf32>
    %549 = arith.addf %547, %548 : vector<2x32xf32>
    %550 = math.tanh %549 : vector<2x32xf32>
    %551 = arith.mulf %546, %550 : vector<2x32xf32>
    %552 = vector.broadcast %508 : i32 to vector<2x1xi32>
    %553 = arith.cmpi slt, %552, %3 : vector<2x1xi32>
    %554 = arith.extui %553 : vector<2x1xi1> to vector<2x1xi32>
    %555 = arith.sitofp %554 : vector<2x1xi32> to vector<2x1xf32>
    %556 = vector.broadcast %509 : i32 to vector<2x1xi32>
    %557 = arith.cmpi slt, %556, %3 : vector<2x1xi32>
    %558 = arith.extui %557 : vector<2x1xi1> to vector<2x1xi32>
    %559 = arith.sitofp %558 : vector<2x1xi32> to vector<2x1xf32>
    %560 = vector.broadcast %555 : vector<2x1xf32> to vector<2x32xf32>
    %561 = arith.mulf %560, %535 : vector<2x32xf32>
    %c14_128 = arith.constant 14 : index
    %c0_129 = arith.constant 0 : index
    %562 = vector.load %arg6[%c14_128, %c0_129] : memref<16x32xf32, #tpu.memory_space<vmem>>, vector<2x32xf32>
    tpu.vector_store %arg6[%c14_128, %c0_129], %561 {strides = array<i32>} : memref<16x32xf32, #tpu.memory_space<vmem>>, vector<2x32xf32>,
    %563 = vector.broadcast %559 : vector<2x1xf32> to vector<2x32xf32>
    %564 = arith.mulf %563, %551 : vector<2x32xf32>
    %cst_130 = arith.constant 1.000000e+00 : f32
    %565 = vector.broadcast %cst_130 : f32 to vector<2x1xf32>
    %566 = arith.subf %565, %559 : vector<2x1xf32>
    %567 = vector.broadcast %566 : vector<2x1xf32> to vector<2x32xf32>
    %568 = arith.mulf %567, %498 : vector<2x32xf32>
    %569 = arith.addf %564, %568 : vector<2x32xf32>
    %570 = vector.broadcast %559 : vector<2x1xf32> to vector<2x32xf32>
    %571 = arith.mulf %570, %549 : vector<2x32xf32>
    %cst_131 = arith.constant 1.000000e+00 : f32
    %572 = vector.broadcast %cst_131 : f32 to vector<2x1xf32>
    %573 = arith.subf %572, %559 : vector<2x1xf32>
    %574 = vector.broadcast %573 : vector<2x1xf32> to vector<2x32xf32>
    %575 = arith.mulf %574, %505 : vector<2x32xf32>
    %576 = arith.addf %571, %575 : vector<2x32xf32>
    %c0_132 = arith.constant 0 : index
    %c0_133 = arith.constant 0 : index
    %577 = vector.load %arg7[%c0_132, %c0_133] : memref<16x32xf32, #tpu.memory_space<vmem>>, vector<2x32xf32>
    tpu.vector_store %arg7[%c0_132, %c0_133], %569 {strides = array<i32>} : memref<16x32xf32, #tpu.memory_space<vmem>>, vector<2x32xf32>,
    %c0_134 = arith.constant 0 : index
    %c0_135 = arith.constant 0 : index
    %578 = vector.load %arg8[%c0_134, %c0_135] : memref<2x32xf32, #tpu.memory_space<vmem>>, vector<2x32xf32>
    tpu.vector_store %arg8[%c0_134, %c0_135], %535 {strides = array<i32>} : memref<2x32xf32, #tpu.memory_space<vmem>>, vector<2x32xf32>,
    %c0_136 = arith.constant 0 : index
    %c0_137 = arith.constant 0 : index
    %579 = vector.load %arg9[%c0_136, %c0_137] : memref<2x32xf32, #tpu.memory_space<vmem>>, vector<2x32xf32>
    tpu.vector_store %arg9[%c0_136, %c0_137], %533 {strides = array<i32>} : memref<2x32xf32, #tpu.memory_space<vmem>>, vector<2x32xf32>,
    %c0_138 = arith.constant 0 : index
    %c0_139 = arith.constant 0 : index
    %580 = vector.load %arg10[%c0_138, %c0_139] : memref<2x32xf32, #tpu.memory_space<vmem>>, vector<2x32xf32>
    tpu.vector_store %arg10[%c0_138, %c0_139], %569 {strides = array<i32>} : memref<2x32xf32, #tpu.memory_space<vmem>>, vector<2x32xf32>,
    %c0_140 = arith.constant 0 : index
    %c0_141 = arith.constant 0 : index
    %581 = vector.load %arg11[%c0_140, %c0_141] : memref<2x32xf32, #tpu.memory_space<vmem>>, vector<2x32xf32>
    tpu.vector_store %arg11[%c0_140, %c0_141], %576 {strides = array<i32>} : memref<2x32xf32, #tpu.memory_space<vmem>>, vector<2x32xf32>,
    return
  }
  func.func @transform_0(%arg0: i32) -> (i32, i32) {
    %c0_i32 = arith.constant 0 : i32
    %c0_i32_0 = arith.constant 0 : i32
    return %arg0, %c0_i32 : i32, i32
  }
  func.func @transform_1(%arg0: i32) -> (i32, i32) {
    %c0_i32 = arith.constant 0 : i32
    %0 = arith.subi %c0_i32, %arg0 : i32
    %c1_i32 = arith.constant 1 : i32
    %c0_i32_0 = arith.constant 0 : i32
    return %0, %c1_i32 : i32, i32
  }
  func.func @transform_2(%arg0: i32) -> (i32, i32) {
    %c0_i32 = arith.constant 0 : i32
    %c0_i32_0 = arith.constant 0 : i32
    %c0_i32_1 = arith.constant 0 : i32
    return %c0_i32, %c0_i32_0 : i32, i32
  }
  func.func @transform_3(%arg0: i32) -> (i32, i32) {
    %c0_i32 = arith.constant 0 : i32
    %c0_i32_0 = arith.constant 0 : i32
    %c0_i32_1 = arith.constant 0 : i32
    return %c0_i32, %c0_i32_0 : i32, i32
  }
  func.func @transform_4(%arg0: i32) -> (i32, i32) {
    %c0_i32 = arith.constant 0 : i32
    %c0_i32_0 = arith.constant 0 : i32
    %c0_i32_1 = arith.constant 0 : i32
    return %c0_i32, %c0_i32_0 : i32, i32
  }
  func.func @transform_5(%arg0: i32) -> (i32, i32) {
    %c0_i32 = arith.constant 0 : i32
    %c0_i32_0 = arith.constant 0 : i32
    return %arg0, %c0_i32 : i32, i32
  }
  func.func @transform_6(%arg0: i32) -> (i32, i32) {
    %c0_i32 = arith.constant 0 : i32
    %0 = arith.subi %c0_i32, %arg0 : i32
    %c0_i32_0 = arith.constant 0 : i32
    %c0_i32_1 = arith.constant 0 : i32
    return %0, %c0_i32_0 : i32, i32
  }
}

module attributes {stable_mosaic.version = 11 : i64} {
  func.func @_proj_kernel(%arg0: i32, %arg1: memref<8x32xf32, #tpu.memory_space<vmem>>, %arg2: memref<8x32xf32, #tpu.memory_space<vmem>>, %arg3: memref<32x256xbf16, #tpu.memory_space<vmem>>, %arg4: memref<32x256xbf16, #tpu.memory_space<vmem>>, %arg5: memref<1x256xf32, #tpu.memory_space<vmem>>, %arg6: memref<8x256xbf16, #tpu.memory_space<vmem>>) attributes {dimension_semantics = [#tpu.dimension_semantics<parallel>], iteration_bounds = array<i64: 1>, scalar_prefetch = 0 : i64, scratch_operands = 0 : i64, tpu.core_type = #tpu.core_type<tc>, window_params = [{transform_indices = @transform_0, window_bounds = array<i64: 8, 32>}, {transform_indices = @transform_1, window_bounds = array<i64: 8, 32>}, {pipeline_mode = #tpu.pipeline_mode<synchronous>, transform_indices = @transform_2, window_bounds = array<i64: 32, 256>}, {pipeline_mode = #tpu.pipeline_mode<synchronous>, transform_indices = @transform_3, window_bounds = array<i64: 32, 256>}, {pipeline_mode = #tpu.pipeline_mode<synchronous>, transform_indices = @transform_4, window_bounds = array<i64: 1, 256>}, {transform_indices = @transform_5, window_bounds = array<i64: 8, 256>}]} {
    %c0 = arith.constant 0 : index
    %c0_0 = arith.constant 0 : index
    %0 = vector.load %arg1[%c0, %c0_0] : memref<8x32xf32, #tpu.memory_space<vmem>>, vector<8x32xf32>
    %1 = arith.truncf %0 : vector<8x32xf32> to vector<8x32xbf16>
    %c0_1 = arith.constant 0 : index
    %c0_2 = arith.constant 0 : index
    %2 = vector.load %arg3[%c0_1, %c0_2] : memref<32x256xbf16, #tpu.memory_space<vmem>>, vector<32x256xbf16>
    %cst = arith.constant dense<0.000000e+00> : vector<8x256xf32>
    %3 = tpu.matmul %1, %2, %cst {dimension_numbers = #tpu.dot_dimension_numbers<[1], [0], [0], [1], [0, 0, 1, 1], [], []>} : vector<8x32xbf16>, vector<32x256xbf16>, vector<8x256xf32> -> vector<8x256xf32>
    %c0_3 = arith.constant 0 : index
    %c0_4 = arith.constant 0 : index
    %4 = vector.load %arg2[%c0_3, %c0_4] : memref<8x32xf32, #tpu.memory_space<vmem>>, vector<8x32xf32>
    %5 = arith.truncf %4 : vector<8x32xf32> to vector<8x32xbf16>
    %c0_5 = arith.constant 0 : index
    %c0_6 = arith.constant 0 : index
    %6 = vector.load %arg4[%c0_5, %c0_6] : memref<32x256xbf16, #tpu.memory_space<vmem>>, vector<32x256xbf16>
    %cst_7 = arith.constant dense<0.000000e+00> : vector<8x256xf32>
    %7 = tpu.matmul %5, %6, %cst_7 {dimension_numbers = #tpu.dot_dimension_numbers<[1], [0], [0], [1], [0, 0, 1, 1], [], []>} : vector<8x32xbf16>, vector<32x256xbf16>, vector<8x256xf32> -> vector<8x256xf32>
    %8 = arith.addf %3, %7 : vector<8x256xf32>
    %c0_8 = arith.constant 0 : index
    %c0_9 = arith.constant 0 : index
    %9 = vector.load %arg5[%c0_8, %c0_9] : memref<1x256xf32, #tpu.memory_space<vmem>>, vector<1x256xf32>
    %10 = vector.broadcast %9 : vector<1x256xf32> to vector<8x256xf32>
    %11 = arith.addf %8, %10 : vector<8x256xf32>
    %12 = arith.truncf %11 : vector<8x256xf32> to vector<8x256xbf16>
    %c0_10 = arith.constant 0 : index
    %c0_11 = arith.constant 0 : index
    %13 = vector.load %arg6[%c0_10, %c0_11] : memref<8x256xbf16, #tpu.memory_space<vmem>>, vector<8x256xbf16>
    tpu.vector_store %arg6[%c0_10, %c0_11], %12 {strides = array<i32>} : memref<8x256xbf16, #tpu.memory_space<vmem>>, vector<8x256xbf16>,
    return
  }
  func.func @transform_0(%arg0: i32) -> (i32, i32) {
    %c0_i32 = arith.constant 0 : i32
    %c0_i32_0 = arith.constant 0 : i32
    return %arg0, %c0_i32 : i32, i32
  }
  func.func @transform_1(%arg0: i32) -> (i32, i32) {
    %c0_i32 = arith.constant 0 : i32
    %c0_i32_0 = arith.constant 0 : i32
    return %arg0, %c0_i32 : i32, i32
  }
  func.func @transform_2(%arg0: i32) -> (i32, i32) {
    %c0_i32 = arith.constant 0 : i32
    %c0_i32_0 = arith.constant 0 : i32
    %c0_i32_1 = arith.constant 0 : i32
    return %c0_i32, %c0_i32_0 : i32, i32
  }
  func.func @transform_3(%arg0: i32) -> (i32, i32) {
    %c0_i32 = arith.constant 0 : i32
    %c0_i32_0 = arith.constant 0 : i32
    %c0_i32_1 = arith.constant 0 : i32
    return %c0_i32, %c0_i32_0 : i32, i32
  }
  func.func @transform_4(%arg0: i32) -> (i32, i32) {
    %c0_i32 = arith.constant 0 : i32
    %c0_i32_0 = arith.constant 0 : i32
    %c0_i32_1 = arith.constant 0 : i32
    return %c0_i32, %c0_i32_0 : i32, i32
  }
  func.func @transform_5(%arg0: i32) -> (i32, i32) {
    %c0_i32 = arith.constant 0 : i32
    %c0_i32_0 = arith.constant 0 : i32
    return %arg0, %c0_i32 : i32, i32
  }
}

module attributes {stable_mosaic.version = 11 : i64} {
  func.func @_bilstm_recurrence_kernel(%arg0: i32, %arg1: memref<8x128xbf16, #tpu.memory_space<vmem>>, %arg2: memref<8x128xbf16, #tpu.memory_space<vmem>>, %arg3: memref<2x1xi32, #tpu.memory_space<vmem>>, %arg4: memref<32x128xbf16, #tpu.memory_space<vmem>>, %arg5: memref<32x128xbf16, #tpu.memory_space<vmem>>, %arg6: memref<8x32xf32, #tpu.memory_space<vmem>>, %arg7: memref<8x32xf32, #tpu.memory_space<vmem>>, %arg8: memref<2x32xf32, #tpu.memory_space<vmem>>, %arg9: memref<2x32xf32, #tpu.memory_space<vmem>>, %arg10: memref<2x32xf32, #tpu.memory_space<vmem>>, %arg11: memref<2x32xf32, #tpu.memory_space<vmem>>) attributes {dimension_semantics = [#tpu.dimension_semantics<arbitrary>], iteration_bounds = array<i64: 1>, scalar_prefetch = 0 : i64, scratch_operands = 4 : i64, tpu.core_type = #tpu.core_type<tc>, window_params = [{transform_indices = @transform_0, window_bounds = array<i64: 8, 128>}, {transform_indices = @transform_1, window_bounds = array<i64: 8, 128>}, {pipeline_mode = #tpu.pipeline_mode<synchronous>, transform_indices = @transform_2, window_bounds = array<i64: 2, 1>}, {pipeline_mode = #tpu.pipeline_mode<synchronous>, transform_indices = @transform_3, window_bounds = array<i64: 32, 128>}, {pipeline_mode = #tpu.pipeline_mode<synchronous>, transform_indices = @transform_4, window_bounds = array<i64: 32, 128>}, {transform_indices = @transform_5, window_bounds = array<i64: 8, 32>}, {transform_indices = @transform_6, window_bounds = array<i64: 8, 32>}]} {
    %c0_i32 = arith.constant 0 : i32
    %0 = arith.cmpi eq, %arg0, %c0_i32 : i32
    %1 = arith.extui %0 : i1 to i32
    %c0_i32_0 = arith.constant 0 : i32
    %2 = arith.cmpi ne, %1, %c0_i32_0 : i32
    scf.if %2 {
      %cst_82 = arith.constant 0.000000e+00 : f32
      %298 = vector.broadcast %cst_82 : f32 to vector<2x32xf32>
      %c0_83 = arith.constant 0 : index
      %c0_84 = arith.constant 0 : index
      %299 = vector.load %arg8[%c0_83, %c0_84] : memref<2x32xf32, #tpu.memory_space<vmem>>, vector<2x32xf32>
      tpu.vector_store %arg8[%c0_83, %c0_84], %298 {strides = array<i32>} : memref<2x32xf32, #tpu.memory_space<vmem>>, vector<2x32xf32>,
      %c0_85 = arith.constant 0 : index
      %c0_86 = arith.constant 0 : index
      %300 = vector.load %arg9[%c0_85, %c0_86] : memref<2x32xf32, #tpu.memory_space<vmem>>, vector<2x32xf32>
      tpu.vector_store %arg9[%c0_85, %c0_86], %298 {strides = array<i32>} : memref<2x32xf32, #tpu.memory_space<vmem>>, vector<2x32xf32>,
      %c0_87 = arith.constant 0 : index
      %c0_88 = arith.constant 0 : index
      %301 = vector.load %arg10[%c0_87, %c0_88] : memref<2x32xf32, #tpu.memory_space<vmem>>, vector<2x32xf32>
      tpu.vector_store %arg10[%c0_87, %c0_88], %298 {strides = array<i32>} : memref<2x32xf32, #tpu.memory_space<vmem>>, vector<2x32xf32>,
      %c0_89 = arith.constant 0 : index
      %c0_90 = arith.constant 0 : index
      %302 = vector.load %arg11[%c0_89, %c0_90] : memref<2x32xf32, #tpu.memory_space<vmem>>, vector<2x32xf32>
      tpu.vector_store %arg11[%c0_89, %c0_90], %298 {strides = array<i32>} : memref<2x32xf32, #tpu.memory_space<vmem>>, vector<2x32xf32>,
    } else {
    }
    %c0 = arith.constant 0 : index
    %c0_1 = arith.constant 0 : index
    %3 = vector.load %arg3[%c0, %c0_1] : memref<2x1xi32, #tpu.memory_space<vmem>>, vector<2x1xi32>
    %c0_2 = arith.constant 0 : index
    %c0_3 = arith.constant 0 : index
    %4 = vector.load %arg4[%c0_2, %c0_3] : memref<32x128xbf16, #tpu.memory_space<vmem>>, vector<32x128xbf16>
    %c0_4 = arith.constant 0 : index
    %c0_5 = arith.constant 0 : index
    %5 = vector.load %arg5[%c0_4, %c0_5] : memref<32x128xbf16, #tpu.memory_space<vmem>>, vector<32x128xbf16>
    %c0_6 = arith.constant 0 : index
    %c0_7 = arith.constant 0 : index
    %6 = vector.load %arg8[%c0_6, %c0_7] : memref<2x32xf32, #tpu.memory_space<vmem>>, vector<2x32xf32>
    %c0_8 = arith.constant 0 : index
    %c0_9 = arith.constant 0 : index
    %7 = vector.load %arg9[%c0_8, %c0_9] : memref<2x32xf32, #tpu.memory_space<vmem>>, vector<2x32xf32>
    %c0_10 = arith.constant 0 : index
    %c0_11 = arith.constant 0 : index
    %8 = vector.load %arg10[%c0_10, %c0_11] : memref<2x32xf32, #tpu.memory_space<vmem>>, vector<2x32xf32>
    %c0_12 = arith.constant 0 : index
    %c0_13 = arith.constant 0 : index
    %9 = vector.load %arg11[%c0_12, %c0_13] : memref<2x32xf32, #tpu.memory_space<vmem>>, vector<2x32xf32>
    %c4_i32 = arith.constant 4 : i32
    %10 = arith.muli %arg0, %c4_i32 : i32
    %c0_i32_14 = arith.constant 0 : i32
    %11 = arith.addi %10, %c0_i32_14 : i32
    %c3_i32 = arith.constant 3 : i32
    %12 = arith.subi %c3_i32, %11 : i32
    %13 = arith.truncf %6 : vector<2x32xf32> to vector<2x32xbf16>
    %cst = arith.constant dense<0.000000e+00> : vector<2x128xf32>
    %14 = tpu.matmul %13, %4, %cst {dimension_numbers = #tpu.dot_dimension_numbers<[1], [0], [0], [1], [0, 0, 1, 1], [], []>} : vector<2x32xbf16>, vector<32x128xbf16>, vector<2x128xf32> -> vector<2x128xf32>
    %15 = arith.truncf %8 : vector<2x32xf32> to vector<2x32xbf16>
    %cst_15 = arith.constant dense<0.000000e+00> : vector<2x128xf32>
    %16 = tpu.matmul %15, %5, %cst_15 {dimension_numbers = #tpu.dot_dimension_numbers<[1], [0], [0], [1], [0, 0, 1, 1], [], []>} : vector<2x32xbf16>, vector<32x128xbf16>, vector<2x128xf32> -> vector<2x128xf32>
    %c0_16 = arith.constant 0 : index
    %c0_17 = arith.constant 0 : index
    %17 = vector.load %arg1[%c0_16, %c0_17] : memref<8x128xbf16, #tpu.memory_space<vmem>>, vector<2x128xbf16>
    %18 = arith.extf %17 : vector<2x128xbf16> to vector<2x128xf32>
    %19 = arith.addf %18, %14 : vector<2x128xf32>
    %c6 = arith.constant 6 : index
    %c0_18 = arith.constant 0 : index
    %20 = vector.load %arg2[%c6, %c0_18] : memref<8x128xbf16, #tpu.memory_space<vmem>>, vector<2x128xbf16>
    %21 = arith.extf %20 : vector<2x128xbf16> to vector<2x128xf32>
    %22 = arith.addf %21, %16 : vector<2x128xf32>
    %23 = vector.extract_strided_slice %19 {offsets = [0, 0], sizes = [2, 96], strides = [1, 1]} : vector<2x128xf32> to vector<2x96xf32>
    %24 = arith.negf %23 : vector<2x96xf32>
    %25 = math.exp %24 : vector<2x96xf32>
    %cst_19 = arith.constant 1.000000e+00 : f32
    %26 = vector.broadcast %cst_19 : f32 to vector<2x96xf32>
    %27 = arith.addf %26, %25 : vector<2x96xf32>
    %28 = arith.divf %26, %27 : vector<2x96xf32>
    %29 = vector.extract_strided_slice %19 {offsets = [0, 96], sizes = [2, 32], strides = [1, 1]} : vector<2x128xf32> to vector<2x32xf32>
    %30 = math.tanh %29 : vector<2x32xf32>
    %31 = vector.extract_strided_slice %28 {offsets = [0, 0], sizes = [2, 32], strides = [1, 1]} : vector<2x96xf32> to vector<2x32xf32>
    %32 = vector.extract_strided_slice %28 {offsets = [0, 32], sizes = [2, 32], strides = [1, 1]} : vector<2x96xf32> to vector<2x32xf32>
    %33 = vector.extract_strided_slice %28 {offsets = [0, 64], sizes = [2, 32], strides = [1, 1]} : vector<2x96xf32> to vector<2x32xf32>
    %34 = arith.mulf %32, %7 : vector<2x32xf32>
    %35 = arith.mulf %31, %30 : vector<2x32xf32>
    %36 = arith.addf %34, %35 : vector<2x32xf32>
    %37 = math.tanh %36 : vector<2x32xf32>
    %38 = arith.mulf %33, %37 : vector<2x32xf32>
    %39 = vector.extract_strided_slice %22 {offsets = [0, 0], sizes = [2, 96], strides = [1, 1]} : vector<2x128xf32> to vector<2x96xf32>
    %40 = arith.negf %39 : vector<2x96xf32>
    %41 = math.exp %40 : vector<2x96xf32>
    %cst_20 = arith.constant 1.000000e+00 : f32
    %42 = vector.broadcast %cst_20 : f32 to vector<2x96xf32>
    %43 = arith.addf %42, %41 : vector<2x96xf32>
    %44 = arith.divf %42, %43 : vector<2x96xf32>
    %45 = vector.extract_strided_slice %22 {offsets = [0, 96], sizes = [2, 32], strides = [1, 1]} : vector<2x128xf32> to vector<2x32xf32>
    %46 = math.tanh %45 : vector<2x32xf32>
    %47 = vector.extract_strided_slice %44 {offsets = [0, 0], sizes = [2, 32], strides = [1, 1]} : vector<2x96xf32> to vector<2x32xf32>
    %48 = vector.extract_strided_slice %44 {offsets = [0, 32], sizes = [2, 32], strides = [1, 1]} : vector<2x96xf32> to vector<2x32xf32>
    %49 = vector.extract_strided_slice %44 {offsets = [0, 64], sizes = [2, 32], strides = [1, 1]} : vector<2x96xf32> to vector<2x32xf32>
    %50 = arith.mulf %48, %9 : vector<2x32xf32>
    %51 = arith.mulf %47, %46 : vector<2x32xf32>
    %52 = arith.addf %50, %51 : vector<2x32xf32>
    %53 = math.tanh %52 : vector<2x32xf32>
    %54 = arith.mulf %49, %53 : vector<2x32xf32>
    %55 = vector.broadcast %11 : i32 to vector<2x1xi32>
    %56 = arith.cmpi slt, %55, %3 : vector<2x1xi32>
    %57 = arith.extui %56 : vector<2x1xi1> to vector<2x1xi32>
    %58 = arith.sitofp %57 : vector<2x1xi32> to vector<2x1xf32>
    %59 = vector.broadcast %12 : i32 to vector<2x1xi32>
    %60 = arith.cmpi slt, %59, %3 : vector<2x1xi32>
    %61 = arith.extui %60 : vector<2x1xi1> to vector<2x1xi32>
    %62 = arith.sitofp %61 : vector<2x1xi32> to vector<2x1xf32>
    %63 = vector.broadcast %58 : vector<2x1xf32> to vector<2x32xf32>
    %64 = arith.mulf %63, %38 : vector<2x32xf32>
    %c0_21 = arith.constant 0 : index
    %c0_22 = arith.constant 0 : index
    %65 = vector.load %arg6[%c0_21, %c0_22] : memref<8x32xf32, #tpu.memory_space<vmem>>, vector<2x32xf32>
    tpu.vector_store %arg6[%c0_21, %c0_22], %64 {strides = array<i32>} : memref<8x32xf32, #tpu.memory_space<vmem>>, vector<2x32xf32>,
    %66 = vector.broadcast %62 : vector<2x1xf32> to vector<2x32xf32>
    %67 = arith.mulf %66, %54 : vector<2x32xf32>
    %cst_23 = arith.constant 1.000000e+00 : f32
    %68 = vector.broadcast %cst_23 : f32 to vector<2x1xf32>
    %69 = arith.subf %68, %62 : vector<2x1xf32>
    %70 = vector.broadcast %69 : vector<2x1xf32> to vector<2x32xf32>
    %71 = arith.mulf %70, %8 : vector<2x32xf32>
    %72 = arith.addf %67, %71 : vector<2x32xf32>
    %73 = vector.broadcast %62 : vector<2x1xf32> to vector<2x32xf32>
    %74 = arith.mulf %73, %52 : vector<2x32xf32>
    %cst_24 = arith.constant 1.000000e+00 : f32
    %75 = vector.broadcast %cst_24 : f32 to vector<2x1xf32>
    %76 = arith.subf %75, %62 : vector<2x1xf32>
    %77 = vector.broadcast %76 : vector<2x1xf32> to vector<2x32xf32>
    %78 = arith.mulf %77, %9 : vector<2x32xf32>
    %79 = arith.addf %74, %78 : vector<2x32xf32>
    %c6_25 = arith.constant 6 : index
    %c0_26 = arith.constant 0 : index
    %80 = vector.load %arg7[%c6_25, %c0_26] : memref<8x32xf32, #tpu.memory_space<vmem>>, vector<2x32xf32>
    tpu.vector_store %arg7[%c6_25, %c0_26], %72 {strides = array<i32>} : memref<8x32xf32, #tpu.memory_space<vmem>>, vector<2x32xf32>,
    %c4_i32_27 = arith.constant 4 : i32
    %81 = arith.muli %arg0, %c4_i32_27 : i32
    %c1_i32 = arith.constant 1 : i32
    %82 = arith.addi %81, %c1_i32 : i32
    %c3_i32_28 = arith.constant 3 : i32
    %83 = arith.subi %c3_i32_28, %82 : i32
    %84 = arith.truncf %38 : vector<2x32xf32> to vector<2x32xbf16>
    %cst_29 = arith.constant dense<0.000000e+00> : vector<2x128xf32>
    %85 = tpu.matmul %84, %4, %cst_29 {dimension_numbers = #tpu.dot_dimension_numbers<[1], [0], [0], [1], [0, 0, 1, 1], [], []>} : vector<2x32xbf16>, vector<32x128xbf16>, vector<2x128xf32> -> vector<2x128xf32>
    %86 = arith.truncf %72 : vector<2x32xf32> to vector<2x32xbf16>
    %cst_30 = arith.constant dense<0.000000e+00> : vector<2x128xf32>
    %87 = tpu.matmul %86, %5, %cst_30 {dimension_numbers = #tpu.dot_dimension_numbers<[1], [0], [0], [1], [0, 0, 1, 1], [], []>} : vector<2x32xbf16>, vector<32x128xbf16>, vector<2x128xf32> -> vector<2x128xf32>
    %c2 = arith.constant 2 : index
    %c0_31 = arith.constant 0 : index
    %88 = vector.load %arg1[%c2, %c0_31] : memref<8x128xbf16, #tpu.memory_space<vmem>>, vector<2x128xbf16>
    %89 = arith.extf %88 : vector<2x128xbf16> to vector<2x128xf32>
    %90 = arith.addf %89, %85 : vector<2x128xf32>
    %c4 = arith.constant 4 : index
    %c0_32 = arith.constant 0 : index
    %91 = vector.load %arg2[%c4, %c0_32] : memref<8x128xbf16, #tpu.memory_space<vmem>>, vector<2x128xbf16>
    %92 = arith.extf %91 : vector<2x128xbf16> to vector<2x128xf32>
    %93 = arith.addf %92, %87 : vector<2x128xf32>
    %94 = vector.extract_strided_slice %90 {offsets = [0, 0], sizes = [2, 96], strides = [1, 1]} : vector<2x128xf32> to vector<2x96xf32>
    %95 = arith.negf %94 : vector<2x96xf32>
    %96 = math.exp %95 : vector<2x96xf32>
    %cst_33 = arith.constant 1.000000e+00 : f32
    %97 = vector.broadcast %cst_33 : f32 to vector<2x96xf32>
    %98 = arith.addf %97, %96 : vector<2x96xf32>
    %99 = arith.divf %97, %98 : vector<2x96xf32>
    %100 = vector.extract_strided_slice %90 {offsets = [0, 96], sizes = [2, 32], strides = [1, 1]} : vector<2x128xf32> to vector<2x32xf32>
    %101 = math.tanh %100 : vector<2x32xf32>
    %102 = vector.extract_strided_slice %99 {offsets = [0, 0], sizes = [2, 32], strides = [1, 1]} : vector<2x96xf32> to vector<2x32xf32>
    %103 = vector.extract_strided_slice %99 {offsets = [0, 32], sizes = [2, 32], strides = [1, 1]} : vector<2x96xf32> to vector<2x32xf32>
    %104 = vector.extract_strided_slice %99 {offsets = [0, 64], sizes = [2, 32], strides = [1, 1]} : vector<2x96xf32> to vector<2x32xf32>
    %105 = arith.mulf %103, %36 : vector<2x32xf32>
    %106 = arith.mulf %102, %101 : vector<2x32xf32>
    %107 = arith.addf %105, %106 : vector<2x32xf32>
    %108 = math.tanh %107 : vector<2x32xf32>
    %109 = arith.mulf %104, %108 : vector<2x32xf32>
    %110 = vector.extract_strided_slice %93 {offsets = [0, 0], sizes = [2, 96], strides = [1, 1]} : vector<2x128xf32> to vector<2x96xf32>
    %111 = arith.negf %110 : vector<2x96xf32>
    %112 = math.exp %111 : vector<2x96xf32>
    %cst_34 = arith.constant 1.000000e+00 : f32
    %113 = vector.broadcast %cst_34 : f32 to vector<2x96xf32>
    %114 = arith.addf %113, %112 : vector<2x96xf32>
    %115 = arith.divf %113, %114 : vector<2x96xf32>
    %116 = vector.extract_strided_slice %93 {offsets = [0, 96], sizes = [2, 32], strides = [1, 1]} : vector<2x128xf32> to vector<2x32xf32>
    %117 = math.tanh %116 : vector<2x32xf32>
    %118 = vector.extract_strided_slice %115 {offsets = [0, 0], sizes = [2, 32], strides = [1, 1]} : vector<2x96xf32> to vector<2x32xf32>
    %119 = vector.extract_strided_slice %115 {offsets = [0, 32], sizes = [2, 32], strides = [1, 1]} : vector<2x96xf32> to vector<2x32xf32>
    %120 = vector.extract_strided_slice %115 {offsets = [0, 64], sizes = [2, 32], strides = [1, 1]} : vector<2x96xf32> to vector<2x32xf32>
    %121 = arith.mulf %119, %79 : vector<2x32xf32>
    %122 = arith.mulf %118, %117 : vector<2x32xf32>
    %123 = arith.addf %121, %122 : vector<2x32xf32>
    %124 = math.tanh %123 : vector<2x32xf32>
    %125 = arith.mulf %120, %124 : vector<2x32xf32>
    %126 = vector.broadcast %82 : i32 to vector<2x1xi32>
    %127 = arith.cmpi slt, %126, %3 : vector<2x1xi32>
    %128 = arith.extui %127 : vector<2x1xi1> to vector<2x1xi32>
    %129 = arith.sitofp %128 : vector<2x1xi32> to vector<2x1xf32>
    %130 = vector.broadcast %83 : i32 to vector<2x1xi32>
    %131 = arith.cmpi slt, %130, %3 : vector<2x1xi32>
    %132 = arith.extui %131 : vector<2x1xi1> to vector<2x1xi32>
    %133 = arith.sitofp %132 : vector<2x1xi32> to vector<2x1xf32>
    %134 = vector.broadcast %129 : vector<2x1xf32> to vector<2x32xf32>
    %135 = arith.mulf %134, %109 : vector<2x32xf32>
    %c2_35 = arith.constant 2 : index
    %c0_36 = arith.constant 0 : index
    %136 = vector.load %arg6[%c2_35, %c0_36] : memref<8x32xf32, #tpu.memory_space<vmem>>, vector<2x32xf32>
    tpu.vector_store %arg6[%c2_35, %c0_36], %135 {strides = array<i32>} : memref<8x32xf32, #tpu.memory_space<vmem>>, vector<2x32xf32>,
    %137 = vector.broadcast %133 : vector<2x1xf32> to vector<2x32xf32>
    %138 = arith.mulf %137, %125 : vector<2x32xf32>
    %cst_37 = arith.constant 1.000000e+00 : f32
    %139 = vector.broadcast %cst_37 : f32 to vector<2x1xf32>
    %140 = arith.subf %139, %133 : vector<2x1xf32>
    %141 = vector.broadcast %140 : vector<2x1xf32> to vector<2x32xf32>
    %142 = arith.mulf %141, %72 : vector<2x32xf32>
    %143 = arith.addf %138, %142 : vector<2x32xf32>
    %144 = vector.broadcast %133 : vector<2x1xf32> to vector<2x32xf32>
    %145 = arith.mulf %144, %123 : vector<2x32xf32>
    %cst_38 = arith.constant 1.000000e+00 : f32
    %146 = vector.broadcast %cst_38 : f32 to vector<2x1xf32>
    %147 = arith.subf %146, %133 : vector<2x1xf32>
    %148 = vector.broadcast %147 : vector<2x1xf32> to vector<2x32xf32>
    %149 = arith.mulf %148, %79 : vector<2x32xf32>
    %150 = arith.addf %145, %149 : vector<2x32xf32>
    %c4_39 = arith.constant 4 : index
    %c0_40 = arith.constant 0 : index
    %151 = vector.load %arg7[%c4_39, %c0_40] : memref<8x32xf32, #tpu.memory_space<vmem>>, vector<2x32xf32>
    tpu.vector_store %arg7[%c4_39, %c0_40], %143 {strides = array<i32>} : memref<8x32xf32, #tpu.memory_space<vmem>>, vector<2x32xf32>,
    %c4_i32_41 = arith.constant 4 : i32
    %152 = arith.muli %arg0, %c4_i32_41 : i32
    %c2_i32 = arith.constant 2 : i32
    %153 = arith.addi %152, %c2_i32 : i32
    %c3_i32_42 = arith.constant 3 : i32
    %154 = arith.subi %c3_i32_42, %153 : i32
    %155 = arith.truncf %109 : vector<2x32xf32> to vector<2x32xbf16>
    %cst_43 = arith.constant dense<0.000000e+00> : vector<2x128xf32>
    %156 = tpu.matmul %155, %4, %cst_43 {dimension_numbers = #tpu.dot_dimension_numbers<[1], [0], [0], [1], [0, 0, 1, 1], [], []>} : vector<2x32xbf16>, vector<32x128xbf16>, vector<2x128xf32> -> vector<2x128xf32>
    %157 = arith.truncf %143 : vector<2x32xf32> to vector<2x32xbf16>
    %cst_44 = arith.constant dense<0.000000e+00> : vector<2x128xf32>
    %158 = tpu.matmul %157, %5, %cst_44 {dimension_numbers = #tpu.dot_dimension_numbers<[1], [0], [0], [1], [0, 0, 1, 1], [], []>} : vector<2x32xbf16>, vector<32x128xbf16>, vector<2x128xf32> -> vector<2x128xf32>
    %c4_45 = arith.constant 4 : index
    %c0_46 = arith.constant 0 : index
    %159 = vector.load %arg1[%c4_45, %c0_46] : memref<8x128xbf16, #tpu.memory_space<vmem>>, vector<2x128xbf16>
    %160 = arith.extf %159 : vector<2x128xbf16> to vector<2x128xf32>
    %161 = arith.addf %160, %156 : vector<2x128xf32>
    %c2_47 = arith.constant 2 : index
    %c0_48 = arith.constant 0 : index
    %162 = vector.load %arg2[%c2_47, %c0_48] : memref<8x128xbf16, #tpu.memory_space<vmem>>, vector<2x128xbf16>
    %163 = arith.extf %162 : vector<2x128xbf16> to vector<2x128xf32>
    %164 = arith.addf %163, %158 : vector<2x128xf32>
    %165 = vector.extract_strided_slice %161 {offsets = [0, 0], sizes = [2, 96], strides = [1, 1]} : vector<2x128xf32> to vector<2x96xf32>
    %166 = arith.negf %165 : vector<2x96xf32>
    %167 = math.exp %166 : vector<2x96xf32>
    %cst_49 = arith.constant 1.000000e+00 : f32
    %168 = vector.broadcast %cst_49 : f32 to vector<2x96xf32>
    %169 = arith.addf %168, %167 : vector<2x96xf32>
    %170 = arith.divf %168, %169 : vector<2x96xf32>
    %171 = vector.extract_strided_slice %161 {offsets = [0, 96], sizes = [2, 32], strides = [1, 1]} : vector<2x128xf32> to vector<2x32xf32>
    %172 = math.tanh %171 : vector<2x32xf32>
    %173 = vector.extract_strided_slice %170 {offsets = [0, 0], sizes = [2, 32], strides = [1, 1]} : vector<2x96xf32> to vector<2x32xf32>
    %174 = vector.extract_strided_slice %170 {offsets = [0, 32], sizes = [2, 32], strides = [1, 1]} : vector<2x96xf32> to vector<2x32xf32>
    %175 = vector.extract_strided_slice %170 {offsets = [0, 64], sizes = [2, 32], strides = [1, 1]} : vector<2x96xf32> to vector<2x32xf32>
    %176 = arith.mulf %174, %107 : vector<2x32xf32>
    %177 = arith.mulf %173, %172 : vector<2x32xf32>
    %178 = arith.addf %176, %177 : vector<2x32xf32>
    %179 = math.tanh %178 : vector<2x32xf32>
    %180 = arith.mulf %175, %179 : vector<2x32xf32>
    %181 = vector.extract_strided_slice %164 {offsets = [0, 0], sizes = [2, 96], strides = [1, 1]} : vector<2x128xf32> to vector<2x96xf32>
    %182 = arith.negf %181 : vector<2x96xf32>
    %183 = math.exp %182 : vector<2x96xf32>
    %cst_50 = arith.constant 1.000000e+00 : f32
    %184 = vector.broadcast %cst_50 : f32 to vector<2x96xf32>
    %185 = arith.addf %184, %183 : vector<2x96xf32>
    %186 = arith.divf %184, %185 : vector<2x96xf32>
    %187 = vector.extract_strided_slice %164 {offsets = [0, 96], sizes = [2, 32], strides = [1, 1]} : vector<2x128xf32> to vector<2x32xf32>
    %188 = math.tanh %187 : vector<2x32xf32>
    %189 = vector.extract_strided_slice %186 {offsets = [0, 0], sizes = [2, 32], strides = [1, 1]} : vector<2x96xf32> to vector<2x32xf32>
    %190 = vector.extract_strided_slice %186 {offsets = [0, 32], sizes = [2, 32], strides = [1, 1]} : vector<2x96xf32> to vector<2x32xf32>
    %191 = vector.extract_strided_slice %186 {offsets = [0, 64], sizes = [2, 32], strides = [1, 1]} : vector<2x96xf32> to vector<2x32xf32>
    %192 = arith.mulf %190, %150 : vector<2x32xf32>
    %193 = arith.mulf %189, %188 : vector<2x32xf32>
    %194 = arith.addf %192, %193 : vector<2x32xf32>
    %195 = math.tanh %194 : vector<2x32xf32>
    %196 = arith.mulf %191, %195 : vector<2x32xf32>
    %197 = vector.broadcast %153 : i32 to vector<2x1xi32>
    %198 = arith.cmpi slt, %197, %3 : vector<2x1xi32>
    %199 = arith.extui %198 : vector<2x1xi1> to vector<2x1xi32>
    %200 = arith.sitofp %199 : vector<2x1xi32> to vector<2x1xf32>
    %201 = vector.broadcast %154 : i32 to vector<2x1xi32>
    %202 = arith.cmpi slt, %201, %3 : vector<2x1xi32>
    %203 = arith.extui %202 : vector<2x1xi1> to vector<2x1xi32>
    %204 = arith.sitofp %203 : vector<2x1xi32> to vector<2x1xf32>
    %205 = vector.broadcast %200 : vector<2x1xf32> to vector<2x32xf32>
    %206 = arith.mulf %205, %180 : vector<2x32xf32>
    %c4_51 = arith.constant 4 : index
    %c0_52 = arith.constant 0 : index
    %207 = vector.load %arg6[%c4_51, %c0_52] : memref<8x32xf32, #tpu.memory_space<vmem>>, vector<2x32xf32>
    tpu.vector_store %arg6[%c4_51, %c0_52], %206 {strides = array<i32>} : memref<8x32xf32, #tpu.memory_space<vmem>>, vector<2x32xf32>,
    %208 = vector.broadcast %204 : vector<2x1xf32> to vector<2x32xf32>
    %209 = arith.mulf %208, %196 : vector<2x32xf32>
    %cst_53 = arith.constant 1.000000e+00 : f32
    %210 = vector.broadcast %cst_53 : f32 to vector<2x1xf32>
    %211 = arith.subf %210, %204 : vector<2x1xf32>
    %212 = vector.broadcast %211 : vector<2x1xf32> to vector<2x32xf32>
    %213 = arith.mulf %212, %143 : vector<2x32xf32>
    %214 = arith.addf %209, %213 : vector<2x32xf32>
    %215 = vector.broadcast %204 : vector<2x1xf32> to vector<2x32xf32>
    %216 = arith.mulf %215, %194 : vector<2x32xf32>
    %cst_54 = arith.constant 1.000000e+00 : f32
    %217 = vector.broadcast %cst_54 : f32 to vector<2x1xf32>
    %218 = arith.subf %217, %204 : vector<2x1xf32>
    %219 = vector.broadcast %218 : vector<2x1xf32> to vector<2x32xf32>
    %220 = arith.mulf %219, %150 : vector<2x32xf32>
    %221 = arith.addf %216, %220 : vector<2x32xf32>
    %c2_55 = arith.constant 2 : index
    %c0_56 = arith.constant 0 : index
    %222 = vector.load %arg7[%c2_55, %c0_56] : memref<8x32xf32, #tpu.memory_space<vmem>>, vector<2x32xf32>
    tpu.vector_store %arg7[%c2_55, %c0_56], %214 {strides = array<i32>} : memref<8x32xf32, #tpu.memory_space<vmem>>, vector<2x32xf32>,
    %c4_i32_57 = arith.constant 4 : i32
    %223 = arith.muli %arg0, %c4_i32_57 : i32
    %c3_i32_58 = arith.constant 3 : i32
    %224 = arith.addi %223, %c3_i32_58 : i32
    %c3_i32_59 = arith.constant 3 : i32
    %225 = arith.subi %c3_i32_59, %224 : i32
    %226 = arith.truncf %180 : vector<2x32xf32> to vector<2x32xbf16>
    %cst_60 = arith.constant dense<0.000000e+00> : vector<2x128xf32>
    %227 = tpu.matmul %226, %4, %cst_60 {dimension_numbers = #tpu.dot_dimension_numbers<[1], [0], [0], [1], [0, 0, 1, 1], [], []>} : vector<2x32xbf16>, vector<32x128xbf16>, vector<2x128xf32> -> vector<2x128xf32>
    %228 = arith.truncf %214 : vector<2x32xf32> to vector<2x32xbf16>
    %cst_61 = arith.constant dense<0.000000e+00> : vector<2x128xf32>
    %229 = tpu.matmul %228, %5, %cst_61 {dimension_numbers = #tpu.dot_dimension_numbers<[1], [0], [0], [1], [0, 0, 1, 1], [], []>} : vector<2x32xbf16>, vector<32x128xbf16>, vector<2x128xf32> -> vector<2x128xf32>
    %c6_62 = arith.constant 6 : index
    %c0_63 = arith.constant 0 : index
    %230 = vector.load %arg1[%c6_62, %c0_63] : memref<8x128xbf16, #tpu.memory_space<vmem>>, vector<2x128xbf16>
    %231 = arith.extf %230 : vector<2x128xbf16> to vector<2x128xf32>
    %232 = arith.addf %231, %227 : vector<2x128xf32>
    %c0_64 = arith.constant 0 : index
    %c0_65 = arith.constant 0 : index
    %233 = vector.load %arg2[%c0_64, %c0_65] : memref<8x128xbf16, #tpu.memory_space<vmem>>, vector<2x128xbf16>
    %234 = arith.extf %233 : vector<2x128xbf16> to vector<2x128xf32>
    %235 = arith.addf %234, %229 : vector<2x128xf32>
    %236 = vector.extract_strided_slice %232 {offsets = [0, 0], sizes = [2, 96], strides = [1, 1]} : vector<2x128xf32> to vector<2x96xf32>
    %237 = arith.negf %236 : vector<2x96xf32>
    %238 = math.exp %237 : vector<2x96xf32>
    %cst_66 = arith.constant 1.000000e+00 : f32
    %239 = vector.broadcast %cst_66 : f32 to vector<2x96xf32>
    %240 = arith.addf %239, %238 : vector<2x96xf32>
    %241 = arith.divf %239, %240 : vector<2x96xf32>
    %242 = vector.extract_strided_slice %232 {offsets = [0, 96], sizes = [2, 32], strides = [1, 1]} : vector<2x128xf32> to vector<2x32xf32>
    %243 = math.tanh %242 : vector<2x32xf32>
    %244 = vector.extract_strided_slice %241 {offsets = [0, 0], sizes = [2, 32], strides = [1, 1]} : vector<2x96xf32> to vector<2x32xf32>
    %245 = vector.extract_strided_slice %241 {offsets = [0, 32], sizes = [2, 32], strides = [1, 1]} : vector<2x96xf32> to vector<2x32xf32>
    %246 = vector.extract_strided_slice %241 {offsets = [0, 64], sizes = [2, 32], strides = [1, 1]} : vector<2x96xf32> to vector<2x32xf32>
    %247 = arith.mulf %245, %178 : vector<2x32xf32>
    %248 = arith.mulf %244, %243 : vector<2x32xf32>
    %249 = arith.addf %247, %248 : vector<2x32xf32>
    %250 = math.tanh %249 : vector<2x32xf32>
    %251 = arith.mulf %246, %250 : vector<2x32xf32>
    %252 = vector.extract_strided_slice %235 {offsets = [0, 0], sizes = [2, 96], strides = [1, 1]} : vector<2x128xf32> to vector<2x96xf32>
    %253 = arith.negf %252 : vector<2x96xf32>
    %254 = math.exp %253 : vector<2x96xf32>
    %cst_67 = arith.constant 1.000000e+00 : f32
    %255 = vector.broadcast %cst_67 : f32 to vector<2x96xf32>
    %256 = arith.addf %255, %254 : vector<2x96xf32>
    %257 = arith.divf %255, %256 : vector<2x96xf32>
    %258 = vector.extract_strided_slice %235 {offsets = [0, 96], sizes = [2, 32], strides = [1, 1]} : vector<2x128xf32> to vector<2x32xf32>
    %259 = math.tanh %258 : vector<2x32xf32>
    %260 = vector.extract_strided_slice %257 {offsets = [0, 0], sizes = [2, 32], strides = [1, 1]} : vector<2x96xf32> to vector<2x32xf32>
    %261 = vector.extract_strided_slice %257 {offsets = [0, 32], sizes = [2, 32], strides = [1, 1]} : vector<2x96xf32> to vector<2x32xf32>
    %262 = vector.extract_strided_slice %257 {offsets = [0, 64], sizes = [2, 32], strides = [1, 1]} : vector<2x96xf32> to vector<2x32xf32>
    %263 = arith.mulf %261, %221 : vector<2x32xf32>
    %264 = arith.mulf %260, %259 : vector<2x32xf32>
    %265 = arith.addf %263, %264 : vector<2x32xf32>
    %266 = math.tanh %265 : vector<2x32xf32>
    %267 = arith.mulf %262, %266 : vector<2x32xf32>
    %268 = vector.broadcast %224 : i32 to vector<2x1xi32>
    %269 = arith.cmpi slt, %268, %3 : vector<2x1xi32>
    %270 = arith.extui %269 : vector<2x1xi1> to vector<2x1xi32>
    %271 = arith.sitofp %270 : vector<2x1xi32> to vector<2x1xf32>
    %272 = vector.broadcast %225 : i32 to vector<2x1xi32>
    %273 = arith.cmpi slt, %272, %3 : vector<2x1xi32>
    %274 = arith.extui %273 : vector<2x1xi1> to vector<2x1xi32>
    %275 = arith.sitofp %274 : vector<2x1xi32> to vector<2x1xf32>
    %276 = vector.broadcast %271 : vector<2x1xf32> to vector<2x32xf32>
    %277 = arith.mulf %276, %251 : vector<2x32xf32>
    %c6_68 = arith.constant 6 : index
    %c0_69 = arith.constant 0 : index
    %278 = vector.load %arg6[%c6_68, %c0_69] : memref<8x32xf32, #tpu.memory_space<vmem>>, vector<2x32xf32>
    tpu.vector_store %arg6[%c6_68, %c0_69], %277 {strides = array<i32>} : memref<8x32xf32, #tpu.memory_space<vmem>>, vector<2x32xf32>,
    %279 = vector.broadcast %275 : vector<2x1xf32> to vector<2x32xf32>
    %280 = arith.mulf %279, %267 : vector<2x32xf32>
    %cst_70 = arith.constant 1.000000e+00 : f32
    %281 = vector.broadcast %cst_70 : f32 to vector<2x1xf32>
    %282 = arith.subf %281, %275 : vector<2x1xf32>
    %283 = vector.broadcast %282 : vector<2x1xf32> to vector<2x32xf32>
    %284 = arith.mulf %283, %214 : vector<2x32xf32>
    %285 = arith.addf %280, %284 : vector<2x32xf32>
    %286 = vector.broadcast %275 : vector<2x1xf32> to vector<2x32xf32>
    %287 = arith.mulf %286, %265 : vector<2x32xf32>
    %cst_71 = arith.constant 1.000000e+00 : f32
    %288 = vector.broadcast %cst_71 : f32 to vector<2x1xf32>
    %289 = arith.subf %288, %275 : vector<2x1xf32>
    %290 = vector.broadcast %289 : vector<2x1xf32> to vector<2x32xf32>
    %291 = arith.mulf %290, %221 : vector<2x32xf32>
    %292 = arith.addf %287, %291 : vector<2x32xf32>
    %c0_72 = arith.constant 0 : index
    %c0_73 = arith.constant 0 : index
    %293 = vector.load %arg7[%c0_72, %c0_73] : memref<8x32xf32, #tpu.memory_space<vmem>>, vector<2x32xf32>
    tpu.vector_store %arg7[%c0_72, %c0_73], %285 {strides = array<i32>} : memref<8x32xf32, #tpu.memory_space<vmem>>, vector<2x32xf32>,
    %c0_74 = arith.constant 0 : index
    %c0_75 = arith.constant 0 : index
    %294 = vector.load %arg8[%c0_74, %c0_75] : memref<2x32xf32, #tpu.memory_space<vmem>>, vector<2x32xf32>
    tpu.vector_store %arg8[%c0_74, %c0_75], %251 {strides = array<i32>} : memref<2x32xf32, #tpu.memory_space<vmem>>, vector<2x32xf32>,
    %c0_76 = arith.constant 0 : index
    %c0_77 = arith.constant 0 : index
    %295 = vector.load %arg9[%c0_76, %c0_77] : memref<2x32xf32, #tpu.memory_space<vmem>>, vector<2x32xf32>
    tpu.vector_store %arg9[%c0_76, %c0_77], %249 {strides = array<i32>} : memref<2x32xf32, #tpu.memory_space<vmem>>, vector<2x32xf32>,
    %c0_78 = arith.constant 0 : index
    %c0_79 = arith.constant 0 : index
    %296 = vector.load %arg10[%c0_78, %c0_79] : memref<2x32xf32, #tpu.memory_space<vmem>>, vector<2x32xf32>
    tpu.vector_store %arg10[%c0_78, %c0_79], %285 {strides = array<i32>} : memref<2x32xf32, #tpu.memory_space<vmem>>, vector<2x32xf32>,
    %c0_80 = arith.constant 0 : index
    %c0_81 = arith.constant 0 : index
    %297 = vector.load %arg11[%c0_80, %c0_81] : memref<2x32xf32, #tpu.memory_space<vmem>>, vector<2x32xf32>
    tpu.vector_store %arg11[%c0_80, %c0_81], %292 {strides = array<i32>} : memref<2x32xf32, #tpu.memory_space<vmem>>, vector<2x32xf32>,
    return
  }
  func.func @transform_0(%arg0: i32) -> (i32, i32) {
    %c0_i32 = arith.constant 0 : i32
    %c0_i32_0 = arith.constant 0 : i32
    return %arg0, %c0_i32 : i32, i32
  }
  func.func @transform_1(%arg0: i32) -> (i32, i32) {
    %c0_i32 = arith.constant 0 : i32
    %0 = arith.subi %c0_i32, %arg0 : i32
    %c1_i32 = arith.constant 1 : i32
    %c0_i32_0 = arith.constant 0 : i32
    return %0, %c1_i32 : i32, i32
  }
  func.func @transform_2(%arg0: i32) -> (i32, i32) {
    %c0_i32 = arith.constant 0 : i32
    %c0_i32_0 = arith.constant 0 : i32
    %c0_i32_1 = arith.constant 0 : i32
    return %c0_i32, %c0_i32_0 : i32, i32
  }
  func.func @transform_3(%arg0: i32) -> (i32, i32) {
    %c0_i32 = arith.constant 0 : i32
    %c0_i32_0 = arith.constant 0 : i32
    %c0_i32_1 = arith.constant 0 : i32
    return %c0_i32, %c0_i32_0 : i32, i32
  }
  func.func @transform_4(%arg0: i32) -> (i32, i32) {
    %c0_i32 = arith.constant 0 : i32
    %c0_i32_0 = arith.constant 0 : i32
    %c0_i32_1 = arith.constant 0 : i32
    return %c0_i32, %c0_i32_0 : i32, i32
  }
  func.func @transform_5(%arg0: i32) -> (i32, i32) {
    %c0_i32 = arith.constant 0 : i32
    %c0_i32_0 = arith.constant 0 : i32
    return %arg0, %c0_i32 : i32, i32
  }
  func.func @transform_6(%arg0: i32) -> (i32, i32) {
    %c0_i32 = arith.constant 0 : i32
    %0 = arith.subi %c0_i32, %arg0 : i32
    %c0_i32_0 = arith.constant 0 : i32
    %c0_i32_1 = arith.constant 0 : i32
    return %0, %c0_i32_0 : i32, i32
  }
}

module attributes {stable_mosaic.version = 11 : i64} {
  func.func @_proj_kernel(%arg0: i32, %arg1: memref<4x32xf32, #tpu.memory_space<vmem>>, %arg2: memref<4x32xf32, #tpu.memory_space<vmem>>, %arg3: memref<32x256xbf16, #tpu.memory_space<vmem>>, %arg4: memref<32x256xbf16, #tpu.memory_space<vmem>>, %arg5: memref<1x256xf32, #tpu.memory_space<vmem>>, %arg6: memref<4x256xbf16, #tpu.memory_space<vmem>>) attributes {dimension_semantics = [#tpu.dimension_semantics<parallel>], iteration_bounds = array<i64: 1>, scalar_prefetch = 0 : i64, scratch_operands = 0 : i64, tpu.core_type = #tpu.core_type<tc>, window_params = [{transform_indices = @transform_0, window_bounds = array<i64: 4, 32>}, {transform_indices = @transform_1, window_bounds = array<i64: 4, 32>}, {pipeline_mode = #tpu.pipeline_mode<synchronous>, transform_indices = @transform_2, window_bounds = array<i64: 32, 256>}, {pipeline_mode = #tpu.pipeline_mode<synchronous>, transform_indices = @transform_3, window_bounds = array<i64: 32, 256>}, {pipeline_mode = #tpu.pipeline_mode<synchronous>, transform_indices = @transform_4, window_bounds = array<i64: 1, 256>}, {transform_indices = @transform_5, window_bounds = array<i64: 4, 256>}]} {
    %c0 = arith.constant 0 : index
    %c0_0 = arith.constant 0 : index
    %0 = vector.load %arg1[%c0, %c0_0] : memref<4x32xf32, #tpu.memory_space<vmem>>, vector<4x32xf32>
    %1 = arith.truncf %0 : vector<4x32xf32> to vector<4x32xbf16>
    %c0_1 = arith.constant 0 : index
    %c0_2 = arith.constant 0 : index
    %2 = vector.load %arg3[%c0_1, %c0_2] : memref<32x256xbf16, #tpu.memory_space<vmem>>, vector<32x256xbf16>
    %cst = arith.constant dense<0.000000e+00> : vector<4x256xf32>
    %3 = tpu.matmul %1, %2, %cst {dimension_numbers = #tpu.dot_dimension_numbers<[1], [0], [0], [1], [0, 0, 1, 1], [], []>} : vector<4x32xbf16>, vector<32x256xbf16>, vector<4x256xf32> -> vector<4x256xf32>
    %c0_3 = arith.constant 0 : index
    %c0_4 = arith.constant 0 : index
    %4 = vector.load %arg2[%c0_3, %c0_4] : memref<4x32xf32, #tpu.memory_space<vmem>>, vector<4x32xf32>
    %5 = arith.truncf %4 : vector<4x32xf32> to vector<4x32xbf16>
    %c0_5 = arith.constant 0 : index
    %c0_6 = arith.constant 0 : index
    %6 = vector.load %arg4[%c0_5, %c0_6] : memref<32x256xbf16, #tpu.memory_space<vmem>>, vector<32x256xbf16>
    %cst_7 = arith.constant dense<0.000000e+00> : vector<4x256xf32>
    %7 = tpu.matmul %5, %6, %cst_7 {dimension_numbers = #tpu.dot_dimension_numbers<[1], [0], [0], [1], [0, 0, 1, 1], [], []>} : vector<4x32xbf16>, vector<32x256xbf16>, vector<4x256xf32> -> vector<4x256xf32>
    %8 = arith.addf %3, %7 : vector<4x256xf32>
    %c0_8 = arith.constant 0 : index
    %c0_9 = arith.constant 0 : index
    %9 = vector.load %arg5[%c0_8, %c0_9] : memref<1x256xf32, #tpu.memory_space<vmem>>, vector<1x256xf32>
    %10 = vector.broadcast %9 : vector<1x256xf32> to vector<4x256xf32>
    %11 = arith.addf %8, %10 : vector<4x256xf32>
    %12 = arith.truncf %11 : vector<4x256xf32> to vector<4x256xbf16>
    %c0_10 = arith.constant 0 : index
    %c0_11 = arith.constant 0 : index
    %13 = vector.load %arg6[%c0_10, %c0_11] : memref<4x256xbf16, #tpu.memory_space<vmem>>, vector<4x256xbf16>
    tpu.vector_store %arg6[%c0_10, %c0_11], %12 {strides = array<i32>} : memref<4x256xbf16, #tpu.memory_space<vmem>>, vector<4x256xbf16>,
    return
  }
  func.func @transform_0(%arg0: i32) -> (i32, i32) {
    %c0_i32 = arith.constant 0 : i32
    %c0_i32_0 = arith.constant 0 : i32
    return %arg0, %c0_i32 : i32, i32
  }
  func.func @transform_1(%arg0: i32) -> (i32, i32) {
    %c0_i32 = arith.constant 0 : i32
    %c0_i32_0 = arith.constant 0 : i32
    return %arg0, %c0_i32 : i32, i32
  }
  func.func @transform_2(%arg0: i32) -> (i32, i32) {
    %c0_i32 = arith.constant 0 : i32
    %c0_i32_0 = arith.constant 0 : i32
    %c0_i32_1 = arith.constant 0 : i32
    return %c0_i32, %c0_i32_0 : i32, i32
  }
  func.func @transform_3(%arg0: i32) -> (i32, i32) {
    %c0_i32 = arith.constant 0 : i32
    %c0_i32_0 = arith.constant 0 : i32
    %c0_i32_1 = arith.constant 0 : i32
    return %c0_i32, %c0_i32_0 : i32, i32
  }
  func.func @transform_4(%arg0: i32) -> (i32, i32) {
    %c0_i32 = arith.constant 0 : i32
    %c0_i32_0 = arith.constant 0 : i32
    %c0_i32_1 = arith.constant 0 : i32
    return %c0_i32, %c0_i32_0 : i32, i32
  }
  func.func @transform_5(%arg0: i32) -> (i32, i32) {
    %c0_i32 = arith.constant 0 : i32
    %c0_i32_0 = arith.constant 0 : i32
    return %arg0, %c0_i32 : i32, i32
  }
}

module attributes {stable_mosaic.version = 11 : i64} {
  func.func @_bilstm_recurrence_kernel(%arg0: i32, %arg1: memref<4x128xbf16, #tpu.memory_space<vmem>>, %arg2: memref<4x128xbf16, #tpu.memory_space<vmem>>, %arg3: memref<2x1xi32, #tpu.memory_space<vmem>>, %arg4: memref<32x128xbf16, #tpu.memory_space<vmem>>, %arg5: memref<32x128xbf16, #tpu.memory_space<vmem>>, %arg6: memref<4x32xf32, #tpu.memory_space<vmem>>, %arg7: memref<4x32xf32, #tpu.memory_space<vmem>>, %arg8: memref<2x32xf32, #tpu.memory_space<vmem>>, %arg9: memref<2x32xf32, #tpu.memory_space<vmem>>, %arg10: memref<2x32xf32, #tpu.memory_space<vmem>>, %arg11: memref<2x32xf32, #tpu.memory_space<vmem>>) attributes {dimension_semantics = [#tpu.dimension_semantics<arbitrary>], iteration_bounds = array<i64: 1>, scalar_prefetch = 0 : i64, scratch_operands = 4 : i64, tpu.core_type = #tpu.core_type<tc>, window_params = [{transform_indices = @transform_0, window_bounds = array<i64: 4, 128>}, {transform_indices = @transform_1, window_bounds = array<i64: 4, 128>}, {pipeline_mode = #tpu.pipeline_mode<synchronous>, transform_indices = @transform_2, window_bounds = array<i64: 2, 1>}, {pipeline_mode = #tpu.pipeline_mode<synchronous>, transform_indices = @transform_3, window_bounds = array<i64: 32, 128>}, {pipeline_mode = #tpu.pipeline_mode<synchronous>, transform_indices = @transform_4, window_bounds = array<i64: 32, 128>}, {transform_indices = @transform_5, window_bounds = array<i64: 4, 32>}, {transform_indices = @transform_6, window_bounds = array<i64: 4, 32>}]} {
    %c0_i32 = arith.constant 0 : i32
    %0 = arith.cmpi eq, %arg0, %c0_i32 : i32
    %1 = arith.extui %0 : i1 to i32
    %c0_i32_0 = arith.constant 0 : i32
    %2 = arith.cmpi ne, %1, %c0_i32_0 : i32
    scf.if %2 {
      %cst_52 = arith.constant 0.000000e+00 : f32
      %156 = vector.broadcast %cst_52 : f32 to vector<2x32xf32>
      %c0_53 = arith.constant 0 : index
      %c0_54 = arith.constant 0 : index
      %157 = vector.load %arg8[%c0_53, %c0_54] : memref<2x32xf32, #tpu.memory_space<vmem>>, vector<2x32xf32>
      tpu.vector_store %arg8[%c0_53, %c0_54], %156 {strides = array<i32>} : memref<2x32xf32, #tpu.memory_space<vmem>>, vector<2x32xf32>,
      %c0_55 = arith.constant 0 : index
      %c0_56 = arith.constant 0 : index
      %158 = vector.load %arg9[%c0_55, %c0_56] : memref<2x32xf32, #tpu.memory_space<vmem>>, vector<2x32xf32>
      tpu.vector_store %arg9[%c0_55, %c0_56], %156 {strides = array<i32>} : memref<2x32xf32, #tpu.memory_space<vmem>>, vector<2x32xf32>,
      %c0_57 = arith.constant 0 : index
      %c0_58 = arith.constant 0 : index
      %159 = vector.load %arg10[%c0_57, %c0_58] : memref<2x32xf32, #tpu.memory_space<vmem>>, vector<2x32xf32>
      tpu.vector_store %arg10[%c0_57, %c0_58], %156 {strides = array<i32>} : memref<2x32xf32, #tpu.memory_space<vmem>>, vector<2x32xf32>,
      %c0_59 = arith.constant 0 : index
      %c0_60 = arith.constant 0 : index
      %160 = vector.load %arg11[%c0_59, %c0_60] : memref<2x32xf32, #tpu.memory_space<vmem>>, vector<2x32xf32>
      tpu.vector_store %arg11[%c0_59, %c0_60], %156 {strides = array<i32>} : memref<2x32xf32, #tpu.memory_space<vmem>>, vector<2x32xf32>,
    } else {
    }
    %c0 = arith.constant 0 : index
    %c0_1 = arith.constant 0 : index
    %3 = vector.load %arg3[%c0, %c0_1] : memref<2x1xi32, #tpu.memory_space<vmem>>, vector<2x1xi32>
    %c0_2 = arith.constant 0 : index
    %c0_3 = arith.constant 0 : index
    %4 = vector.load %arg4[%c0_2, %c0_3] : memref<32x128xbf16, #tpu.memory_space<vmem>>, vector<32x128xbf16>
    %c0_4 = arith.constant 0 : index
    %c0_5 = arith.constant 0 : index
    %5 = vector.load %arg5[%c0_4, %c0_5] : memref<32x128xbf16, #tpu.memory_space<vmem>>, vector<32x128xbf16>
    %c0_6 = arith.constant 0 : index
    %c0_7 = arith.constant 0 : index
    %6 = vector.load %arg8[%c0_6, %c0_7] : memref<2x32xf32, #tpu.memory_space<vmem>>, vector<2x32xf32>
    %c0_8 = arith.constant 0 : index
    %c0_9 = arith.constant 0 : index
    %7 = vector.load %arg9[%c0_8, %c0_9] : memref<2x32xf32, #tpu.memory_space<vmem>>, vector<2x32xf32>
    %c0_10 = arith.constant 0 : index
    %c0_11 = arith.constant 0 : index
    %8 = vector.load %arg10[%c0_10, %c0_11] : memref<2x32xf32, #tpu.memory_space<vmem>>, vector<2x32xf32>
    %c0_12 = arith.constant 0 : index
    %c0_13 = arith.constant 0 : index
    %9 = vector.load %arg11[%c0_12, %c0_13] : memref<2x32xf32, #tpu.memory_space<vmem>>, vector<2x32xf32>
    %c2_i32 = arith.constant 2 : i32
    %10 = arith.muli %arg0, %c2_i32 : i32
    %c0_i32_14 = arith.constant 0 : i32
    %11 = arith.addi %10, %c0_i32_14 : i32
    %c1_i32 = arith.constant 1 : i32
    %12 = arith.subi %c1_i32, %11 : i32
    %13 = arith.truncf %6 : vector<2x32xf32> to vector<2x32xbf16>
    %cst = arith.constant dense<0.000000e+00> : vector<2x128xf32>
    %14 = tpu.matmul %13, %4, %cst {dimension_numbers = #tpu.dot_dimension_numbers<[1], [0], [0], [1], [0, 0, 1, 1], [], []>} : vector<2x32xbf16>, vector<32x128xbf16>, vector<2x128xf32> -> vector<2x128xf32>
    %15 = arith.truncf %8 : vector<2x32xf32> to vector<2x32xbf16>
    %cst_15 = arith.constant dense<0.000000e+00> : vector<2x128xf32>
    %16 = tpu.matmul %15, %5, %cst_15 {dimension_numbers = #tpu.dot_dimension_numbers<[1], [0], [0], [1], [0, 0, 1, 1], [], []>} : vector<2x32xbf16>, vector<32x128xbf16>, vector<2x128xf32> -> vector<2x128xf32>
    %c0_16 = arith.constant 0 : index
    %c0_17 = arith.constant 0 : index
    %17 = vector.load %arg1[%c0_16, %c0_17] : memref<4x128xbf16, #tpu.memory_space<vmem>>, vector<2x128xbf16>
    %18 = arith.extf %17 : vector<2x128xbf16> to vector<2x128xf32>
    %19 = arith.addf %18, %14 : vector<2x128xf32>
    %c2 = arith.constant 2 : index
    %c0_18 = arith.constant 0 : index
    %20 = vector.load %arg2[%c2, %c0_18] : memref<4x128xbf16, #tpu.memory_space<vmem>>, vector<2x128xbf16>
    %21 = arith.extf %20 : vector<2x128xbf16> to vector<2x128xf32>
    %22 = arith.addf %21, %16 : vector<2x128xf32>
    %23 = vector.extract_strided_slice %19 {offsets = [0, 0], sizes = [2, 96], strides = [1, 1]} : vector<2x128xf32> to vector<2x96xf32>
    %24 = arith.negf %23 : vector<2x96xf32>
    %25 = math.exp %24 : vector<2x96xf32>
    %cst_19 = arith.constant 1.000000e+00 : f32
    %26 = vector.broadcast %cst_19 : f32 to vector<2x96xf32>
    %27 = arith.addf %26, %25 : vector<2x96xf32>
    %28 = arith.divf %26, %27 : vector<2x96xf32>
    %29 = vector.extract_strided_slice %19 {offsets = [0, 96], sizes = [2, 32], strides = [1, 1]} : vector<2x128xf32> to vector<2x32xf32>
    %30 = math.tanh %29 : vector<2x32xf32>
    %31 = vector.extract_strided_slice %28 {offsets = [0, 0], sizes = [2, 32], strides = [1, 1]} : vector<2x96xf32> to vector<2x32xf32>
    %32 = vector.extract_strided_slice %28 {offsets = [0, 32], sizes = [2, 32], strides = [1, 1]} : vector<2x96xf32> to vector<2x32xf32>
    %33 = vector.extract_strided_slice %28 {offsets = [0, 64], sizes = [2, 32], strides = [1, 1]} : vector<2x96xf32> to vector<2x32xf32>
    %34 = arith.mulf %32, %7 : vector<2x32xf32>
    %35 = arith.mulf %31, %30 : vector<2x32xf32>
    %36 = arith.addf %34, %35 : vector<2x32xf32>
    %37 = math.tanh %36 : vector<2x32xf32>
    %38 = arith.mulf %33, %37 : vector<2x32xf32>
    %39 = vector.extract_strided_slice %22 {offsets = [0, 0], sizes = [2, 96], strides = [1, 1]} : vector<2x128xf32> to vector<2x96xf32>
    %40 = arith.negf %39 : vector<2x96xf32>
    %41 = math.exp %40 : vector<2x96xf32>
    %cst_20 = arith.constant 1.000000e+00 : f32
    %42 = vector.broadcast %cst_20 : f32 to vector<2x96xf32>
    %43 = arith.addf %42, %41 : vector<2x96xf32>
    %44 = arith.divf %42, %43 : vector<2x96xf32>
    %45 = vector.extract_strided_slice %22 {offsets = [0, 96], sizes = [2, 32], strides = [1, 1]} : vector<2x128xf32> to vector<2x32xf32>
    %46 = math.tanh %45 : vector<2x32xf32>
    %47 = vector.extract_strided_slice %44 {offsets = [0, 0], sizes = [2, 32], strides = [1, 1]} : vector<2x96xf32> to vector<2x32xf32>
    %48 = vector.extract_strided_slice %44 {offsets = [0, 32], sizes = [2, 32], strides = [1, 1]} : vector<2x96xf32> to vector<2x32xf32>
    %49 = vector.extract_strided_slice %44 {offsets = [0, 64], sizes = [2, 32], strides = [1, 1]} : vector<2x96xf32> to vector<2x32xf32>
    %50 = arith.mulf %48, %9 : vector<2x32xf32>
    %51 = arith.mulf %47, %46 : vector<2x32xf32>
    %52 = arith.addf %50, %51 : vector<2x32xf32>
    %53 = math.tanh %52 : vector<2x32xf32>
    %54 = arith.mulf %49, %53 : vector<2x32xf32>
    %55 = vector.broadcast %11 : i32 to vector<2x1xi32>
    %56 = arith.cmpi slt, %55, %3 : vector<2x1xi32>
    %57 = arith.extui %56 : vector<2x1xi1> to vector<2x1xi32>
    %58 = arith.sitofp %57 : vector<2x1xi32> to vector<2x1xf32>
    %59 = vector.broadcast %12 : i32 to vector<2x1xi32>
    %60 = arith.cmpi slt, %59, %3 : vector<2x1xi32>
    %61 = arith.extui %60 : vector<2x1xi1> to vector<2x1xi32>
    %62 = arith.sitofp %61 : vector<2x1xi32> to vector<2x1xf32>
    %63 = vector.broadcast %58 : vector<2x1xf32> to vector<2x32xf32>
    %64 = arith.mulf %63, %38 : vector<2x32xf32>
    %c0_21 = arith.constant 0 : index
    %c0_22 = arith.constant 0 : index
    %65 = vector.load %arg6[%c0_21, %c0_22] : memref<4x32xf32, #tpu.memory_space<vmem>>, vector<2x32xf32>
    tpu.vector_store %arg6[%c0_21, %c0_22], %64 {strides = array<i32>} : memref<4x32xf32, #tpu.memory_space<vmem>>, vector<2x32xf32>,
    %66 = vector.broadcast %62 : vector<2x1xf32> to vector<2x32xf32>
    %67 = arith.mulf %66, %54 : vector<2x32xf32>
    %cst_23 = arith.constant 1.000000e+00 : f32
    %68 = vector.broadcast %cst_23 : f32 to vector<2x1xf32>
    %69 = arith.subf %68, %62 : vector<2x1xf32>
    %70 = vector.broadcast %69 : vector<2x1xf32> to vector<2x32xf32>
    %71 = arith.mulf %70, %8 : vector<2x32xf32>
    %72 = arith.addf %67, %71 : vector<2x32xf32>
    %73 = vector.broadcast %62 : vector<2x1xf32> to vector<2x32xf32>
    %74 = arith.mulf %73, %52 : vector<2x32xf32>
    %cst_24 = arith.constant 1.000000e+00 : f32
    %75 = vector.broadcast %cst_24 : f32 to vector<2x1xf32>
    %76 = arith.subf %75, %62 : vector<2x1xf32>
    %77 = vector.broadcast %76 : vector<2x1xf32> to vector<2x32xf32>
    %78 = arith.mulf %77, %9 : vector<2x32xf32>
    %79 = arith.addf %74, %78 : vector<2x32xf32>
    %c2_25 = arith.constant 2 : index
    %c0_26 = arith.constant 0 : index
    %80 = vector.load %arg7[%c2_25, %c0_26] : memref<4x32xf32, #tpu.memory_space<vmem>>, vector<2x32xf32>
    tpu.vector_store %arg7[%c2_25, %c0_26], %72 {strides = array<i32>} : memref<4x32xf32, #tpu.memory_space<vmem>>, vector<2x32xf32>,
    %c2_i32_27 = arith.constant 2 : i32
    %81 = arith.muli %arg0, %c2_i32_27 : i32
    %c1_i32_28 = arith.constant 1 : i32
    %82 = arith.addi %81, %c1_i32_28 : i32
    %c1_i32_29 = arith.constant 1 : i32
    %83 = arith.subi %c1_i32_29, %82 : i32
    %84 = arith.truncf %38 : vector<2x32xf32> to vector<2x32xbf16>
    %cst_30 = arith.constant dense<0.000000e+00> : vector<2x128xf32>
    %85 = tpu.matmul %84, %4, %cst_30 {dimension_numbers = #tpu.dot_dimension_numbers<[1], [0], [0], [1], [0, 0, 1, 1], [], []>} : vector<2x32xbf16>, vector<32x128xbf16>, vector<2x128xf32> -> vector<2x128xf32>
    %86 = arith.truncf %72 : vector<2x32xf32> to vector<2x32xbf16>
    %cst_31 = arith.constant dense<0.000000e+00> : vector<2x128xf32>
    %87 = tpu.matmul %86, %5, %cst_31 {dimension_numbers = #tpu.dot_dimension_numbers<[1], [0], [0], [1], [0, 0, 1, 1], [], []>} : vector<2x32xbf16>, vector<32x128xbf16>, vector<2x128xf32> -> vector<2x128xf32>
    %c2_32 = arith.constant 2 : index
    %c0_33 = arith.constant 0 : index
    %88 = vector.load %arg1[%c2_32, %c0_33] : memref<4x128xbf16, #tpu.memory_space<vmem>>, vector<2x128xbf16>
    %89 = arith.extf %88 : vector<2x128xbf16> to vector<2x128xf32>
    %90 = arith.addf %89, %85 : vector<2x128xf32>
    %c0_34 = arith.constant 0 : index
    %c0_35 = arith.constant 0 : index
    %91 = vector.load %arg2[%c0_34, %c0_35] : memref<4x128xbf16, #tpu.memory_space<vmem>>, vector<2x128xbf16>
    %92 = arith.extf %91 : vector<2x128xbf16> to vector<2x128xf32>
    %93 = arith.addf %92, %87 : vector<2x128xf32>
    %94 = vector.extract_strided_slice %90 {offsets = [0, 0], sizes = [2, 96], strides = [1, 1]} : vector<2x128xf32> to vector<2x96xf32>
    %95 = arith.negf %94 : vector<2x96xf32>
    %96 = math.exp %95 : vector<2x96xf32>
    %cst_36 = arith.constant 1.000000e+00 : f32
    %97 = vector.broadcast %cst_36 : f32 to vector<2x96xf32>
    %98 = arith.addf %97, %96 : vector<2x96xf32>
    %99 = arith.divf %97, %98 : vector<2x96xf32>
    %100 = vector.extract_strided_slice %90 {offsets = [0, 96], sizes = [2, 32], strides = [1, 1]} : vector<2x128xf32> to vector<2x32xf32>
    %101 = math.tanh %100 : vector<2x32xf32>
    %102 = vector.extract_strided_slice %99 {offsets = [0, 0], sizes = [2, 32], strides = [1, 1]} : vector<2x96xf32> to vector<2x32xf32>
    %103 = vector.extract_strided_slice %99 {offsets = [0, 32], sizes = [2, 32], strides = [1, 1]} : vector<2x96xf32> to vector<2x32xf32>
    %104 = vector.extract_strided_slice %99 {offsets = [0, 64], sizes = [2, 32], strides = [1, 1]} : vector<2x96xf32> to vector<2x32xf32>
    %105 = arith.mulf %103, %36 : vector<2x32xf32>
    %106 = arith.mulf %102, %101 : vector<2x32xf32>
    %107 = arith.addf %105, %106 : vector<2x32xf32>
    %108 = math.tanh %107 : vector<2x32xf32>
    %109 = arith.mulf %104, %108 : vector<2x32xf32>
    %110 = vector.extract_strided_slice %93 {offsets = [0, 0], sizes = [2, 96], strides = [1, 1]} : vector<2x128xf32> to vector<2x96xf32>
    %111 = arith.negf %110 : vector<2x96xf32>
    %112 = math.exp %111 : vector<2x96xf32>
    %cst_37 = arith.constant 1.000000e+00 : f32
    %113 = vector.broadcast %cst_37 : f32 to vector<2x96xf32>
    %114 = arith.addf %113, %112 : vector<2x96xf32>
    %115 = arith.divf %113, %114 : vector<2x96xf32>
    %116 = vector.extract_strided_slice %93 {offsets = [0, 96], sizes = [2, 32], strides = [1, 1]} : vector<2x128xf32> to vector<2x32xf32>
    %117 = math.tanh %116 : vector<2x32xf32>
    %118 = vector.extract_strided_slice %115 {offsets = [0, 0], sizes = [2, 32], strides = [1, 1]} : vector<2x96xf32> to vector<2x32xf32>
    %119 = vector.extract_strided_slice %115 {offsets = [0, 32], sizes = [2, 32], strides = [1, 1]} : vector<2x96xf32> to vector<2x32xf32>
    %120 = vector.extract_strided_slice %115 {offsets = [0, 64], sizes = [2, 32], strides = [1, 1]} : vector<2x96xf32> to vector<2x32xf32>
    %121 = arith.mulf %119, %79 : vector<2x32xf32>
    %122 = arith.mulf %118, %117 : vector<2x32xf32>
    %123 = arith.addf %121, %122 : vector<2x32xf32>
    %124 = math.tanh %123 : vector<2x32xf32>
    %125 = arith.mulf %120, %124 : vector<2x32xf32>
    %126 = vector.broadcast %82 : i32 to vector<2x1xi32>
    %127 = arith.cmpi slt, %126, %3 : vector<2x1xi32>
    %128 = arith.extui %127 : vector<2x1xi1> to vector<2x1xi32>
    %129 = arith.sitofp %128 : vector<2x1xi32> to vector<2x1xf32>
    %130 = vector.broadcast %83 : i32 to vector<2x1xi32>
    %131 = arith.cmpi slt, %130, %3 : vector<2x1xi32>
    %132 = arith.extui %131 : vector<2x1xi1> to vector<2x1xi32>
    %133 = arith.sitofp %132 : vector<2x1xi32> to vector<2x1xf32>
    %134 = vector.broadcast %129 : vector<2x1xf32> to vector<2x32xf32>
    %135 = arith.mulf %134, %109 : vector<2x32xf32>
    %c2_38 = arith.constant 2 : index
    %c0_39 = arith.constant 0 : index
    %136 = vector.load %arg6[%c2_38, %c0_39] : memref<4x32xf32, #tpu.memory_space<vmem>>, vector<2x32xf32>
    tpu.vector_store %arg6[%c2_38, %c0_39], %135 {strides = array<i32>} : memref<4x32xf32, #tpu.memory_space<vmem>>, vector<2x32xf32>,
    %137 = vector.broadcast %133 : vector<2x1xf32> to vector<2x32xf32>
    %138 = arith.mulf %137, %125 : vector<2x32xf32>
    %cst_40 = arith.constant 1.000000e+00 : f32
    %139 = vector.broadcast %cst_40 : f32 to vector<2x1xf32>
    %140 = arith.subf %139, %133 : vector<2x1xf32>
    %141 = vector.broadcast %140 : vector<2x1xf32> to vector<2x32xf32>
    %142 = arith.mulf %141, %72 : vector<2x32xf32>
    %143 = arith.addf %138, %142 : vector<2x32xf32>
    %144 = vector.broadcast %133 : vector<2x1xf32> to vector<2x32xf32>
    %145 = arith.mulf %144, %123 : vector<2x32xf32>
    %cst_41 = arith.constant 1.000000e+00 : f32
    %146 = vector.broadcast %cst_41 : f32 to vector<2x1xf32>
    %147 = arith.subf %146, %133 : vector<2x1xf32>
    %148 = vector.broadcast %147 : vector<2x1xf32> to vector<2x32xf32>
    %149 = arith.mulf %148, %79 : vector<2x32xf32>
    %150 = arith.addf %145, %149 : vector<2x32xf32>
    %c0_42 = arith.constant 0 : index
    %c0_43 = arith.constant 0 : index
    %151 = vector.load %arg7[%c0_42, %c0_43] : memref<4x32xf32, #tpu.memory_space<vmem>>, vector<2x32xf32>
    tpu.vector_store %arg7[%c0_42, %c0_43], %143 {strides = array<i32>} : memref<4x32xf32, #tpu.memory_space<vmem>>, vector<2x32xf32>,
    %c0_44 = arith.constant 0 : index
    %c0_45 = arith.constant 0 : index
    %152 = vector.load %arg8[%c0_44, %c0_45] : memref<2x32xf32, #tpu.memory_space<vmem>>, vector<2x32xf32>
    tpu.vector_store %arg8[%c0_44, %c0_45], %109 {strides = array<i32>} : memref<2x32xf32, #tpu.memory_space<vmem>>, vector<2x32xf32>,
    %c0_46 = arith.constant 0 : index
    %c0_47 = arith.constant 0 : index
    %153 = vector.load %arg9[%c0_46, %c0_47] : memref<2x32xf32, #tpu.memory_space<vmem>>, vector<2x32xf32>
    tpu.vector_store %arg9[%c0_46, %c0_47], %107 {strides = array<i32>} : memref<2x32xf32, #tpu.memory_space<vmem>>, vector<2x32xf32>,
    %c0_48 = arith.constant 0 : index
    %c0_49 = arith.constant 0 : index
    %154 = vector.load %arg10[%c0_48, %c0_49] : memref<2x32xf32, #tpu.memory_space<vmem>>, vector<2x32xf32>
    tpu.vector_store %arg10[%c0_48, %c0_49], %143 {strides = array<i32>} : memref<2x32xf32, #tpu.memory_space<vmem>>, vector<2x32xf32>,
    %c0_50 = arith.constant 0 : index
    %c0_51 = arith.constant 0 : index
    %155 = vector.load %arg11[%c0_50, %c0_51] : memref<2x32xf32, #tpu.memory_space<vmem>>, vector<2x32xf32>
    tpu.vector_store %arg11[%c0_50, %c0_51], %150 {strides = array<i32>} : memref<2x32xf32, #tpu.memory_space<vmem>>, vector<2x32xf32>,
    return
  }
  func.func @transform_0(%arg0: i32) -> (i32, i32) {
    %c0_i32 = arith.constant 0 : i32
    %c0_i32_0 = arith.constant 0 : i32
    return %arg0, %c0_i32 : i32, i32
  }
  func.func @transform_1(%arg0: i32) -> (i32, i32) {
    %c0_i32 = arith.constant 0 : i32
    %0 = arith.subi %c0_i32, %arg0 : i32
    %c1_i32 = arith.constant 1 : i32
    %c0_i32_0 = arith.constant 0 : i32
    return %0, %c1_i32 : i32, i32
  }
  func.func @transform_2(%arg0: i32) -> (i32, i32) {
    %c0_i32 = arith.constant 0 : i32
    %c0_i32_0 = arith.constant 0 : i32
    %c0_i32_1 = arith.constant 0 : i32
    return %c0_i32, %c0_i32_0 : i32, i32
  }
  func.func @transform_3(%arg0: i32) -> (i32, i32) {
    %c0_i32 = arith.constant 0 : i32
    %c0_i32_0 = arith.constant 0 : i32
    %c0_i32_1 = arith.constant 0 : i32
    return %c0_i32, %c0_i32_0 : i32, i32
  }
  func.func @transform_4(%arg0: i32) -> (i32, i32) {
    %c0_i32 = arith.constant 0 : i32
    %c0_i32_0 = arith.constant 0 : i32
    %c0_i32_1 = arith.constant 0 : i32
    return %c0_i32, %c0_i32_0 : i32, i32
  }
  func.func @transform_5(%arg0: i32) -> (i32, i32) {
    %c0_i32 = arith.constant 0 : i32
    %c0_i32_0 = arith.constant 0 : i32
    return %arg0, %c0_i32 : i32, i32
  }
  func.func @transform_6(%arg0: i32) -> (i32, i32) {
    %c0_i32 = arith.constant 0 : i32
    %0 = arith.subi %c0_i32, %arg0 : i32
    %c0_i32_0 = arith.constant 0 : i32
    %c0_i32_1 = arith.constant 0 : i32
    return %0, %c0_i32_0 : i32, i32
  }
}

module attributes {stable_mosaic.version = 11 : i64} {
  func.func @_proj_kernel(%arg0: i32, %arg1: memref<4x32xf32, #tpu.memory_space<vmem>>, %arg2: memref<4x32xf32, #tpu.memory_space<vmem>>, %arg3: memref<32x32xbf16, #tpu.memory_space<vmem>>, %arg4: memref<32x32xbf16, #tpu.memory_space<vmem>>, %arg5: memref<1x32xf32, #tpu.memory_space<vmem>>, %arg6: memref<4x32xf32, #tpu.memory_space<vmem>>) attributes {dimension_semantics = [#tpu.dimension_semantics<parallel>], iteration_bounds = array<i64: 1>, scalar_prefetch = 0 : i64, scratch_operands = 0 : i64, tpu.core_type = #tpu.core_type<tc>, window_params = [{transform_indices = @transform_0, window_bounds = array<i64: 4, 32>}, {transform_indices = @transform_1, window_bounds = array<i64: 4, 32>}, {pipeline_mode = #tpu.pipeline_mode<synchronous>, transform_indices = @transform_2, window_bounds = array<i64: 32, 32>}, {pipeline_mode = #tpu.pipeline_mode<synchronous>, transform_indices = @transform_3, window_bounds = array<i64: 32, 32>}, {pipeline_mode = #tpu.pipeline_mode<synchronous>, transform_indices = @transform_4, window_bounds = array<i64: 1, 32>}, {transform_indices = @transform_5, window_bounds = array<i64: 4, 32>}]} {
    %c0 = arith.constant 0 : index
    %c0_0 = arith.constant 0 : index
    %0 = vector.load %arg1[%c0, %c0_0] : memref<4x32xf32, #tpu.memory_space<vmem>>, vector<4x32xf32>
    %1 = arith.truncf %0 : vector<4x32xf32> to vector<4x32xbf16>
    %c0_1 = arith.constant 0 : index
    %c0_2 = arith.constant 0 : index
    %2 = vector.load %arg3[%c0_1, %c0_2] : memref<32x32xbf16, #tpu.memory_space<vmem>>, vector<32x32xbf16>
    %cst = arith.constant dense<0.000000e+00> : vector<4x32xf32>
    %3 = tpu.matmul %1, %2, %cst {dimension_numbers = #tpu.dot_dimension_numbers<[1], [0], [0], [1], [0, 0, 1, 1], [], []>} : vector<4x32xbf16>, vector<32x32xbf16>, vector<4x32xf32> -> vector<4x32xf32>
    %c0_3 = arith.constant 0 : index
    %c0_4 = arith.constant 0 : index
    %4 = vector.load %arg2[%c0_3, %c0_4] : memref<4x32xf32, #tpu.memory_space<vmem>>, vector<4x32xf32>
    %5 = arith.truncf %4 : vector<4x32xf32> to vector<4x32xbf16>
    %c0_5 = arith.constant 0 : index
    %c0_6 = arith.constant 0 : index
    %6 = vector.load %arg4[%c0_5, %c0_6] : memref<32x32xbf16, #tpu.memory_space<vmem>>, vector<32x32xbf16>
    %cst_7 = arith.constant dense<0.000000e+00> : vector<4x32xf32>
    %7 = tpu.matmul %5, %6, %cst_7 {dimension_numbers = #tpu.dot_dimension_numbers<[1], [0], [0], [1], [0, 0, 1, 1], [], []>} : vector<4x32xbf16>, vector<32x32xbf16>, vector<4x32xf32> -> vector<4x32xf32>
    %8 = arith.addf %3, %7 : vector<4x32xf32>
    %c0_8 = arith.constant 0 : index
    %c0_9 = arith.constant 0 : index
    %9 = vector.load %arg5[%c0_8, %c0_9] : memref<1x32xf32, #tpu.memory_space<vmem>>, vector<1x32xf32>
    %10 = vector.broadcast %9 : vector<1x32xf32> to vector<4x32xf32>
    %11 = arith.addf %8, %10 : vector<4x32xf32>
    %c0_10 = arith.constant 0 : index
    %c0_11 = arith.constant 0 : index
    %12 = vector.load %arg6[%c0_10, %c0_11] : memref<4x32xf32, #tpu.memory_space<vmem>>, vector<4x32xf32>
    tpu.vector_store %arg6[%c0_10, %c0_11], %11 {strides = array<i32>} : memref<4x32xf32, #tpu.memory_space<vmem>>, vector<4x32xf32>,
    return
  }
  func.func @transform_0(%arg0: i32) -> (i32, i32) {
    %c0_i32 = arith.constant 0 : i32
    %c0_i32_0 = arith.constant 0 : i32
    return %arg0, %c0_i32 : i32, i32
  }
  func.func @transform_1(%arg0: i32) -> (i32, i32) {
    %c0_i32 = arith.constant 0 : i32
    %c0_i32_0 = arith.constant 0 : i32
    return %arg0, %c0_i32 : i32, i32
  }
  func.func @transform_2(%arg0: i32) -> (i32, i32) {
    %c0_i32 = arith.constant 0 : i32
    %c0_i32_0 = arith.constant 0 : i32
    %c0_i32_1 = arith.constant 0 : i32
    return %c0_i32, %c0_i32_0 : i32, i32
  }
  func.func @transform_3(%arg0: i32) -> (i32, i32) {
    %c0_i32 = arith.constant 0 : i32
    %c0_i32_0 = arith.constant 0 : i32
    %c0_i32_1 = arith.constant 0 : i32
    return %c0_i32, %c0_i32_0 : i32, i32
  }
  func.func @transform_4(%arg0: i32) -> (i32, i32) {
    %c0_i32 = arith.constant 0 : i32
    %c0_i32_0 = arith.constant 0 : i32
    %c0_i32_1 = arith.constant 0 : i32
    return %c0_i32, %c0_i32_0 : i32, i32
  }
  func.func @transform_5(%arg0: i32) -> (i32, i32) {
    %c0_i32 = arith.constant 0 : i32
    %c0_i32_0 = arith.constant 0 : i32
    return %arg0, %c0_i32 : i32, i32
  }
}

</mosaic_0001>

<bundles_post_ra>
// kernel: encoder_forward.7
= control target key start
LH: loop header
LB: loop body
LE: loop exit
PB: predicated region body
PF: predicated region fallthrough
CT: control target
= control target key end

     0   :  { %8 = vsyncpa [#allocation3], 0  ;;  %s134_s15 = smov [#allocation2]   ;;  %s135_s17 = smov 128   ;;  %s175_s0 = inlined_call_operand.vmem [shape: f32[16,16], index: 0, kind: input, shape index: {}]   ;;  %s176_s1 = inlined_call_operand.hbm [shape: bf16[16,256], index: 1, kind: input, shape index: {}]   ;;  %s177_s2 = inlined_call_operand.vmem [shape: f32[1,256], index: 2, kind: input, shape index: {}]   ;;  %s178_s3 = inlined_call_operand.vmem [shape: bf16[16,256], index: 3, kind: output, shape index: {}]  }
   0x1   :  { %s15_s14 = sshll.u32 %s176_s1, 4  ;;  %s17_s16 = sshll.u32 %s134_s15, 4  ;;  %s16_s14 = int_to_ptr.hbm [resolvable:$true] %s15_s14  ;;  %s18_s16 = int_to_ptr.vmem [resolvable:$true] %s17_s16 }
   0x2   :  { %s136_s18 = smov 8  }
   0x3   :  { %23 = dma.hbm_to_vmem [thread:$0]  %s16_s14, 256, %s18_s16, [#allocation3], %s135_s17, %s135_s17, %s136_s18  }
   0x4   :  { %132 = dma.done.wait [#allocation3], 256  }
   0x5   :  { %133 = vsyncadd [#allocation3], 4294967040  ;;  %v95_v0 = vld [vmem:[#allocation2] sm:$0xf]  ;;  %v104_v1 = vld [vmem:[#allocation2 + $0x4] sm:$0xf0] }
   0x6   :  { %v103_v2 = vld [vmem:[#allocation2 + $0x4] sm:$0xf]  ;;  %v96_v3 = vor.u32 %v104_v1, %v95_v0  ;;  %v97_v4 = vld [vmem:[#allocation2 + $0x8] sm:$0xf0]  ;;  %vm52_vm0 = vcmask 130048  }
   0x7   :  { %v31_v5 = vld [vmem:[%s175_s0] sm:$0xff]  ;;  %v32_v6 = vld [vmem:[%s175_s0 + $0x8] sm:$0xff]  ;;  %v100_v7 = vor.u32 %v103_v2, %v97_v4 }
   0x8   :  { %v33_v8 = vpack.c.bf16 %v32_v6, %v31_v5  ;;  %63 = vmatpush.bf16.msra.mxu0 %v96_v3  ;;  %v36_v9 = vld [vmem:[%s177_s2] sm:$0x3] }
   0x9   :  { %77 = vmatpush.bf16.msra.mxu1 %v100_v7  ;;  %v38_v10 = vperm.slane %v36_v9, 0  ;;  %v39_v11 = vperm.slane %v36_v9, 1 }
   0xb   :  { %101 = vmatmul.msk.bf16.vlgmr.msra.gmra.mxu0 %vm52_vm0, %v33_v8 }
   0xc   :  { %102 = vmatmul.msk.bf16.vlgmr.msra.gmra.mxu1 %vm52_vm0, %v33_v8 }
  0x88   :  { %v65_v12 = vpop.f32.mrf.mxu0 }
  0x89   :  { %v66_v13 = vadd.f32 %v65_v12, %v38_v10  ;;  %v79_v14 = vpop.f32.mrf.mxu1 }
  0x8a   :  { %v80_v15 = vadd.f32 %v79_v14, %v39_v11 }
  0x8c   :  { %v84_v16 = vpack.c.bf16 %v80_v15, %v66_v13 }
  0x8e   :  { %86 = vst [vmem:[%s178_s3] sm:$0xff] %v84_v16 }
  0x90   :  { %v67_v17 = vpop.f32.mrf.mxu0 }
  0x91   :  { %v68_v18 = vadd.f32 %v67_v17, %v38_v10  ;;  %v81_v19 = vpop.f32.mrf.mxu1 }
  0x92   :  { %v82_v20 = vadd.f32 %v81_v19, %v39_v11 }
  0x94   :  { %v85_v21 = vpack.c.bf16 %v82_v20, %v68_v18 }
  0x96   :  { %87 = vst [vmem:[%s178_s3 + $0x8] sm:$0xff] %v85_v21 }
  0x97   :  { %92 = vsyncpa [#allocation3], 1 }

// kernel: encoder_forward.9
= control target key start
LH: loop header
LB: loop body
LE: loop exit
PB: predicated region body
PF: predicated region fallthrough
CT: control target
= control target key end

     0   :  { %10 = vsyncpa [#allocation3], 0  ;;  %s236_s21 = smov [#allocation2]   ;;  %s237_s23 = smov 128   ;;  %s308_s0 = inlined_call_operand.vmem [shape: f32[8,32], index: 0, kind: input, shape index: {}]   ;;  %s309_s1 = inlined_call_operand.vmem [shape: f32[8,32], index: 1, kind: input, shape index: {}]   ;;  %s310_s2 = inlined_call_operand.vmem [shape: bf16[32,256], index: 2, kind: input, shape index: {}]   ;;  %s311_s3 = inlined_call_operand.hbm [shape: bf16[32,256], index: 3, kind: input, shape index: {}]   ;;  %s312_s4 = inlined_call_operand.vmem [shape: f32[1,256], index: 4, kind: input, shape index: {}]   ;;  %s313_s5 = inlined_call_operand.vmem [shape: bf16[8,256], index: 5, kind: output, shape index: {}]  }
   0x1   :  { %s21_s20 = sshll.u32 %s311_s3, 4  ;;  %s23_s22 = sshll.u32 %s236_s21, 4  ;;  %s22_s20 = int_to_ptr.hbm [resolvable:$true] %s21_s20  ;;  %s24_s22 = int_to_ptr.vmem [resolvable:$true] %s23_s22 }
   0x2   :  { %s238_s24 = smov 8  }
   0x3   :  { %29 = dma.hbm_to_vmem [thread:$0]  %s22_s20, 512, %s24_s22, [#allocation3], %s237_s23, %s237_s23, %s238_s24  }
   0x4   :  { %234 = dma.done.wait [#allocation3], 512  }
   0x5   :  { %235 = vsyncadd [#allocation3], 4294966784  ;;  %v173_v0 = vld [vmem:[#allocation2 + $0x10] sm:$0xf]  ;;  %v206_v1 = vld [vmem:[#allocation2 + $0x14] sm:$0xf0] }
   0x6   :  { %v205_v2 = vld [vmem:[#allocation2 + $0x14] sm:$0xf]  ;;  %v174_v3 = vor.u32 %v206_v1, %v173_v0  ;;  %v175_v4 = vld [vmem:[#allocation2 + $0x18] sm:$0xf0]  ;;  %v191_v5 = vld [vmem:[%s310_s2 + $0x10] sm:$0xf] }
   0x7   :  { %v202_v6 = vld [vmem:[%s310_s2 + $0x14] sm:$0xf0]  ;;  %v178_v7 = vor.u32 %v205_v2, %v175_v4  ;;  %v201_v9 = vld [vmem:[%s310_s2 + $0x14] sm:$0xf]  ;;  %v193_v10 = vld [vmem:[%s310_s2 + $0x18] sm:$0xf0] }
   0x8   :  { %v192_v8 = vor.u32 %v202_v6, %v191_v5  ;;  %v165_v11 = vld [vmem:[#allocation2] sm:$0xf]  ;;  %79 = vmatpush.bf16.msra.mxu0 %v174_v3  ;;  %v196_v12 = vor.u32 %v201_v9, %v193_v10  ;;  %v204_v13 = vld [vmem:[#allocation2 + $0x4] sm:$0xf0]  ;;  %v203_v14 = vld [vmem:[#allocation2 + $0x4] sm:$0xf] }
   0x9   :  { %v167_v15 = vld [vmem:[#allocation2 + $0x8] sm:$0xf0]  ;;  %92 = vmatpush.bf16.msra.mxu1 %v178_v7  ;;  %v166_v16 = vor.u32 %v204_v13, %v165_v11  ;;  %v183_v18 = vld [vmem:[%s310_s2] sm:$0xf]  ;;  %v200_v19 = vld [vmem:[%s310_s2 + $0x4] sm:$0xf0] }
   0xa   :  { %128 = vmatpush.bf16.msra.mxu2 %v192_v8  ;;  %v170_v17 = vor.u32 %v203_v14, %v167_v15  ;;  %v199_v20 = vld [vmem:[%s310_s2 + $0x4] sm:$0xf]  ;;  %141 = vmatpush.bf16.msra.mxu3 %v196_v12  ;;  %v184_v21 = vor.u32 %v200_v19, %v183_v18  ;;  %v185_v22 = vld [vmem:[%s310_s2 + $0x8] sm:$0xf0]  ;;  %vm69_vm0 = vcmask 261120  }
   0xb   :  { %v43_v23 = vld [vmem:[%s309_s1] sm:$0xff]  ;;  %v188_v25 = vor.u32 %v199_v20, %v185_v22 }
   0xc   :  { %v37_v24 = vld [vmem:[%s308_s0] sm:$0xff]  ;;  %v44_v26 = vpack.c.bf16 %v43_v23, %v43_v23  ;;  %80 = vmatpush.bf16.msra.mxu0 %v166_v16 }
   0xd   :  { %v38_v27 = vpack.c.bf16 %v37_v24, %v37_v24  ;;  %93 = vmatpush.bf16.msra.mxu1 %v170_v17  ;;  %v148_v30 = vld [vmem:[%s312_s4] sm:$0x3] }
   0xe   :  { %129 = vmatpush.bf16.msra.mxu2 %v184_v21  ;;  %142 = vmatpush.bf16.msra.mxu3 %v188_v25  ;;  %v150_v31 = vperm.slane %v148_v30, 0  ;;  %v151_v33 = vperm.slane %v148_v30, 1 }
   0xf   :  { %179 = vmatmul.msk.bf16.vlgmr.msra.gmra.mxu0 %vm69_vm0, %v44_v26 }
  0x10   :  { %180 = vmatmul.msk.bf16.vlgmr.msra.gmra.mxu1 %vm69_vm0, %v44_v26 }
  0x11   :  { %197 = vmatmul.msk.bf16.vlgmr.msra.gmra.mxu2 %vm69_vm0, %v38_v27  ;;  %198 = vmatmul.msk.bf16.vlgmr.msra.gmra.mxu3 %vm69_vm0, %v38_v27 }
  0x8c   :  { %v82_v28 = vpop.f32.mrf.mxu0 }
  0x8d   :  { %v95_v29 = vpop.f32.mrf.mxu1 }
  0x94   :  { %v131_v32 = vpop.f32.mrf.mxu2  ;;  %v144_v35 = vpop.f32.mrf.mxu3 }
  0x95   :  { %v132_v34 = vadd.f32 %v131_v32, %v82_v28  ;;  %v84_v36 = vpop.f32.mrf.mxu0  ;;  %v145_v37 = vadd.f32 %v144_v35, %v95_v29  ;;  %v97_v38 = vpop.f32.mrf.mxu1 }
  0x97   :  { %v154_v39 = vadd.f32 %v150_v31, %v132_v34  ;;  %v155_v40 = vadd.f32 %v151_v33, %v145_v37 }
  0x99   :  { %v156_v41 = vpack.c.bf16 %v155_v40, %v154_v39 }
  0x9b   :  { %157 = vst [vmem:[%s313_s5] sm:$0xff] %v156_v41 }
  0x9c   :  { %v133_v42 = vpop.f32.mrf.mxu2  ;;  %v146_v43 = vpop.f32.mrf.mxu3 }
  0x9d   :  { %162 = vsyncpa [#allocation3], 1 }

// kernel: encoder_forward.11
= control target key start
LH: loop header
LB: loop body
LE: loop exit
PB: predicated region body
PF: predicated region fallthrough
CT: control target
= control target key end

     0   :  { %10 = vsyncpa [#allocation3], 0  ;;  %s239_s21 = smov [#allocation2]   ;;  %s330_s0 = inlined_call_operand.vmem [shape: f32[4,32], index: 0, kind: input, shape index: {}]   ;;  %s331_s1 = inlined_call_operand.vmem [shape: f32[4,32], index: 1, kind: input, shape index: {}]   ;;  %s332_s2 = inlined_call_operand.vmem [shape: bf16[32,256], index: 2, kind: input, shape index: {}]   ;;  %s333_s3 = inlined_call_operand.vmem [shape: bf16[32,256], index: 3, kind: input, shape index: {}]   ;;  %s334_s4 = inlined_call_operand.hbm [shape: f32[1,256], index: 4, kind: input, shape index: {}]   ;;  %s335_s5 = inlined_call_operand.vmem [shape: bf16[4,256], index: 5, kind: output, shape index: {}]  }
   0x1   :  { %s24_s20 = sshll.u32 %s334_s4, 4  ;;  %s26_s22 = sshll.u32 %s239_s21, 4  ;;  %s25_s20 = int_to_ptr.hbm [resolvable:$true] %s24_s20  ;;  %s27_s22 = int_to_ptr.vmem [resolvable:$true] %s26_s22 }
   0x2   :  { %29 = dma.hbm_to_vmem [thread:$0]  %s25_s20, 32, %s27_s22, [#allocation3]  }
   0x3   :  { %237 = dma.done.wait [#allocation3], 32  }
   0x4   :  { %238 = vsyncadd [#allocation3], 4294967264  ;;  %v178_v0 = vld [vmem:[%s333_s3 + $0x10] sm:$0xf]  ;;  %v211_v1 = vld [vmem:[%s333_s3 + $0x14] sm:$0xf0] }
   0x5   :  { %v210_v2 = vld [vmem:[%s333_s3 + $0x14] sm:$0xf]  ;;  %v179_v3 = vor.u32 %v211_v1, %v178_v0  ;;  %v180_v4 = vld [vmem:[%s333_s3 + $0x18] sm:$0xf0]  ;;  %v196_v5 = vld [vmem:[%s332_s2 + $0x10] sm:$0xf] }
   0x6   :  { %v207_v6 = vld [vmem:[%s332_s2 + $0x14] sm:$0xf0]  ;;  %v183_v7 = vor.u32 %v210_v2, %v180_v4  ;;  %v206_v9 = vld [vmem:[%s332_s2 + $0x14] sm:$0xf]  ;;  %v198_v10 = vld [vmem:[%s332_s2 + $0x18] sm:$0xf0] }
   0x7   :  { %v197_v8 = vor.u32 %v207_v6, %v196_v5  ;;  %v170_v11 = vld [vmem:[%s333_s3] sm:$0xf]  ;;  %77 = vmatpush.bf16.msra.mxu0 %v179_v3  ;;  %v201_v12 = vor.u32 %v206_v9, %v198_v10  ;;  %v209_v13 = vld [vmem:[%s333_s3 + $0x4] sm:$0xf0]  ;;  %v208_v14 = vld [vmem:[%s333_s3 + $0x4] sm:$0xf] }
   0x8   :  { %v172_v15 = vld [vmem:[%s333_s3 + $0x8] sm:$0xf0]  ;;  %90 = vmatpush.bf16.msra.mxu1 %v183_v7  ;;  %v171_v16 = vor.u32 %v209_v13, %v170_v11  ;;  %v188_v18 = vld [vmem:[%s332_s2] sm:$0xf]  ;;  %v205_v19 = vld [vmem:[%s332_s2 + $0x4] sm:$0xf0] }
   0x9   :  { %126 = vmatpush.bf16.msra.mxu2 %v197_v8  ;;  %v175_v17 = vor.u32 %v208_v14, %v172_v15  ;;  %v204_v20 = vld [vmem:[%s332_s2 + $0x4] sm:$0xf]  ;;  %139 = vmatpush.bf16.msra.mxu3 %v201_v12  ;;  %v189_v21 = vor.u32 %v205_v19, %v188_v18  ;;  %v190_v22 = vld [vmem:[%s332_s2 + $0x8] sm:$0xf0]  ;;  %v41_v23 = vld [vmem:[%s331_s1] sm:$0xf] }
   0xa   :  { %v35_v24 = vld [vmem:[%s330_s0] sm:$0xf]  ;;  %v193_v25 = vor.u32 %v204_v20, %v190_v22  ;;  %v42_v26 = vpack.c.bf16 %v41_v23, %v41_v23  ;;  %vm67_vm0 = vcmask 261120   ;;  %vm157_vm1 = vcmask 1041408  }
   0xb   :  { %78 = vmatpush.bf16.msra.mxu0 %v171_v16  ;;  %v36_v27 = vpack.c.bf16 %v35_v24, %v35_v24  ;;  %v146_v30 = vld [vmem:[#allocation2] sm:$0x3] }
   0xc   :  { %91 = vmatpush.bf16.msra.mxu1 %v175_v17  ;;  %v148_v31 = vperm.slane %v146_v30, 0  ;;  %v149_v33 = vperm.slane %v146_v30, 1 }
   0xd   :  { %127 = vmatpush.bf16.msra.mxu2 %v189_v21  ;;  %140 = vmatpush.bf16.msra.mxu3 %v193_v25 }
   0xe   :  { %184 = vmatmul.msk.bf16.vlgmr.msra.gmra.mxu0 %vm67_vm0, %v42_v26 }
   0xf   :  { %185 = vmatmul.msk.bf16.vlgmr.msra.gmra.mxu1 %vm67_vm0, %v42_v26 }
  0x10   :  { %202 = vmatmul.msk.bf16.vlgmr.msra.gmra.mxu2 %vm67_vm0, %v36_v27  ;;  %203 = vmatmul.msk.bf16.vlgmr.msra.gmra.mxu3 %vm67_vm0, %v36_v27 }
  0x8b   :  { %v80_v28 = vpop.f32.mrf.mxu0 }
  0x8c   :  { %v93_v29 = vpop.f32.mrf.mxu1 }
  0x93   :  { %v129_v32 = vpop.f32.mrf.mxu2  ;;  %v142_v35 = vpop.f32.mrf.mxu3 }
  0x94   :  { %v130_v34 = vadd.f32 %v129_v32, %v80_v28  ;;  %v82_v36 = vpop.f32.mrf.mxu0  ;;  %v143_v37 = vadd.f32 %v142_v35, %v93_v29  ;;  %v95_v38 = vpop.f32.mrf.mxu1 }
  0x96   :  { %v152_v39 = vadd.f32 %v148_v31, %v130_v34  ;;  %v153_v40 = vadd.f32 %v149_v33, %v143_v37 }
  0x98   :  { %v154_v41 = vpack.c.bf16 %v153_v40, %v152_v39 }
  0x9a   :  { %v156_v42 = vrot.slane %v154_v41, 2 }
  0x9b   :  { %v131_v43 = vpop.f32.mrf.mxu2  ;;  %v144_v44 = vpop.f32.mrf.mxu3 }
  0x9c   :  { %v160_v45 = vsel %vm157_vm1, %v154_v41, %v156_v42 }
  0x9d   :  { %162 = vst [vmem:[%s335_s5] sm:$0xf] %v160_v45 }
  0x9e   :  { %167 = vsyncpa [#allocation3], 1 }

// kernel: encoder_forward.10
= control target key start
LH: loop header
LB: loop body
LE: loop exit
PB: predicated region body
PF: predicated region fallthrough
CT: control target
= control target key end

     0   :  { %12 = vsyncpa [#allocation7], 0  ;;  %s1375_s0 = inlined_call_operand.vmem [shape: bf16[8,256], index: 0, kind: input, shape index: {}, may-alias: {0,1}]   ;;  %s1376_s1 = inlined_call_operand.vmem [shape: bf16[8,256], index: 1, kind: input, shape index: {}, may-alias: {0,1}]   ;;  %s1377_s2 = inlined_call_operand.vmem [shape: s32[2,1], index: 2, kind: input, shape index: {}]   ;;  %s1378_s3 = inlined_call_operand.hbm [shape: bf16[32,128], index: 3, kind: input, shape index: {}]   ;;  %s1379_s4 = inlined_call_operand.hbm [shape: bf16[32,128], index: 4, kind: input, shape index: {}]   ;;  %s1380_s5 = inlined_call_operand.vmem [shape: f32[8,32], index: 5, kind: output, shape index: {0}]   ;;  %s1381_s6 = inlined_call_operand.vmem [shape: f32[8,32], index: 6, kind: output, shape index: {1}]  }
   0x1   :  { %s32_s23 = sshll.u32 %s1378_s3, 4  ;;  %s33_s23 = int_to_ptr.hbm [resolvable:$true] %s32_s23 }
   0x2   :  { %13 = vsyncpa [#allocation9], 0  ;;  %s1105_s24 = smov [#allocation6]   ;;  %s45_s28 = sshll.u32 %s1379_s4, 4  ;;  %s46_s28 = int_to_ptr.hbm [resolvable:$true] %s45_s28 }
   0x3   :  { %s34_s25 = sshll.u32 %s1105_s24, 4  ;;  %s1106_s29 = smov 64   ;;  %s35_s25 = int_to_ptr.vmem [resolvable:$true] %s34_s25 }
   0x4   :  { %s1107_s30 = smov 4   ;;  %s1108_s7 = smov [#allocation8]  }
   0x5   :  { %40 = dma.hbm_to_vmem [thread:$0]  %s33_s23, 256, %s35_s25, [#allocation7], %s1106_s29, %s1106_s29, %s1107_s30  }
   0x6   :  { %s47_s8 = sshll.u32 %s1108_s7, 4  ;;  %s48_s8 = int_to_ptr.vmem [resolvable:$true] %s47_s8 }
   0x7   :  { %53 = dma.hbm_to_vmem [thread:$0]  %s46_s28, 256, %s48_s8, [#allocation9], %s1106_s29, %s1106_s29, %s1107_s30  }
   0x8   :  { %1101 = dma.done.wait [#allocation7], 256  }
   0x9   :  { %1102 = vsyncadd [#allocation7], 4294967040 }
   0xa   :  { %1103 = dma.done.wait [#allocation9], 256  }
   0xb   :  { %1104 = vsyncadd [#allocation9], 4294967040  ;;  %vm93_vm0 = vcmask 254976   ;;  %v1109_v0 = vmov 0.0   ;;  %v967_v1 = vld [vmem:[#allocation8 + $0x8] sm:$0xff]  ;;  %v965_v2 = vld [vmem:[#allocation6 + $0x8] sm:$0xff] }
   0xc   :  { %96 = vst.msk [vmem:[#allocation4] sm:$0x3] %vm93_vm0, %v1109_v0  ;;  %v966_v3 = vld [vmem:[#allocation8] sm:$0xff]  ;;  %165 = vmatpush.bf16.msra.mxu1 %v967_v1  ;;  %136 = vmatpush.bf16.msra.mxu0 %v965_v2  ;;  %v964_v5 = vld [vmem:[#allocation6] sm:$0xff]  ;;  %vm126_vm1 = vcmask 261120   ;;  %s1110_s3 = smov 32  }
   0xd   :  { %94 = vst.msk [vmem:[#allocation2] sm:$0x3] %vm93_vm0, %v1109_v0  ;;  %327 = vmatpush.bf16.msra.mxu2 %v965_v2  ;;  %344 = vmatpush.bf16.msra.mxu3 %v967_v1  ;;  %v930_v11 = vld [vmem:[%s1376_s1 + $0x4] sm:$0x8]  ;;  %v172_v15 = vld [vmem:[%s1375_s0] sm:$0x1] }
   0xe   :  { %95 = vst.msk [vmem:[#allocation3] sm:$0x3] %vm93_vm0, %v1109_v0  ;;  %v176_v12 = vunpack.c.l.bf16 %v930_v11  ;;  %v173_v19 = vunpack.c.l.bf16 %v172_v15  ;;  %v1190_v56 = vld [vmem:[%s1377_s2] sm:$0x3]  ;;  %v1111_v57 = vmov 0   ;;  %s1112_s2 = smov 96  }
   0xf   :  { %97 = vst.msk [vmem:[#allocation5] sm:$0x3] %vm93_vm0, %v1109_v0  ;;  %976 = vset.pattern.permute.xlu2 %v1111_v57  ;;  %vm935_vm10 = vcmp.gt.s32.totalorder %v1190_v56, 3  ;;  %977 = vset.pattern.permute.xlu1 %v1111_v57  ;;  %vm944_vm15 = vcmp.gt.s32.totalorder %v1190_v56, 2 }
  0x10   :  { %166 = vmatpush.bf16.msra.mxu1 %v966_v3  ;;  %137 = vmatpush.bf16.msra.mxu0 %v964_v5  ;;  %v1194_v58 = vsel %vm935_vm10, 1.0, %v1109_v0  ;;  %vm942_vm10 = vcmp.gt.s32.totalorder %v1190_v56, 1 }
  0x11   :  { %328 = vmatpush.bf16.msra.mxu2 %v964_v5  ;;  %345 = vmatpush.bf16.msra.mxu3 %v966_v3 }
  0x12   :  { %978 = vset.pattern.permute.xlu0 %v1111_v57 }
  0x13   :  { %v1166_v4 = vld [vmem:[#allocation4] sm:$0x3] }
  0x14   :  { %v107_v6 = vld [vmem:[#allocation2] sm:$0x3]  ;;  %v143_v8 = vpack.c.bf16 %v1166_v4, %v1166_v4  ;;  %509 = vmatpush.bf16.msrb.mxu0 %v965_v2  ;;  %526 = vmatpush.bf16.msrb.mxu1 %v967_v1 }
  0x15   :  { %v113_v9 = vpack.c.bf16 %v107_v6, %v107_v6  ;;  %691 = vmatpush.bf16.msrb.mxu2 %v965_v2  ;;  %708 = vmatpush.bf16.msrb.mxu3 %v967_v1  ;;  %v108_v17 = vld [vmem:[#allocation3] sm:$0x3]  ;;  %v295_v6 = vsub.f32 1.0, %v1194_v58 }
  0x16   :  { %v1168_v7 = vld [vmem:[#allocation5] sm:$0x3]  ;;  %929 = vmatmul.msk.bf16.vlgmr.msra.gmra.mxu1 %vm126_vm1, %v143_v8  ;;  %202 = vrot.lane.b32.xlu2 %v108_v17, %s1110_s3 }
  0x17   :  { %v243_v10 = vrot.slane %v1168_v7, 2  ;;  %920 = vmatmul.msk.bf16.vlgmr.msra.gmra.mxu0 %vm126_vm1, %v113_v9 }
  0x18   :  { %510 = vmatpush.bf16.msrb.mxu0 %v964_v5  ;;  %527 = vmatpush.bf16.msrb.mxu1 %v966_v3 }
  0x19   :  { %244 = vrot.lane.b32.xlu1 %v243_v10, %s1110_s3  ;;  %692 = vmatpush.bf16.msrb.mxu2 %v964_v5 }
  0x1a   :  { %709 = vmatpush.bf16.msrb.mxu3 %v966_v3 }
  0x70   :  { %v203_v55 = vpop.permute.xlu2 %202 }
  0x8b   :  { %v245_v62 = vpop.permute.xlu1 %244 }
  0x93   :  { %v168_v13 = vpop.f32.mrf.mxu1 }
  0x94   :  { %v139_v14 = vpop.f32.mrf.mxu0  ;;  %v178_v16 = vrot.slane %v168_v13, 2 }
  0x95   :  { %v174_v20 = vadd.f32 %v173_v19, %v139_v14 }
  0x96   :  { %v180_v18 = vadd.f32 %v178_v16, %v176_v12 }
  0x97   :  { %v931_v26 = vmul.f32 -1.442695, %v174_v20 }
  0x98   :  { %989 = vtanh.f32 %v180_v18  ;;  %v932_v25 = vmul.f32 -1.442695, %v180_v18 }
  0x99   :  { %991 = vtanh.f32 %v174_v20 }
  0x9a   :  { %993 = vpow2.f32 %v932_v25 }
  0x9b   :  { %v170_v21 = vpop.f32.mrf.mxu1  ;;  %995 = vpow2.f32 %v931_v26 }
  0x9c   :  { %v141_v22 = vpop.f32.mrf.mxu0 }
  0x9e   :  { %v990_v23 = vpop.eup %989 }
  0x9f   :  { %249 = vrot.lane.b32.xlu0 %v990_v23, %s1110_s3  ;;  %v992_v24 = vpop.eup %991 }
  0xa0   :  { %v994_v27 = vpop.eup %993 }
  0xa1   :  { %v225_v28 = vadd.f32 1.0, %v994_v27  ;;  %v996_v29 = vpop.eup %995  ;;  %v351_v27 = vld [vmem:[%s1375_s0] sm:$0x2] }
  0xa2   :  { %v184_v30 = vadd.f32 1.0, %v996_v29 }
  0xa3   :  { %997 = vrcp.f32 %v225_v28  ;;  %v237_v39 = vand.u32 2147483648, %v225_v28  ;;  %vm231_vm3 = vweird.f32 %v225_v28  ;;  %v235_v40 = vand.u32 2147483647, %v225_v28 }
  0xa4   :  { %999 = vrcp.f32 %v184_v30  ;;  %vm190_vm5 = vweird.f32 %v184_v30  ;;  %v196_v44 = vand.u32 2147483648, %v184_v30  ;;  %v194_v46 = vand.u32 2147483647, %v184_v30 }
  0xa5   :  { %v238_v43 = vor.u32 1.1754944e-38, %v237_v39  ;;  %vm236_vm7 = vcmp.eq.f32.partialorder %v235_v40, 8.507059e+37 }
  0xa6   :  { %v197_v50 = vor.u32 1.1754944e-38, %v196_v44  ;;  %vm195_vm9 = vcmp.eq.f32.partialorder %v194_v46, 8.507059e+37 }
  0xa7   :  { %207 = vrot.lane.b32.xlu0 %v992_v24, %s1110_s3 }
  0xa9   :  { %v998_v31 = vpop.eup %997 }
  0xaa   :  { %v227_v32 = vmul.f32 %v998_v31, %v225_v28  ;;  %v1000_v33 = vpop.eup %999  ;;  %vm232_vm2 = vweird.f32 %v998_v31  ;;  %v352_v28 = vunpack.c.l.bf16 %v351_v27 }
  0xab   :  { %v186_v35 = vmul.f32 %v1000_v33, %v184_v30  ;;  %vm233_vm4 = vmor %vm231_vm3, %vm232_vm2  ;;  %vm191_vm6 = vweird.f32 %v1000_v33 }
  0xac   :  { %v228_v34 = vsub.f32 1.0, %v227_v32  ;;  %vm192_vm8 = vmor %vm190_vm5, %vm191_vm6 }
  0xad   :  { %v187_v37 = vsub.f32 1.0, %v186_v35 }
  0xae   :  { %v229_v36 = vmul.f32 %v998_v31, %v228_v34 }
  0xaf   :  { %v188_v41 = vmul.f32 %v1000_v33, %v187_v37 }
  0xb0   :  { %v230_v38 = vadd.f32 %v998_v31, %v229_v36 }
  0xb1   :  { %v189_v45 = vadd.f32 %v1000_v33, %v188_v41 }
  0xb2   :  { %v234_v42 = vsel %vm233_vm4, %v998_v31, %v230_v38 }
  0xb3   :  { %v239_v47 = vsel %vm236_vm7, %v238_v43, %v234_v42  ;;  %v193_v51 = vsel %vm192_vm8, %v1000_v33, %v189_v45 }
  0xb4   :  { %v198_v52 = vsel %vm195_vm9, %v197_v50, %v193_v51  ;;  %v247_v1 = vmul.f32 %v245_v62, %v239_v47 }
  0xb5   :  { %v205_v59 = vmul.f32 %v203_v55, %v198_v52  ;;  %v1238_v55 = vsel %vm944_vm15, 1.0, %v1109_v0  ;;  %vm933_vm15 = vcmp.gt.s32.totalorder %v1190_v56, 0 }
 0x111   :  { %v250_v48 = vpop.permute.xlu0 %249 }
 0x112   :  { %v252_v49 = vmul.f32 %v250_v48, %v239_v47 }
 0x114   :  { %254 = vrot.lane.b32.xlu1 %v252_v49, %s1110_s3 }
 0x119   :  { %v208_v53 = vpop.permute.xlu0 %207 }
 0x11a   :  { %v210_v54 = vmul.f32 %v208_v53, %v198_v52 }
 0x11c   :  { %212 = vrot.lane.b32.xlu2 %v210_v54, %s1110_s3 }
 0x124   :  { %286 = vperm.xlu2 %976, %v1194_v58  }
 0x176   :  { %v213_v60 = vpop.permute.xlu2 %212 }
 0x177   :  { %v1197_v61 = vadd.f32 %v213_v60, %v205_v59 }
 0x179   :  { %1001 = vtanh.f32 %v1197_v61 }
 0x17e   :  { %v287_v15 = vpop.permute.xlu2 %286 }
 0x17f   :  { %v1002_v63 = vpop.eup %1001 }
 0x180   :  { %218 = vrot.lane.b32.xlu1 %v1002_v63, %s1110_s3 }
 0x186   :  { %v255_v2 = vpop.permute.xlu1 %254 }
 0x187   :  { %v257_v3 = vadd.f32 %v255_v2, %v247_v1 }
 0x188   :  { %298 = vperm.xlu1 %977, %v295_v6  }
 0x189   :  { %1003 = vtanh.f32 %v257_v3  ;;  %v304_v14 = vrot.slane %v257_v3, 6 }
 0x18f   :  { %v1004_v5 = vpop.eup %1003 }
 0x190   :  { %260 = vrot.lane.b32.xlu0 %v1004_v5, %s1110_s3 }
 0x1f2   :  { %v219_v8 = vpop.permute.xlu1 %218 }
 0x1f3   :  { %v1203_v9 = vmul.f32 %v219_v8, %v198_v52 }
 0x1f5   :  { %v314_v10 = vpack.c.bf16 %v1203_v9, %v1203_v9 }
 0x1f7   :  { %316 = vrot.lane.b32.xlu2 %v314_v10, %s1106_s29 }
 0x1fa   :  { %v299_v17 = vpop.permute.xlu1 %298 }
 0x1fb   :  { %v301_v18 = vmul.f32 %v299_v17, %v1166_v4  ;;  %v309_v24 = vmul.f32 %v299_v17, %v1168_v7  ;;  %v939_v7 = vld [vmem:[%s1376_s1 + $0x4] sm:$0x4] }
 0x1fc   :  { %v358_v34 = vunpack.c.l.bf16 %v939_v7 }
 0x202   :  { %v261_v11 = vpop.permute.xlu0 %260 }
 0x203   :  { %v263_v12 = vmul.f32 %v261_v11, %v239_v47 }
 0x205   :  { %v290_v13 = vrot.slane %v263_v12, 6 }
 0x207   :  { %291 = vrot.lane.b32.xlu0 %v290_v13, %s1106_s29 }
 0x20f   :  { %305 = vrot.lane.b32.xlu0 %v304_v14, %s1112_s2  ;;  %v384_v14 = vrot.slane %v1197_v61, 6 }
 0x251   :  { %v317_v16 = vpop.permute.xlu2 %316 }
 0x252   :  { %937 = vmatmul.msk.bf16.vlgmr.msra.gmra.mxu2 %vm126_vm1, %v317_v16 }
 0x279   :  { %v292_v19 = vpop.permute.xlu0 %291 }
 0x27a   :  { %v294_v20 = vmul.f32 %v292_v19, %v287_v15  ;;  %v476_v19 = vsub.f32 1.0, %v1238_v55 }
 0x27c   :  { %v1212_v21 = vadd.f32 %v301_v18, %v294_v20 }
 0x27e   :  { %311 = vst.msk [vmem:[%s1381_s6 + $0x6] sm:$0x3] %vm93_vm0, %v1212_v21  ;;  %v334_v22 = vpack.c.bf16 %v1212_v21, %v1212_v21 }
 0x280   :  { %938 = vmatmul.msk.bf16.vlgmr.msra.gmra.mxu3 %vm126_vm1, %v334_v22 }
 0x281   :  { %v306_v23 = vpop.permute.xlu0 %305 }
 0x282   :  { %v308_v25 = vmul.f32 %v306_v23, %v287_v15 }
 0x284   :  { %v1223_v4 = vadd.f32 %v309_v24, %v308_v25 }
 0x286   :  { %v424_v26 = vrot.slane %v1223_v4, 4 }
 0x288   :  { %425 = vrot.lane.b32.xlu0 %v424_v26, %s1110_s3 }
 0x2d5   :  { %v330_v29 = vpop.f32.mrf.mxu2 }
 0x2d6   :  { %v354_v30 = vrot.slane %v330_v29, 6 }
 0x2d8   :  { %v356_v31 = vadd.f32 %v354_v30, %v352_v28 }
 0x2da   :  { %1005 = vtanh.f32 %v356_v31  ;;  %v940_v40 = vmul.f32 -1.442695, %v356_v31 }
 0x2dd   :  { %v332_v32 = vpop.f32.mrf.mxu2 }
 0x2e0   :  { %v1006_v33 = vpop.eup %1005 }
 0x2e1   :  { %388 = vrot.lane.b32.xlu2 %v1006_v33, %s1110_s3 }
 0x2fa   :  { %v426_v20 = vpop.permute.xlu0 %425 }
 0x303   :  { %v347_v35 = vpop.f32.mrf.mxu3 }
 0x304   :  { %v360_v36 = vrot.slane %v347_v35, 4 }
 0x306   :  { %v362_v37 = vadd.f32 %v360_v36, %v358_v34 }
 0x308   :  { %1007 = vtanh.f32 %v362_v37  ;;  %v941_v57 = vmul.f32 -1.442695, %v362_v37 }
 0x309   :  { %1009 = vpow2.f32 %v940_v40  ;;  %v533_v40 = vld [vmem:[%s1375_s0] sm:$0x4] }
 0x30b   :  { %v349_v38 = vpop.f32.mrf.mxu3 }
 0x30e   :  { %v1008_v39 = vpop.eup %1007 }
 0x30f   :  { %430 = vrot.lane.b32.xlu1 %v1008_v39, %s1110_s3  ;;  %v1010_v41 = vpop.eup %1009 }
 0x310   :  { %v366_v42 = vadd.f32 1.0, %v1010_v41 }
 0x312   :  { %1011 = vrcp.f32 %v366_v42  ;;  %v378_v48 = vand.u32 2147483648, %v366_v42  ;;  %vm372_vm12 = vweird.f32 %v366_v42  ;;  %v376_v49 = vand.u32 2147483647, %v366_v42 }
 0x313   :  { %1013 = vpow2.f32 %v941_v57 }
 0x314   :  { %v379_v51 = vor.u32 1.1754944e-38, %v378_v48  ;;  %vm377_vm14 = vcmp.eq.f32.partialorder %v376_v49, 8.507059e+37 }
 0x318   :  { %v1012_v43 = vpop.eup %1011 }
 0x319   :  { %v368_v44 = vmul.f32 %v1012_v43, %v366_v42  ;;  %vm373_vm11 = vweird.f32 %v1012_v43  ;;  %v1014_v59 = vpop.eup %1013 }
 0x31a   :  { %vm374_vm13 = vmor %vm372_vm12, %vm373_vm11  ;;  %v406_v60 = vadd.f32 1.0, %v1014_v59 }
 0x31b   :  { %v369_v45 = vsub.f32 1.0, %v368_v44 }
 0x31c   :  { %1015 = vrcp.f32 %v406_v60  ;;  %v418_v5 = vand.u32 2147483648, %v406_v60  ;;  %vm412_vm3 = vweird.f32 %v406_v60  ;;  %v416_v6 = vand.u32 2147483647, %v406_v60 }
 0x31d   :  { %v370_v46 = vmul.f32 %v1012_v43, %v369_v45 }
 0x31e   :  { %v419_v10 = vor.u32 1.1754944e-38, %v418_v5  ;;  %vm417_vm5 = vcmp.eq.f32.partialorder %v416_v6, 8.507059e+37 }
 0x31f   :  { %v371_v47 = vadd.f32 %v1012_v43, %v370_v46 }
 0x321   :  { %v375_v50 = vsel %vm374_vm13, %v1012_v43, %v371_v47  ;;  %v534_v43 = vunpack.c.l.bf16 %v533_v40 }
 0x322   :  { %v380_v53 = vsel %vm377_vm14, %v379_v51, %v375_v50  ;;  %v1016_v62 = vpop.eup %1015 }
 0x323   :  { %v408_v63 = vmul.f32 %v1016_v62, %v406_v60  ;;  %vm413_vm2 = vweird.f32 %v1016_v62  ;;  %v386_v15 = vmul.f32 %v384_v14, %v380_v53 }
 0x324   :  { %vm414_vm4 = vmor %vm412_vm3, %vm413_vm2 }
 0x325   :  { %v409_v1 = vsub.f32 1.0, %v408_v63 }
 0x327   :  { %v410_v2 = vmul.f32 %v1016_v62, %v409_v1 }
 0x329   :  { %v411_v3 = vadd.f32 %v1016_v62, %v410_v2 }
 0x32b   :  { %v415_v8 = vsel %vm414_vm4, %v1016_v62, %v411_v3 }
 0x32c   :  { %v420_v12 = vsel %vm417_vm5, %v419_v10, %v415_v8  ;;  %v1280_v8 = vsel %vm942_vm10, 1.0, %v1109_v0  ;;  %v948_v10 = vld [vmem:[%s1376_s1 + $0x4] sm:$0x2] }
 0x32d   :  { %v428_v22 = vmul.f32 %v426_v20, %v420_v12 }
 0x33b   :  { %v389_v52 = vpop.permute.xlu2 %388 }
 0x33c   :  { %v391_v54 = vmul.f32 %v389_v52, %v380_v53 }
 0x33e   :  { %393 = vrot.lane.b32.xlu2 %v391_v54, %s1110_s3 }
 0x346   :  { %467 = vperm.xlu2 %976, %v1238_v55  }
 0x381   :  { %v431_v11 = vpop.permute.xlu1 %430 }
 0x382   :  { %v433_v13 = vmul.f32 %v431_v11, %v420_v12  ;;  %v540_v11 = vunpack.c.l.bf16 %v948_v10 }
 0x384   :  { %435 = vrot.lane.b32.xlu1 %v433_v13, %s1110_s3 }
 0x398   :  { %v394_v16 = vpop.permute.xlu2 %393 }
 0x399   :  { %v1243_v17 = vadd.f32 %v394_v16, %v386_v15 }
 0x39b   :  { %1017 = vtanh.f32 %v1243_v17 }
 0x3a0   :  { %v468_v29 = vpop.permute.xlu2 %467 }
 0x3a1   :  { %v1018_v18 = vpop.eup %1017 }
 0x3a2   :  { %399 = vrot.lane.b32.xlu1 %v1018_v18, %s1110_s3 }
 0x3aa   :  { %479 = vperm.xlu1 %977, %v476_v19  }
 0x3f6   :  { %v436_v23 = vpop.permute.xlu1 %435 }
 0x3f7   :  { %v438_v24 = vadd.f32 %v436_v23, %v428_v22 }
 0x3f9   :  { %1019 = vtanh.f32 %v438_v24  ;;  %v485_v7 = vrot.slane %v438_v24, 4 }
 0x3ff   :  { %v1020_v25 = vpop.eup %1019 }
 0x400   :  { %441 = vrot.lane.b32.xlu0 %v1020_v25, %s1110_s3 }
 0x414   :  { %v400_v61 = vpop.permute.xlu1 %399 }
 0x415   :  { %v1249_v26 = vmul.f32 %v400_v61, %v380_v53 }
 0x417   :  { %v495_v27 = vpack.c.bf16 %v1249_v26, %v1249_v26 }
 0x419   :  { %v497_v28 = vrot.slane %v495_v27, 1 }
 0x41b   :  { %498 = vrot.lane.b32.xlu2 %v497_v28, %s1106_s29 }
 0x41c   :  { %v480_v34 = vpop.permute.xlu1 %479 }
 0x41d   :  { %v482_v36 = vmul.f32 %v480_v34, %v1212_v21  ;;  %v490_v21 = vmul.f32 %v480_v34, %v1223_v4 }
 0x472   :  { %v442_v30 = vpop.permute.xlu0 %441 }
 0x473   :  { %v444_v31 = vmul.f32 %v442_v30, %v420_v12 }
 0x475   :  { %v471_v32 = vrot.slane %v444_v31, 4  ;;  %v499_v33 = vpop.permute.xlu2 %498 }
 0x476   :  { %946 = vmatmul.msk.bf16.vlgmr.msrb.gmra.mxu0 %vm126_vm1, %v499_v33 }
 0x477   :  { %472 = vrot.lane.b32.xlu0 %v471_v32, %s1106_s29 }
 0x47f   :  { %486 = vrot.lane.b32.xlu0 %v485_v7, %s1112_s2 }
 0x4e9   :  { %v473_v35 = vpop.permute.xlu0 %472 }
 0x4ea   :  { %v475_v37 = vmul.f32 %v473_v35, %v468_v29 }
 0x4ec   :  { %v1258_v38 = vadd.f32 %v482_v36, %v475_v37 }
 0x4ee   :  { %492 = vst.msk [vmem:[%s1381_s6 + $0x4] sm:$0x3] %vm93_vm0, %v1258_v38  ;;  %v516_v39 = vpack.c.bf16 %v1258_v38, %v1258_v38 }
 0x4f0   :  { %947 = vmatmul.msk.bf16.vlgmr.msrb.gmra.mxu1 %vm126_vm1, %v516_v39 }
 0x4f1   :  { %v487_v41 = vpop.permute.xlu0 %486 }
 0x4f2   :  { %v489_v42 = vmul.f32 %v487_v41, %v468_v29  ;;  %v566_v29 = vrot.slane %v1243_v17, 6  ;;  %v658_v17 = vsub.f32 1.0, %v1280_v8 }
 0x4f3   :  { %v512_v44 = vpop.f32.mrf.mxu0 }
 0x4f4   :  { %v1272_v45 = vadd.f32 %v490_v21, %v489_v42  ;;  %v536_v46 = vrot.slane %v512_v44, 4 }
 0x4f6   :  { %v538_v47 = vadd.f32 %v536_v46, %v534_v43  ;;  %v606_v48 = vrot.slane %v1272_v45, 6 }
 0x4f8   :  { %1021 = vtanh.f32 %v538_v47  ;;  %607 = vrot.lane.b32.xlu0 %v606_v48, %s1110_s3  ;;  %v949_v51 = vmul.f32 -1.442695, %v538_v47 }
 0x4fa   :  { %1023 = vpow2.f32 %v949_v51 }
 0x4fb   :  { %v514_v49 = vpop.f32.mrf.mxu0 }
 0x4fe   :  { %v1022_v50 = vpop.eup %1021 }
 0x4ff   :  { %570 = vrot.lane.b32.xlu2 %v1022_v50, %s1110_s3 }
 0x500   :  { %v1024_v52 = vpop.eup %1023 }
 0x501   :  { %v548_v4 = vadd.f32 1.0, %v1024_v52 }
 0x503   :  { %1025 = vrcp.f32 %v548_v4  ;;  %v560_v62 = vand.u32 2147483648, %v548_v4  ;;  %vm554_vm7 = vweird.f32 %v548_v4  ;;  %v558_v63 = vand.u32 2147483647, %v548_v4 }
 0x505   :  { %v561_v2 = vor.u32 1.1754944e-38, %v560_v62  ;;  %vm559_vm9 = vcmp.eq.f32.partialorder %v558_v63, 8.507059e+37 }
 0x509   :  { %v1026_v53 = vpop.eup %1025 }
 0x50a   :  { %v550_v54 = vmul.f32 %v1026_v53, %v548_v4  ;;  %vm555_vm6 = vweird.f32 %v1026_v53 }
 0x50b   :  { %vm556_vm8 = vmor %vm554_vm7, %vm555_vm6 }
 0x50c   :  { %v551_v57 = vsub.f32 1.0, %v550_v54 }
 0x50e   :  { %v552_v59 = vmul.f32 %v1026_v53, %v551_v57 }
 0x510   :  { %v553_v60 = vadd.f32 %v1026_v53, %v552_v59 }
 0x512   :  { %v557_v1 = vsel %vm556_vm8, %v1026_v53, %v553_v60  ;;  %v715_v53 = vld [vmem:[%s1375_s0] sm:$0x8] }
 0x513   :  { %v562_v5 = vsel %vm559_vm9, %v561_v2, %v557_v1  ;;  %v716_v54 = vunpack.c.l.bf16 %v715_v53  ;;  %vm858_vm9 = vcmask 261126  }
 0x514   :  { %v568_v32 = vmul.f32 %v566_v29, %v562_v5 }
 0x559   :  { %v571_v3 = vpop.permute.xlu2 %570 }
 0x55a   :  { %v573_v6 = vmul.f32 %v571_v3, %v562_v5 }
 0x55c   :  { %575 = vrot.lane.b32.xlu2 %v573_v6, %s1110_s3 }
 0x564   :  { %649 = vperm.xlu2 %976, %v1280_v8  }
 0x56a   :  { %v608_v39 = vpop.permute.xlu0 %607 }
 0x56d   :  { %v529_v12 = vpop.f32.mrf.mxu1 }
 0x56e   :  { %v542_v13 = vrot.slane %v529_v12, 6 }
 0x570   :  { %v544_v14 = vadd.f32 %v542_v13, %v540_v11 }
 0x572   :  { %1027 = vtanh.f32 %v544_v14  ;;  %v950_v18 = vmul.f32 -1.442695, %v544_v14  ;;  %v1322_v14 = vsel %vm933_vm15, 1.0, %v1109_v0 }
 0x574   :  { %1029 = vpow2.f32 %v950_v18 }
 0x575   :  { %v531_v15 = vpop.f32.mrf.mxu1 }
 0x576   :  { %v831_v15 = vsub.f32 1.0, %v1322_v14 }
 0x578   :  { %v1028_v16 = vpop.eup %1027 }
 0x579   :  { %612 = vrot.lane.b32.xlu1 %v1028_v16, %s1110_s3 }
 0x57a   :  { %v1030_v19 = vpop.eup %1029 }
 0x57b   :  { %v588_v20 = vadd.f32 1.0, %v1030_v19 }
 0x57d   :  { %1031 = vrcp.f32 %v588_v20  ;;  %v600_v27 = vand.u32 2147483648, %v588_v20  ;;  %vm594_vm12 = vweird.f32 %v588_v20  ;;  %v598_v28 = vand.u32 2147483647, %v588_v20 }
 0x57f   :  { %v601_v33 = vor.u32 1.1754944e-38, %v600_v27  ;;  %vm599_vm14 = vcmp.eq.f32.partialorder %v598_v28, 8.507059e+37 }
 0x583   :  { %v1032_v22 = vpop.eup %1031 }
 0x584   :  { %v590_v23 = vmul.f32 %v1032_v22, %v588_v20  ;;  %vm595_vm11 = vweird.f32 %v1032_v22 }
 0x585   :  { %vm596_vm13 = vmor %vm594_vm12, %vm595_vm11 }
 0x586   :  { %v591_v24 = vsub.f32 1.0, %v590_v23 }
 0x588   :  { %v592_v25 = vmul.f32 %v1032_v22, %v591_v24 }
 0x58a   :  { %v593_v61 = vadd.f32 %v1032_v22, %v592_v25 }
 0x58c   :  { %v597_v31 = vsel %vm596_vm13, %v1032_v22, %v593_v61 }
 0x58d   :  { %v602_v35 = vsel %vm599_vm14, %v601_v33, %v597_v31  ;;  %v957_v31 = vld [vmem:[%s1376_s1 + $0x4] sm:$0x1] }
 0x58e   :  { %v610_v40 = vmul.f32 %v608_v39, %v602_v35  ;;  %v722_v33 = vunpack.c.l.bf16 %v957_v31 }
 0x5b6   :  { %v576_v30 = vpop.permute.xlu2 %575 }
 0x5b7   :  { %v1288_v7 = vadd.f32 %v576_v30, %v568_v32 }
 0x5b9   :  { %1033 = vtanh.f32 %v1288_v7 }
 0x5be   :  { %v650_v48 = vpop.permute.xlu2 %649 }
 0x5bf   :  { %v1034_v37 = vpop.eup %1033 }
 0x5eb   :  { %v613_v34 = vpop.permute.xlu1 %612 }
 0x5ec   :  { %v615_v36 = vmul.f32 %v613_v34, %v602_v35 }
 0x5ee   :  { %617 = vrot.lane.b32.xlu1 %v615_v36, %s1110_s3 }
 0x5f6   :  { %581 = vrot.lane.b32.xlu1 %v1034_v37, %s1110_s3  ;;  %v459_v37 = vrot.slane %v1249_v26, 2 }
 0x5fe   :  { %661 = vperm.xlu1 %977, %v658_v17  }
 0x660   :  { %v618_v41 = vpop.permute.xlu1 %617 }
 0x661   :  { %v620_v21 = vadd.f32 %v618_v41, %v610_v40 }
 0x663   :  { %1035 = vtanh.f32 %v620_v21  ;;  %v667_v4 = vrot.slane %v620_v21, 2 }
 0x668   :  { %v582_v42 = vpop.permute.xlu1 %581 }
 0x669   :  { %v1036_v43 = vpop.eup %1035  ;;  %v1294_v44 = vmul.f32 %v582_v42, %v562_v5 }
 0x66a   :  { %623 = vrot.lane.b32.xlu0 %v1036_v43, %s1110_s3 }
 0x66b   :  { %v677_v46 = vpack.c.bf16 %v1294_v44, %v1294_v44 }
 0x66d   :  { %v679_v47 = vrot.slane %v677_v46, 2 }
 0x66f   :  { %680 = vrot.lane.b32.xlu2 %v679_v47, %s1106_s29 }
 0x670   :  { %v662_v62 = vpop.permute.xlu1 %661 }
 0x671   :  { %v664_v1 = vmul.f32 %v662_v62, %v1258_v38  ;;  %v672_v38 = vmul.f32 %v662_v62, %v1272_v45 }
 0x6c9   :  { %v681_v49 = vpop.permute.xlu2 %680 }
 0x6ca   :  { %955 = vmatmul.msk.bf16.vlgmr.msrb.gmra.mxu2 %vm126_vm1, %v681_v49 }
 0x6dc   :  { %v624_v50 = vpop.permute.xlu0 %623 }
 0x6dd   :  { %v626_v51 = vmul.f32 %v624_v50, %v602_v35  ;;  %v745_v50 = vrot.slane %v1288_v7, 6 }
 0x6df   :  { %v653_v52 = vrot.slane %v626_v51, 2 }
 0x6e1   :  { %654 = vrot.lane.b32.xlu0 %v653_v52, %s1106_s29 }
 0x6e9   :  { %668 = vrot.lane.b32.xlu0 %v667_v4, %s1112_s2 }
 0x74d   :  { %v694_v57 = vpop.f32.mrf.mxu2 }
 0x74e   :  { %v718_v59 = vrot.slane %v694_v57, 2 }
 0x750   :  { %v720_v60 = vadd.f32 %v718_v59, %v716_v54 }
 0x752   :  { %1037 = vtanh.f32 %v720_v60  ;;  %v958_v16 = vmul.f32 -1.442695, %v720_v60 }
 0x753   :  { %v655_v63 = vpop.permute.xlu0 %654 }
 0x754   :  { %v657_v2 = vmul.f32 %v655_v63, %v650_v48  ;;  %1039 = vpow2.f32 %v958_v16  ;;  %v979_v63 = vpack.i.bf16 %v1322_v14, %v1322_v14 }
 0x755   :  { %v696_v3 = vpop.f32.mrf.mxu2 }
 0x756   :  { %v1307_v5 = vadd.f32 %v664_v1, %v657_v2 }
 0x758   :  { %v1038_v6 = vpop.eup %1037  ;;  %674 = vst.msk [vmem:[%s1381_s6 + $0x2] sm:$0x3] %vm93_vm0, %v1307_v5  ;;  %v698_v10 = vpack.c.bf16 %v1307_v5, %v1307_v5 }
 0x759   :  { %749 = vrot.lane.b32.xlu1 %v1038_v6, %s1110_s3 }
 0x75a   :  { %956 = vmatmul.msk.bf16.vlgmr.msrb.gmra.mxu3 %vm126_vm1, %v698_v10  ;;  %v1040_v18 = vpop.eup %1039  ;;  %v984_v10 = vpack.i.bf16 %v1238_v55, %v1280_v8  ;;  %v641_v55 = vrot.slane %v1294_v44, 4 }
 0x75b   :  { %v669_v11 = vpop.permute.xlu0 %668  ;;  %v727_v19 = vadd.f32 1.0, %v1040_v18 }
 0x75c   :  { %v671_v12 = vmul.f32 %v669_v11, %v650_v48 }
 0x75d   :  { %1041 = vrcp.f32 %v727_v19  ;;  %v739_v56 = vand.u32 2147483648, %v727_v19  ;;  %vm733_vm2 = vweird.f32 %v727_v19  ;;  %v737_v25 = vand.u32 2147483647, %v727_v19 }
 0x75e   :  { %v673_v13 = vadd.f32 %v672_v38, %v671_v12 }
 0x75f   :  { %v740_v61 = vor.u32 1.1754944e-38, %v739_v56  ;;  %vm738_vm4 = vcmp.eq.f32.partialorder %v737_v25, 8.507059e+37 }
 0x760   :  { %785 = vrot.lane.b32.xlu0 %v673_v13, %s1110_s3 }
 0x763   :  { %v1042_v20 = vpop.eup %1041 }
 0x764   :  { %v729_v22 = vmul.f32 %v1042_v20, %v727_v19  ;;  %vm734_vm1 = vweird.f32 %v1042_v20 }
 0x765   :  { %vm735_vm3 = vmor %vm733_vm2, %vm734_vm1 }
 0x766   :  { %v730_v45 = vsub.f32 1.0, %v729_v22 }
 0x768   :  { %834 = vperm.xlu0 %978, %v831_v15   ;;  %v731_v23 = vmul.f32 %v1042_v20, %v730_v45 }
 0x76a   :  { %v732_v24 = vadd.f32 %v1042_v20, %v731_v23 }
 0x76c   :  { %v736_v0 = vsel %vm735_vm3, %v1042_v20, %v732_v24 }
 0x76d   :  { %v741_v27 = vsel %vm738_vm4, %v740_v61, %v736_v0 }
 0x76e   :  { %v747_v52 = vmul.f32 %v745_v50, %v741_v27 }
 0x7cb   :  { %v750_v28 = vpop.permute.xlu1 %749 }
 0x7cc   :  { %v752_v29 = vmul.f32 %v750_v28, %v741_v27 }
 0x7ce   :  { %754 = vrot.lane.b32.xlu1 %v752_v29, %s1110_s3 }
 0x7d2   :  { %v786_v30 = vpop.permute.xlu0 %785 }
 0x7da   :  { %v835_v32 = vpop.permute.xlu0 %834 }
 0x7db   :  { %v844_v34 = vmul.f32 %v835_v32, %v673_v13  ;;  %v837_v6 = vmul.f32 %v835_v32, %v1307_v5 }
 0x7dd   :  { %846 = vrot.lane.b32.xlu0 %v844_v34, %s1110_s3  ;;  %v711_v35 = vpop.f32.mrf.mxu3 }
 0x7de   :  { %v723_v36 = vadd.f32 %v722_v33, %v711_v35 }
 0x7e0   :  { %1043 = vtanh.f32 %v723_v36  ;;  %v959_v40 = vmul.f32 -1.442695, %v723_v36 }
 0x7e2   :  { %1045 = vpow2.f32 %v959_v40 }
 0x7e5   :  { %460 = vrot.lane.b32.xlu0 %v459_v37, %s1106_s29  ;;  %v713_v17 = vpop.f32.mrf.mxu3 }
 0x7e6   :  { %v1044_v39 = vpop.eup %1043 }
 0x7e7   :  { %790 = vrot.lane.b32.xlu2 %v1044_v39, %s1110_s3 }
 0x7e8   :  { %v1046_v41 = vpop.eup %1045 }
 0x7e9   :  { %v767_v21 = vadd.f32 1.0, %v1046_v41 }
 0x7eb   :  { %1047 = vrcp.f32 %v767_v21  ;;  %v779_v49 = vand.u32 2147483648, %v767_v21  ;;  %vm773_vm6 = vweird.f32 %v767_v21  ;;  %v777_v26 = vand.u32 2147483647, %v767_v21 }
 0x7ed   :  { %v780_v4 = vor.u32 1.1754944e-38, %v779_v49  ;;  %vm778_vm8 = vcmp.eq.f32.partialorder %v777_v26, 8.507059e+37 }
 0x7f1   :  { %v1048_v42 = vpop.eup %1047 }
 0x7f2   :  { %v769_v43 = vmul.f32 %v1048_v42, %v767_v21  ;;  %vm774_vm5 = vweird.f32 %v1048_v42 }
 0x7f3   :  { %vm775_vm7 = vmor %vm773_vm6, %vm774_vm5 }
 0x7f4   :  { %v770_v46 = vsub.f32 1.0, %v769_v43 }
 0x7f6   :  { %v771_v47 = vmul.f32 %v1048_v42, %v770_v46 }
 0x7f8   :  { %v772_v48 = vadd.f32 %v1048_v42, %v771_v47 }
 0x7fa   :  { %v776_v51 = vsel %vm775_vm7, %v1048_v42, %v772_v48 }
 0x7fb   :  { %v781_v59 = vsel %vm778_vm8, %v780_v4, %v776_v51 }
 0x7fc   :  { %v788_v7 = vmul.f32 %v786_v30, %v781_v59 }
 0x840   :  { %v755_v53 = vpop.permute.xlu1 %754 }
 0x841   :  { %v757_v54 = vadd.f32 %v755_v53, %v747_v52  ;;  %v791_v57 = vpop.permute.xlu2 %790 }
 0x842   :  { %v793_v60 = vmul.f32 %v791_v57, %v781_v59 }
 0x843   :  { %1049 = vtanh.f32 %v757_v54 }
 0x844   :  { %795 = vrot.lane.b32.xlu2 %v793_v60, %s1110_s3 }
 0x849   :  { %v1050_v62 = vpop.eup %1049 }
 0x84a   :  { %760 = vrot.lane.b32.xlu1 %v1050_v62, %s1110_s3 }
 0x84f   :  { %v847_v18 = vpop.permute.xlu0 %846 }
 0x852   :  { %980 = vperm.xlu1 %977, %v979_v63  }
 0x857   :  { %v461_v24 = vpop.permute.xlu0 %460 }
 0x89e   :  { %v796_v1 = vpop.permute.xlu2 %795 }
 0x89f   :  { %v798_v2 = vadd.f32 %v796_v1, %v788_v7 }
 0x8a1   :  { %1051 = vtanh.f32 %v798_v2 }
 0x8a7   :  { %v1052_v3 = vpop.eup %1051 }
 0x8a8   :  { %801 = vrot.lane.b32.xlu2 %v1052_v3, %s1110_s3 }
 0x8b0   :  { %839 = vrot.lane.b32.xlu2 %v837_v6, %s1106_s29 }
 0x8b8   :  { %985 = vperm.xlu2 %976, %v984_v10  }
 0x8bc   :  { %v761_v11 = vpop.permute.xlu1 %760 }
 0x8bd   :  { %v763_v38 = vmul.f32 %v761_v11, %v741_v27 }
 0x8bf   :  { %v819_v12 = vrot.slane %v763_v38, 6 }
 0x8c0   :  { %815 = vperm.xlu2 %976, %v1194_v58  }
 0x8c1   :  { %820 = vrot.lane.b32.xlu0 %v819_v12, %s1106_s29 }
 0x8c4   :  { %v981_v13 = vpop.permute.xlu1 %980 }
 0x8c5   :  { %v983_v14 = vunpack.i.h.bf16 %v981_v13  ;;  %v982_v16 = vunpack.i.l.bf16 %v981_v13 }
 0x8c7   :  { %v277_v15 = vmul.f32 %v983_v14, %v1203_v9  ;;  %v843_v9 = vmul.f32 %v982_v16, %v798_v2 }
 0x8c8   :  { %855 = vrot.lane.b32.xlu2 %v763_v38, %s1106_s29 }
 0x8c9   :  { %861 = vrot.lane.b32.xlu0 %v757_v54, %s1112_s2  ;;  %279 = vrot.lane.b32.xlu1 %v277_v15, %s1106_s29  ;;  %v849_v23 = vadd.f32 %v847_v18, %v843_v9 }
 0x8d1   :  { %642 = vrot.lane.b32.xlu1 %v641_v55, %s1106_s29 }
 0x902   :  { %v802_v8 = vpop.permute.xlu2 %801 }
 0x903   :  { %v804_v5 = vmul.f32 %v802_v8, %v781_v59 }
 0x905   :  { %v830_v58 = vmul.f32 %v982_v16, %v804_v5 }
 0x90a   :  { %v840_v19 = vpop.permute.xlu2 %839 }
 0x90b   :  { %v842_v20 = vadd.f32 %v840_v19, %v830_v58 }
 0x90d   :  { %851 = vrot.lane.b32.xlu1 %v842_v20, %s1106_s29 }
 0x912   :  { %v986_v22 = vpop.permute.xlu2 %985 }
 0x913   :  { %v987_v45 = vunpack.i.l.bf16 %v986_v22  ;;  %v988_v29 = vunpack.i.h.bf16 %v986_v22 }
 0x915   :  { %v463_v56 = vmul.f32 %v987_v45, %v461_v24  ;;  %867 = vrot.lane.b32.xlu1 %v849_v23, %s1112_s2 }
 0x917   :  { %464 = vst.msk [vmem:[%s1380_s5 + $0x2] sm:$0x3] %vm93_vm0, %v463_v56 }
 0x91a   :  { %v816_v44 = vpop.permute.xlu2 %815 }
 0x922   :  { %v856_v25 = vpop.permute.xlu2 %855 }
 0x923   :  { %859 = vst.msk [vmem:[#allocation2 - $0x6] sm:$0xc0] %vm858_vm9, %v856_v25 }
 0x933   :  { %v821_v0 = vpop.permute.xlu0 %820 }
 0x934   :  { %v823_v61 = vmul.f32 %v821_v0, %v816_v44 }
 0x936   :  { %824 = vst.msk [vmem:[%s1380_s5 + $0x6] sm:$0x3] %vm93_vm0, %v823_v61 }
 0x93b   :  { %v862_v27 = vpop.permute.xlu0 %861  ;;  %v280_v28 = vpop.permute.xlu1 %279 }
 0x93c   :  { %864 = vst.msk [vmem:[#allocation3 - $0x6] sm:$0xc0] %vm858_vm9, %v862_v27 }
 0x93d   :  { %283 = vst.msk [vmem:[%s1380_s5] sm:$0x3] %vm93_vm0, %v280_v28 }
 0x943   :  { %v643_v30 = vpop.permute.xlu1 %642 }
 0x944   :  { %v645_v31 = vmul.f32 %v988_v29, %v643_v30 }
 0x946   :  { %646 = vst.msk [vmem:[%s1380_s5 + $0x4] sm:$0x3] %vm93_vm0, %v645_v31 }
 0x97f   :  { %v852_v32 = vpop.permute.xlu1 %851 }
 0x980   :  { %854 = vst.msk [vmem:[%s1381_s6] sm:$0x3] %vm93_vm0, %v852_v32 }
 0x981   :  { %865 = vst.msk [vmem:[#allocation4] sm:$0x3] %vm93_vm0, %v852_v32 }
 0x987   :  { %v868_v33 = vpop.permute.xlu1 %867 }
 0x988   :  { %870 = vst.msk [vmem:[#allocation5] sm:$0x3] %vm93_vm0, %v868_v33 }
 0x989   :  { %890 = vsyncpa [#allocation7], 1 }
 0x98a   :  { %891 = vsyncpa [#allocation9], 1 }

// kernel: encoder_forward.8
= control target key start
LH: loop header
LB: loop body
LE: loop exit
PB: predicated region body
PF: predicated region fallthrough
CT: control target
= control target key end

     0   :  { %12 = vsyncpa [#allocation9], 0  ;;  %s2025_s8 = smov [#allocation8]   ;;  %s2528_s0 = inlined_call_operand.vmem [shape: bf16[16,256], index: 0, kind: input, shape index: {}, may-alias: {0,1}]   ;;  %s2529_s1 = inlined_call_operand.vmem [shape: bf16[16,256], index: 1, kind: input, shape index: {}, may-alias: {0,1}]   ;;  %s2530_s2 = inlined_call_operand.vmem [shape: s32[2,1], index: 2, kind: input, shape index: {}]   ;;  %s2531_s3 = inlined_call_operand.hbm [shape: bf16[32,128], index: 3, kind: input, shape index: {}]   ;;  %s2532_s4 = inlined_call_operand.hbm [shape: bf16[32,128], index: 4, kind: input, shape index: {}]   ;;  %s2533_s5 = inlined_call_operand.vmem [shape: f32[16,32], index: 5, kind: output, shape index: {0}]   ;;  %s2534_s6 = inlined_call_operand.vmem [shape: f32[16,32], index: 6, kind: output, shape index: {1}]  }
   0x1   :  { %v32_v0 = vld [vmem:[%s2528_s0] sm:$0xf]  ;;  %v34_v1 = vld [vmem:[%s2528_s0 + $0x8] sm:$0xf]  ;;  %v1727_v2 = vld [vmem:[%s2529_s1 + $0x4] sm:$0xf] }
   0x2   :  { %33 = vst [vmem:[#allocation6] sm:$0xf] %v32_v0  ;;  %v1728_v3 = vld [vmem:[%s2529_s1 + $0xc] sm:$0xf]  ;;  %s120_s7 = sshll.u32 %s2531_s3, 4  ;;  %s122_s9 = sshll.u32 %s2025_s8, 4  ;;  %s121_s7 = int_to_ptr.hbm [resolvable:$true] %s120_s7  ;;  %s123_s9 = int_to_ptr.vmem [resolvable:$true] %s122_s9 }
   0x3   :  { %35 = vst [vmem:[#allocation6 + $0x4] sm:$0xf] %v34_v1 }
   0x4   :  { %13 = vsyncpa [#allocation11], 0  ;;  %86 = vst [vmem:[#allocation7] sm:$0xf] %v1727_v2  ;;  %s133_s11 = sshll.u32 %s2532_s4, 4  ;;  %s2026_s12 = smov 64   ;;  %s134_s11 = int_to_ptr.hbm [resolvable:$true] %s133_s11 }
   0x5   :  { %88 = vst [vmem:[#allocation7 + $0x4] sm:$0xf] %v1728_v3  ;;  %s2027_s13 = smov 4   ;;  %s2028_s1 = smov [#allocation10]  }
   0x6   :  { %128 = dma.hbm_to_vmem [thread:$0]  %s121_s7, 256, %s123_s9, [#allocation9], %s2026_s12, %s2026_s12, %s2027_s13  }
   0x7   :  { %s135_s3 = sshll.u32 %s2028_s1, 4  ;;  %s136_s3 = int_to_ptr.vmem [resolvable:$true] %s135_s3 }
   0x8   :  { %141 = dma.hbm_to_vmem [thread:$0]  %s134_s11, 256, %s136_s3, [#allocation11], %s2026_s12, %s2026_s12, %s2027_s13  }
   0x9   :  { %2021 = dma.done.wait [#allocation9], 256  }
   0xa   :  { %2022 = vsyncadd [#allocation9], 4294967040 }
   0xb   :  { %2023 = dma.done.wait [#allocation11], 256  }
   0xc   :  { %2024 = vsyncadd [#allocation11], 4294967040  ;;  %vm175_vm0 = vcmask 254976   ;;  %v2029_v4 = vmov 0.0   ;;  %v2098_v5 = vld [vmem:[#allocation10 + $0x8] sm:$0xff]  ;;  %v2100_v6 = vld [vmem:[#allocation8 + $0x8] sm:$0xff] }
   0xd   :  { %178 = vst.msk [vmem:[#allocation4] sm:$0x3] %vm175_vm0, %v2029_v4  ;;  %v2102_v7 = vld [vmem:[#allocation10] sm:$0xff]  ;;  %247 = vmatpush.bf16.msra.mxu1 %v2098_v5  ;;  %218 = vmatpush.bf16.msra.mxu0 %v2100_v6  ;;  %v2108_v9 = vld [vmem:[#allocation8] sm:$0xff]  ;;  %vm208_vm1 = vcmask 261120   ;;  %s2030_s4 = smov 32  }
   0xe   :  { %176 = vst.msk [vmem:[#allocation2] sm:$0x3] %vm175_vm0, %v2029_v4  ;;  %409 = vmatpush.bf16.msra.mxu2 %v2100_v6  ;;  %426 = vmatpush.bf16.msra.mxu3 %v2098_v5  ;;  %v257_v15 = vld [vmem:[#allocation7 + $0x4] sm:$0x8]  ;;  %v254_v19 = vld [vmem:[#allocation6] sm:$0x1] }
   0xf   :  { %177 = vst.msk [vmem:[#allocation3] sm:$0x3] %vm175_vm0, %v2029_v4  ;;  %v258_v16 = vunpack.c.l.bf16 %v257_v15  ;;  %v255_v23 = vunpack.c.l.bf16 %v254_v19  ;;  %v2144_v60 = vld [vmem:[%s2530_s2] sm:$0x3]  ;;  %v2031_v61 = vmov 0   ;;  %s2032_s16 = smov 96  }
  0x10   :  { %179 = vst.msk [vmem:[#allocation5] sm:$0x3] %vm175_vm0, %v2029_v4  ;;  %1821 = vset.pattern.permute.xlu2 %v2031_v61  ;;  %vm1751_vm10 = vcmp.gt.s32.totalorder %v2144_v60, 7  ;;  %1822 = vset.pattern.permute.xlu1 %v2031_v61  ;;  %vm1759_vm15 = vcmp.gt.s32.totalorder %v2144_v60, 6 }
  0x11   :  { %248 = vmatpush.bf16.msra.mxu1 %v2102_v7  ;;  %219 = vmatpush.bf16.msra.mxu0 %v2108_v9  ;;  %v2148_v62 = vsel %vm1751_vm10, 1.0, %v2029_v4  ;;  %vm1767_vm10 = vcmp.gt.s32.totalorder %v2144_v60, 5 }
  0x12   :  { %410 = vmatpush.bf16.msra.mxu2 %v2108_v9  ;;  %427 = vmatpush.bf16.msra.mxu3 %v2102_v7  ;;  %v377_v15 = vsub.f32 1.0, %v2148_v62 }
  0x13   :  { %1823 = vset.pattern.permute.xlu0 %v2031_v61 }
  0x14   :  { %v2105_v8 = vld [vmem:[#allocation4] sm:$0x3] }
  0x15   :  { %v189_v10 = vld [vmem:[#allocation2] sm:$0x3]  ;;  %v225_v12 = vpack.c.bf16 %v2105_v8, %v2105_v8  ;;  %591 = vmatpush.bf16.msrb.mxu0 %v2100_v6  ;;  %608 = vmatpush.bf16.msrb.mxu1 %v2098_v5 }
  0x16   :  { %v195_v13 = vpack.c.bf16 %v189_v10, %v189_v10  ;;  %773 = vmatpush.bf16.msrb.mxu2 %v2100_v6  ;;  %790 = vmatpush.bf16.msrb.mxu3 %v2098_v5  ;;  %v190_v21 = vld [vmem:[#allocation3] sm:$0x3] }
  0x17   :  { %v2112_v11 = vld [vmem:[#allocation5] sm:$0x3]  ;;  %1746 = vmatmul.msk.bf16.vlgmr.msra.gmra.mxu1 %vm208_vm1, %v225_v12  ;;  %284 = vrot.lane.b32.xlu2 %v190_v21, %s2030_s4 }
  0x18   :  { %v325_v14 = vrot.slane %v2112_v11, 2  ;;  %1737 = vmatmul.msk.bf16.vlgmr.msra.gmra.mxu0 %vm208_vm1, %v195_v13 }
  0x19   :  { %592 = vmatpush.bf16.msrb.mxu0 %v2108_v9  ;;  %609 = vmatpush.bf16.msrb.mxu1 %v2102_v7 }
  0x1a   :  { %326 = vrot.lane.b32.xlu1 %v325_v14, %s2030_s4  ;;  %774 = vmatpush.bf16.msrb.mxu2 %v2108_v9 }
  0x1b   :  { %791 = vmatpush.bf16.msrb.mxu3 %v2102_v7 }
  0x1d   :  { %953 = vmatpush.bf16.msra.mxu0 %v2100_v6  ;;  %973 = vmatpush.bf16.msra.mxu1 %v2098_v5 }
  0x21   :  { %954 = vmatpush.bf16.msra.mxu0 %v2108_v9  ;;  %974 = vmatpush.bf16.msra.mxu1 %v2102_v7 }
  0x71   :  { %v285_v59 = vpop.permute.xlu2 %284 }
  0x8c   :  { %v327_v2 = vpop.permute.xlu1 %326 }
  0x94   :  { %v250_v17 = vpop.f32.mrf.mxu1 }
  0x95   :  { %v221_v18 = vpop.f32.mrf.mxu0  ;;  %v260_v20 = vrot.slane %v250_v17, 2 }
  0x96   :  { %v256_v24 = vadd.f32 %v255_v23, %v221_v18 }
  0x97   :  { %v262_v22 = vadd.f32 %v260_v20, %v258_v16 }
  0x98   :  { %v1747_v30 = vmul.f32 -1.442695, %v256_v24 }
  0x99   :  { %1844 = vtanh.f32 %v262_v22  ;;  %v1748_v29 = vmul.f32 -1.442695, %v262_v22 }
  0x9a   :  { %1846 = vtanh.f32 %v256_v24 }
  0x9b   :  { %1848 = vpow2.f32 %v1748_v29 }
  0x9c   :  { %v252_v25 = vpop.f32.mrf.mxu1  ;;  %1850 = vpow2.f32 %v1747_v30 }
  0x9d   :  { %v223_v26 = vpop.f32.mrf.mxu0 }
  0x9f   :  { %v1845_v27 = vpop.eup %1844 }
  0xa0   :  { %331 = vrot.lane.b32.xlu0 %v1845_v27, %s2030_s4  ;;  %v1847_v28 = vpop.eup %1846 }
  0xa1   :  { %v1849_v31 = vpop.eup %1848 }
  0xa2   :  { %v307_v32 = vadd.f32 1.0, %v1849_v31  ;;  %v1851_v33 = vpop.eup %1850 }
  0xa3   :  { %v266_v34 = vadd.f32 1.0, %v1851_v33 }
  0xa4   :  { %1852 = vrcp.f32 %v307_v32  ;;  %v319_v43 = vand.u32 2147483648, %v307_v32  ;;  %vm313_vm3 = vweird.f32 %v307_v32  ;;  %v317_v44 = vand.u32 2147483647, %v307_v32 }
  0xa5   :  { %1854 = vrcp.f32 %v266_v34  ;;  %vm272_vm5 = vweird.f32 %v266_v34  ;;  %v278_v48 = vand.u32 2147483648, %v266_v34  ;;  %v276_v50 = vand.u32 2147483647, %v266_v34 }
  0xa6   :  { %v320_v47 = vor.u32 1.1754944e-38, %v319_v43  ;;  %vm318_vm7 = vcmp.eq.f32.partialorder %v317_v44, 8.507059e+37 }
  0xa7   :  { %v279_v54 = vor.u32 1.1754944e-38, %v278_v48  ;;  %vm277_vm9 = vcmp.eq.f32.partialorder %v276_v50, 8.507059e+37 }
  0xa8   :  { %289 = vrot.lane.b32.xlu0 %v1847_v28, %s2030_s4 }
  0xaa   :  { %v1853_v35 = vpop.eup %1852 }
  0xab   :  { %v309_v36 = vmul.f32 %v1853_v35, %v307_v32  ;;  %v1855_v37 = vpop.eup %1854  ;;  %vm314_vm2 = vweird.f32 %v1853_v35 }
  0xac   :  { %v268_v39 = vmul.f32 %v1855_v37, %v266_v34  ;;  %vm315_vm4 = vmor %vm313_vm3, %vm314_vm2  ;;  %vm273_vm6 = vweird.f32 %v1855_v37 }
  0xad   :  { %v310_v38 = vsub.f32 1.0, %v309_v36  ;;  %vm274_vm8 = vmor %vm272_vm5, %vm273_vm6 }
  0xae   :  { %v269_v41 = vsub.f32 1.0, %v268_v39 }
  0xaf   :  { %v311_v40 = vmul.f32 %v1853_v35, %v310_v38 }
  0xb0   :  { %v270_v45 = vmul.f32 %v1855_v37, %v269_v41 }
  0xb1   :  { %v312_v42 = vadd.f32 %v1853_v35, %v311_v40 }
  0xb2   :  { %v271_v49 = vadd.f32 %v1855_v37, %v270_v45 }
  0xb3   :  { %v316_v46 = vsel %vm315_vm4, %v1853_v35, %v312_v42  ;;  %v433_v35 = vld [vmem:[#allocation6] sm:$0x2] }
  0xb4   :  { %v321_v51 = vsel %vm318_vm7, %v320_v47, %v316_v46  ;;  %v275_v55 = vsel %vm274_vm8, %v1855_v37, %v271_v49  ;;  %v434_v36 = vunpack.c.l.bf16 %v433_v35 }
  0xb5   :  { %v280_v56 = vsel %vm277_vm9, %v279_v54, %v275_v55  ;;  %v329_v10 = vmul.f32 %v327_v2, %v321_v51  ;;  %v2190_v2 = vsel %vm1759_vm15, 1.0, %v2029_v4  ;;  %vm1775_vm15 = vcmp.gt.s32.totalorder %v2144_v60, 4 }
  0xb6   :  { %v287_v63 = vmul.f32 %v285_v59, %v280_v56 }
 0x112   :  { %v332_v52 = vpop.permute.xlu0 %331 }
 0x113   :  { %v334_v53 = vmul.f32 %v332_v52, %v321_v51 }
 0x115   :  { %336 = vrot.lane.b32.xlu1 %v334_v53, %s2030_s4 }
 0x11a   :  { %v290_v57 = vpop.permute.xlu0 %289 }
 0x11b   :  { %v292_v58 = vmul.f32 %v290_v57, %v280_v56 }
 0x11d   :  { %294 = vrot.lane.b32.xlu2 %v292_v58, %s2030_s4 }
 0x125   :  { %368 = vperm.xlu2 %1821, %v2148_v62  }
 0x177   :  { %v295_v0 = vpop.permute.xlu2 %294 }
 0x178   :  { %v2151_v1 = vadd.f32 %v295_v0, %v287_v63 }
 0x17a   :  { %1856 = vtanh.f32 %v2151_v1 }
 0x17f   :  { %v369_v23 = vpop.permute.xlu2 %368 }
 0x180   :  { %v1857_v3 = vpop.eup %1856 }
 0x181   :  { %300 = vrot.lane.b32.xlu1 %v1857_v3, %s2030_s4 }
 0x187   :  { %v337_v12 = vpop.permute.xlu1 %336 }
 0x188   :  { %v339_v13 = vadd.f32 %v337_v12, %v329_v10 }
 0x189   :  { %380 = vperm.xlu1 %1822, %v377_v15  }
 0x18a   :  { %1858 = vtanh.f32 %v339_v13  ;;  %v386_v22 = vrot.slane %v339_v13, 6 }
 0x190   :  { %v1859_v14 = vpop.eup %1858 }
 0x191   :  { %342 = vrot.lane.b32.xlu0 %v1859_v14, %s2030_s4 }
 0x1f3   :  { %v301_v16 = vpop.permute.xlu1 %300 }
 0x1f4   :  { %v2157_v17 = vmul.f32 %v301_v16, %v280_v56 }
 0x1f6   :  { %v396_v18 = vpack.c.bf16 %v2157_v17, %v2157_v17 }
 0x1f8   :  { %398 = vrot.lane.b32.xlu2 %v396_v18, %s2026_s12 }
 0x1fb   :  { %v381_v25 = vpop.permute.xlu1 %380 }
 0x1fc   :  { %v383_v26 = vmul.f32 %v381_v25, %v2105_v8  ;;  %v391_v8 = vmul.f32 %v381_v25, %v2112_v11  ;;  %v439_v11 = vld [vmem:[#allocation7 + $0x4] sm:$0x4] }
 0x1fd   :  { %v440_v42 = vunpack.c.l.bf16 %v439_v11 }
 0x203   :  { %v343_v19 = vpop.permute.xlu0 %342 }
 0x204   :  { %v345_v20 = vmul.f32 %v343_v19, %v321_v51 }
 0x206   :  { %v372_v21 = vrot.slane %v345_v20, 6 }
 0x208   :  { %373 = vrot.lane.b32.xlu0 %v372_v21, %s2026_s12 }
 0x210   :  { %387 = vrot.lane.b32.xlu0 %v386_v22, %s2032_s16 }
 0x252   :  { %v399_v24 = vpop.permute.xlu2 %398 }
 0x253   :  { %1753 = vmatmul.msk.bf16.vlgmr.msra.gmra.mxu2 %vm208_vm1, %v399_v24 }
 0x254   :  { %1139 = vmatpush.bf16.msra.mxu2 %v2100_v6 }
 0x258   :  { %1140 = vmatpush.bf16.msra.mxu2 %v2108_v9 }
 0x27a   :  { %v374_v27 = vpop.permute.xlu0 %373 }
 0x27b   :  { %v376_v28 = vmul.f32 %v374_v27, %v369_v23 }
 0x27d   :  { %v2168_v29 = vadd.f32 %v383_v26, %v376_v28  ;;  %v466_v26 = vrot.slane %v2151_v1, 6 }
 0x27f   :  { %393 = vst.msk [vmem:[%s2534_s6 + $0xe] sm:$0x3] %vm175_vm0, %v2168_v29  ;;  %v416_v30 = vpack.c.bf16 %v2168_v29, %v2168_v29 }
 0x281   :  { %1754 = vmatmul.msk.bf16.vlgmr.msra.gmra.mxu3 %vm208_vm1, %v416_v30 }
 0x282   :  { %v388_v31 = vpop.permute.xlu0 %387  ;;  %1156 = vmatpush.bf16.msra.mxu3 %v2098_v5 }
 0x283   :  { %v390_v32 = vmul.f32 %v388_v31, %v369_v23 }
 0x285   :  { %v2180_v33 = vadd.f32 %v391_v8, %v390_v32  ;;  %v558_v8 = vsub.f32 1.0, %v2190_v2 }
 0x286   :  { %1157 = vmatpush.bf16.msra.mxu3 %v2102_v7 }
 0x287   :  { %v506_v34 = vrot.slane %v2180_v33, 4 }
 0x289   :  { %507 = vrot.lane.b32.xlu0 %v506_v34, %s2030_s4 }
 0x2d6   :  { %v412_v37 = vpop.f32.mrf.mxu2 }
 0x2d7   :  { %v436_v38 = vrot.slane %v412_v37, 6 }
 0x2d9   :  { %v438_v39 = vadd.f32 %v436_v38, %v434_v36 }
 0x2db   :  { %1860 = vtanh.f32 %v438_v39  ;;  %v1755_v48 = vmul.f32 -1.442695, %v438_v39 }
 0x2de   :  { %v414_v40 = vpop.f32.mrf.mxu2 }
 0x2e1   :  { %v1861_v41 = vpop.eup %1860 }
 0x2e2   :  { %470 = vrot.lane.b32.xlu2 %v1861_v41, %s2030_s4 }
 0x2fb   :  { %v508_v32 = vpop.permute.xlu0 %507 }
 0x304   :  { %v429_v43 = vpop.f32.mrf.mxu3 }
 0x305   :  { %v442_v44 = vrot.slane %v429_v43, 4 }
 0x307   :  { %v444_v45 = vadd.f32 %v442_v44, %v440_v42 }
 0x309   :  { %1862 = vtanh.f32 %v444_v45  ;;  %v1756_v3 = vmul.f32 -1.442695, %v444_v45 }
 0x30a   :  { %1864 = vpow2.f32 %v1755_v48 }
 0x30c   :  { %v431_v46 = vpop.f32.mrf.mxu3 }
 0x30f   :  { %v1863_v47 = vpop.eup %1862 }
 0x310   :  { %512 = vrot.lane.b32.xlu1 %v1863_v47, %s2030_s4  ;;  %v1865_v49 = vpop.eup %1864 }
 0x311   :  { %v448_v50 = vadd.f32 1.0, %v1865_v49 }
 0x313   :  { %1866 = vrcp.f32 %v448_v50  ;;  %v460_v56 = vand.u32 2147483648, %v448_v50  ;;  %vm454_vm12 = vweird.f32 %v448_v50  ;;  %v458_v57 = vand.u32 2147483647, %v448_v50 }
 0x314   :  { %1868 = vpow2.f32 %v1756_v3 }
 0x315   :  { %v461_v59 = vor.u32 1.1754944e-38, %v460_v56  ;;  %vm459_vm14 = vcmp.eq.f32.partialorder %v458_v57, 8.507059e+37 }
 0x319   :  { %v1867_v51 = vpop.eup %1866 }
 0x31a   :  { %v450_v52 = vmul.f32 %v1867_v51, %v448_v50  ;;  %vm455_vm11 = vweird.f32 %v1867_v51  ;;  %v1869_v10 = vpop.eup %1868 }
 0x31b   :  { %vm456_vm13 = vmor %vm454_vm12, %vm455_vm11  ;;  %v488_v12 = vadd.f32 1.0, %v1869_v10 }
 0x31c   :  { %v451_v53 = vsub.f32 1.0, %v450_v52  ;;  %v615_v52 = vld [vmem:[#allocation6] sm:$0x4] }
 0x31d   :  { %1870 = vrcp.f32 %v488_v12  ;;  %v500_v19 = vand.u32 2147483648, %v488_v12  ;;  %vm494_vm3 = vweird.f32 %v488_v12  ;;  %v498_v20 = vand.u32 2147483647, %v488_v12 }
 0x31e   :  { %v452_v54 = vmul.f32 %v1867_v51, %v451_v53 }
 0x31f   :  { %v501_v22 = vor.u32 1.1754944e-38, %v500_v19  ;;  %vm499_vm5 = vcmp.eq.f32.partialorder %v498_v20, 8.507059e+37 }
 0x320   :  { %v453_v55 = vadd.f32 %v1867_v51, %v452_v54 }
 0x322   :  { %v457_v58 = vsel %vm456_vm13, %v1867_v51, %v453_v55  ;;  %v616_v55 = vunpack.c.l.bf16 %v615_v52 }
 0x323   :  { %v462_v63 = vsel %vm459_vm14, %v461_v59, %v457_v58  ;;  %v1871_v13 = vpop.eup %1870 }
 0x324   :  { %v490_v14 = vmul.f32 %v1871_v13, %v488_v12  ;;  %vm495_vm2 = vweird.f32 %v1871_v13  ;;  %v468_v27 = vmul.f32 %v466_v26, %v462_v63  ;;  %v621_v26 = vld [vmem:[#allocation7 + $0x4] sm:$0x2] }
 0x325   :  { %vm496_vm4 = vmor %vm494_vm3, %vm495_vm2 }
 0x326   :  { %v491_v15 = vsub.f32 1.0, %v490_v14 }
 0x328   :  { %v492_v16 = vmul.f32 %v1871_v13, %v491_v15 }
 0x32a   :  { %v493_v18 = vadd.f32 %v1871_v13, %v492_v16 }
 0x32c   :  { %v497_v21 = vsel %vm496_vm4, %v1871_v13, %v493_v18 }
 0x32d   :  { %v502_v24 = vsel %vm499_vm5, %v501_v22, %v497_v21 }
 0x32e   :  { %v510_v34 = vmul.f32 %v508_v32, %v502_v24 }
 0x33c   :  { %v471_v61 = vpop.permute.xlu2 %470 }
 0x33d   :  { %v473_v0 = vmul.f32 %v471_v61, %v462_v63 }
 0x33f   :  { %475 = vrot.lane.b32.xlu2 %v473_v0, %s2030_s4 }
 0x347   :  { %549 = vperm.xlu2 %1821, %v2190_v2  }
 0x382   :  { %v513_v23 = vpop.permute.xlu1 %512 }
 0x383   :  { %v515_v25 = vmul.f32 %v513_v23, %v502_v24 }
 0x385   :  { %517 = vrot.lane.b32.xlu1 %v515_v25, %s2030_s4  ;;  %v2233_v25 = vsel %vm1767_vm10, 1.0, %v2029_v4 }
 0x399   :  { %v476_v28 = vpop.permute.xlu2 %475 }
 0x39a   :  { %v2195_v30 = vadd.f32 %v476_v28, %v468_v27  ;;  %v622_v27 = vunpack.c.l.bf16 %v621_v26 }
 0x39c   :  { %1872 = vtanh.f32 %v2195_v30 }
 0x3a1   :  { %v550_v41 = vpop.permute.xlu2 %549 }
 0x3a2   :  { %v1873_v31 = vpop.eup %1872 }
 0x3a3   :  { %481 = vrot.lane.b32.xlu1 %v1873_v31, %s2030_s4 }
 0x3ab   :  { %561 = vperm.xlu1 %1822, %v558_v8  }
 0x3f7   :  { %v518_v35 = vpop.permute.xlu1 %517 }
 0x3f8   :  { %v520_v36 = vadd.f32 %v518_v35, %v510_v34 }
 0x3fa   :  { %1874 = vtanh.f32 %v520_v36  ;;  %v567_v45 = vrot.slane %v520_v36, 4 }
 0x400   :  { %v1875_v37 = vpop.eup %1874 }
 0x401   :  { %523 = vrot.lane.b32.xlu0 %v1875_v37, %s2030_s4 }
 0x415   :  { %v482_v1 = vpop.permute.xlu1 %481 }
 0x416   :  { %v2201_v38 = vmul.f32 %v482_v1, %v462_v63 }
 0x418   :  { %v577_v39 = vpack.c.bf16 %v2201_v38, %v2201_v38 }
 0x41a   :  { %v579_v40 = vrot.slane %v577_v39, 1 }
 0x41c   :  { %580 = vrot.lane.b32.xlu2 %v579_v40, %s2026_s12 }
 0x41d   :  { %v562_v46 = vpop.permute.xlu1 %561 }
 0x41e   :  { %v564_v48 = vmul.f32 %v562_v46, %v2168_v29  ;;  %v572_v29 = vmul.f32 %v562_v46, %v2180_v33 }
 0x473   :  { %v524_v11 = vpop.permute.xlu0 %523 }
 0x474   :  { %v526_v42 = vmul.f32 %v524_v11, %v502_v24 }
 0x476   :  { %v553_v43 = vrot.slane %v526_v42, 4  ;;  %v581_v44 = vpop.permute.xlu2 %580 }
 0x477   :  { %1761 = vmatmul.msk.bf16.vlgmr.msrb.gmra.mxu0 %vm208_vm1, %v581_v44  ;;  %v648_v44 = vrot.slane %v2195_v30, 6  ;;  %v740_v30 = vsub.f32 1.0, %v2233_v25 }
 0x478   :  { %554 = vrot.lane.b32.xlu0 %v553_v43, %s2026_s12  ;;  %1321 = vmatpush.bf16.msrb.mxu0 %v2100_v6 }
 0x47c   :  { %1322 = vmatpush.bf16.msrb.mxu0 %v2108_v9 }
 0x480   :  { %568 = vrot.lane.b32.xlu0 %v567_v45, %s2032_s16 }
 0x4ea   :  { %v555_v47 = vpop.permute.xlu0 %554 }
 0x4eb   :  { %v557_v49 = vmul.f32 %v555_v47, %v550_v41 }
 0x4ed   :  { %v2212_v50 = vadd.f32 %v564_v48, %v557_v49 }
 0x4ef   :  { %574 = vst.msk [vmem:[%s2534_s6 + $0xc] sm:$0x3] %vm175_vm0, %v2212_v50  ;;  %v598_v51 = vpack.c.bf16 %v2212_v50, %v2212_v50 }
 0x4f1   :  { %1762 = vmatmul.msk.bf16.vlgmr.msrb.gmra.mxu1 %vm208_vm1, %v598_v51 }
 0x4f2   :  { %v569_v53 = vpop.permute.xlu0 %568  ;;  %1338 = vmatpush.bf16.msrb.mxu1 %v2098_v5 }
 0x4f3   :  { %v571_v54 = vmul.f32 %v569_v53, %v550_v41 }
 0x4f4   :  { %v594_v56 = vpop.f32.mrf.mxu0 }
 0x4f5   :  { %v2224_v57 = vadd.f32 %v572_v29, %v571_v54  ;;  %v618_v58 = vrot.slane %v594_v56, 4 }
 0x4f6   :  { %1339 = vmatpush.bf16.msrb.mxu1 %v2102_v7 }
 0x4f7   :  { %v620_v59 = vadd.f32 %v618_v58, %v616_v55  ;;  %v688_v61 = vrot.slane %v2224_v57, 6 }
 0x4f9   :  { %1876 = vtanh.f32 %v620_v59  ;;  %689 = vrot.lane.b32.xlu0 %v688_v61, %s2030_s4  ;;  %v1763_v3 = vmul.f32 -1.442695, %v620_v59 }
 0x4fb   :  { %1878 = vpow2.f32 %v1763_v3 }
 0x4fc   :  { %v596_v63 = vpop.f32.mrf.mxu0 }
 0x4ff   :  { %v1877_v0 = vpop.eup %1876 }
 0x500   :  { %652 = vrot.lane.b32.xlu2 %v1877_v0, %s2030_s4 }
 0x501   :  { %v1879_v33 = vpop.eup %1878 }
 0x502   :  { %v630_v10 = vadd.f32 1.0, %v1879_v33 }
 0x504   :  { %1880 = vrcp.f32 %v630_v10  ;;  %v642_v18 = vand.u32 2147483648, %v630_v10  ;;  %vm636_vm7 = vweird.f32 %v630_v10  ;;  %v640_v19 = vand.u32 2147483647, %v630_v10 }
 0x506   :  { %v643_v21 = vor.u32 1.1754944e-38, %v642_v18  ;;  %vm641_vm9 = vcmp.eq.f32.partialorder %v640_v19, 8.507059e+37 }
 0x50a   :  { %v1881_v12 = vpop.eup %1880 }
 0x50b   :  { %v632_v13 = vmul.f32 %v1881_v12, %v630_v10  ;;  %vm637_vm6 = vweird.f32 %v1881_v12 }
 0x50c   :  { %vm638_vm8 = vmor %vm636_vm7, %vm637_vm6 }
 0x50d   :  { %v633_v14 = vsub.f32 1.0, %v632_v13 }
 0x50f   :  { %v634_v15 = vmul.f32 %v1881_v12, %v633_v14 }
 0x511   :  { %v635_v16 = vadd.f32 %v1881_v12, %v634_v15 }
 0x513   :  { %v639_v20 = vsel %vm638_vm8, %v1881_v12, %v635_v16  ;;  %v797_v16 = vld [vmem:[#allocation6] sm:$0x8] }
 0x514   :  { %v644_v23 = vsel %vm641_vm9, %v643_v21, %v639_v20  ;;  %v798_v18 = vunpack.c.l.bf16 %v797_v16 }
 0x515   :  { %v650_v47 = vmul.f32 %v648_v44, %v644_v23 }
 0x55a   :  { %v653_v22 = vpop.permute.xlu2 %652 }
 0x55b   :  { %v655_v24 = vmul.f32 %v653_v22, %v644_v23 }
 0x55d   :  { %657 = vrot.lane.b32.xlu2 %v655_v24, %s2030_s4 }
 0x565   :  { %731 = vperm.xlu2 %1821, %v2233_v25  }
 0x56b   :  { %v690_v54 = vpop.permute.xlu0 %689 }
 0x56e   :  { %v611_v28 = vpop.f32.mrf.mxu1 }
 0x56f   :  { %v624_v31 = vrot.slane %v611_v28, 6 }
 0x571   :  { %v626_v8 = vadd.f32 %v624_v31, %v622_v27  ;;  %v2264_v31 = vsel %vm1775_vm15, 1.0, %v2029_v4 }
 0x573   :  { %1882 = vtanh.f32 %v626_v8  ;;  %v1764_v35 = vmul.f32 -1.442695, %v626_v8 }
 0x575   :  { %1884 = vpow2.f32 %v1764_v35 }
 0x576   :  { %v613_v32 = vpop.f32.mrf.mxu1 }
 0x579   :  { %v1883_v34 = vpop.eup %1882 }
 0x57a   :  { %694 = vrot.lane.b32.xlu1 %v1883_v34, %s2030_s4  ;;  %v913_v34 = vsub.f32 1.0, %v2264_v31 }
 0x57b   :  { %v1885_v36 = vpop.eup %1884 }
 0x57c   :  { %v670_v37 = vadd.f32 1.0, %v1885_v36 }
 0x57e   :  { %1886 = vrcp.f32 %v670_v37  ;;  %v682_v42 = vand.u32 2147483648, %v670_v37  ;;  %vm676_vm12 = vweird.f32 %v670_v37  ;;  %v680_v43 = vand.u32 2147483647, %v670_v37 }
 0x580   :  { %v683_v48 = vor.u32 1.1754944e-38, %v682_v42  ;;  %vm681_vm14 = vcmp.eq.f32.partialorder %v680_v43, 8.507059e+37 }
 0x584   :  { %v1887_v1 = vpop.eup %1886 }
 0x585   :  { %v672_v39 = vmul.f32 %v1887_v1, %v670_v37  ;;  %vm677_vm11 = vweird.f32 %v1887_v1 }
 0x586   :  { %vm678_vm13 = vmor %vm676_vm12, %vm677_vm11 }
 0x587   :  { %v673_v40 = vsub.f32 1.0, %v672_v39 }
 0x589   :  { %v674_v41 = vmul.f32 %v1887_v1, %v673_v40 }
 0x58b   :  { %v675_v11 = vadd.f32 %v1887_v1, %v674_v41 }
 0x58d   :  { %v679_v46 = vsel %vm678_vm13, %v1887_v1, %v675_v11 }
 0x58e   :  { %v684_v52 = vsel %vm681_vm14, %v683_v48, %v679_v46 }
 0x58f   :  { %v692_v55 = vmul.f32 %v690_v54, %v684_v52 }
 0x5b7   :  { %v658_v45 = vpop.permute.xlu2 %657 }
 0x5b8   :  { %v2238_v49 = vadd.f32 %v658_v45, %v650_v47 }
 0x5ba   :  { %1888 = vtanh.f32 %v2238_v49 }
 0x5bf   :  { %v732_v33 = vpop.permute.xlu2 %731 }
 0x5c0   :  { %v1889_v29 = vpop.eup %1888 }
 0x5ec   :  { %v695_v51 = vpop.permute.xlu1 %694 }
 0x5ed   :  { %v697_v53 = vmul.f32 %v695_v51, %v684_v52  ;;  %v803_v51 = vld [vmem:[#allocation7 + $0x4] sm:$0x1] }
 0x5ef   :  { %699 = vrot.lane.b32.xlu1 %v697_v53, %s2030_s4 }
 0x5f7   :  { %663 = vrot.lane.b32.xlu1 %v1889_v29, %s2030_s4 }
 0x5ff   :  { %743 = vperm.xlu1 %1822, %v740_v30  }
 0x661   :  { %v700_v56 = vpop.permute.xlu1 %699 }
 0x662   :  { %v702_v58 = vadd.f32 %v700_v56, %v692_v55 }
 0x664   :  { %1890 = vtanh.f32 %v702_v58  ;;  %v749_v15 = vrot.slane %v702_v58, 2 }
 0x669   :  { %v664_v59 = vpop.permute.xlu1 %663 }
 0x66a   :  { %v1891_v61 = vpop.eup %1890  ;;  %v2244_v63 = vmul.f32 %v664_v59, %v644_v23 }
 0x66b   :  { %705 = vrot.lane.b32.xlu0 %v1891_v61, %s2030_s4 }
 0x66c   :  { %v759_v0 = vpack.c.bf16 %v2244_v63, %v2244_v63 }
 0x66e   :  { %v761_v3 = vrot.slane %v759_v0, 2 }
 0x670   :  { %762 = vrot.lane.b32.xlu2 %v761_v3, %s2026_s12 }
 0x671   :  { %v744_v22 = vpop.permute.xlu1 %743 }
 0x672   :  { %v754_v8 = vmul.f32 %v744_v22, %v2224_v57 }
 0x6ca   :  { %v763_v10 = vpop.permute.xlu2 %762 }
 0x6cb   :  { %1769 = vmatmul.msk.bf16.vlgmr.msrb.gmra.mxu2 %vm208_vm1, %v763_v10 }
 0x6cc   :  { %1503 = vmatpush.bf16.msrb.mxu2 %v2100_v6  ;;  %v746_v6 = vmul.f32 %v744_v22, %v2212_v50 }
 0x6d0   :  { %1504 = vmatpush.bf16.msrb.mxu2 %v2108_v9 }
 0x6dd   :  { %v706_v12 = vpop.permute.xlu0 %705 }
 0x6de   :  { %v708_v13 = vmul.f32 %v706_v12, %v684_v52  ;;  %v804_v52 = vunpack.c.l.bf16 %v803_v51 }
 0x6e0   :  { %v735_v14 = vrot.slane %v708_v13, 2 }
 0x6e2   :  { %736 = vrot.lane.b32.xlu0 %v735_v14, %s2026_s12 }
 0x6ea   :  { %750 = vrot.lane.b32.xlu0 %v749_v15, %s2032_s16 }
 0x74e   :  { %v776_v19 = vpop.f32.mrf.mxu2 }
 0x74f   :  { %v800_v20 = vrot.slane %v776_v19, 2 }
 0x751   :  { %v802_v21 = vadd.f32 %v800_v20, %v798_v18 }
 0x753   :  { %1892 = vtanh.f32 %v802_v21  ;;  %v1771_v36 = vmul.f32 -1.442695, %v802_v21 }
 0x754   :  { %v737_v23 = vpop.permute.xlu0 %736 }
 0x755   :  { %v739_v24 = vmul.f32 %v737_v23, %v732_v33  ;;  %1894 = vpow2.f32 %v1771_v36  ;;  %v827_v23 = vrot.slane %v2238_v49, 6 }
 0x756   :  { %v778_v9 = vpop.f32.mrf.mxu2 }
 0x757   :  { %v747_v26 = vadd.f32 %v746_v6, %v739_v24 }
 0x759   :  { %v1893_v27 = vpop.eup %1892  ;;  %756 = vst.msk [vmem:[%s2534_s6 + $0xa] sm:$0x3] %vm175_vm0, %v747_v26  ;;  %v780_v28 = vpack.c.bf16 %v747_v26, %v747_v26 }
 0x75a   :  { %831 = vrot.lane.b32.xlu2 %v1893_v27, %s2030_s4 }
 0x75b   :  { %1770 = vmatmul.msk.bf16.vlgmr.msrb.gmra.mxu3 %vm208_vm1, %v780_v28  ;;  %v1895_v37 = vpop.eup %1894 }
 0x75c   :  { %v751_v50 = vpop.permute.xlu0 %750  ;;  %1520 = vmatpush.bf16.msrb.mxu3 %v2098_v5  ;;  %v809_v1 = vadd.f32 1.0, %v1895_v37 }
 0x75d   :  { %v753_v32 = vmul.f32 %v751_v50, %v732_v33 }
 0x75e   :  { %1896 = vrcp.f32 %v809_v1  ;;  %v821_v11 = vand.u32 2147483648, %v809_v1  ;;  %vm815_vm3 = vweird.f32 %v809_v1 }
 0x75f   :  { %v2269_v35 = vadd.f32 %v754_v8, %v753_v32 }
 0x760   :  { %1521 = vmatpush.bf16.msrb.mxu3 %v2102_v7  ;;  %v819_v7 = vand.u32 2147483647, %v809_v1  ;;  %v822_v43 = vor.u32 1.1754944e-38, %v821_v11  ;;  %v983_v11 = vld [vmem:[#allocation7] sm:$0x8] }
 0x761   :  { %867 = vrot.lane.b32.xlu0 %v2269_v35, %s2030_s4 }
 0x762   :  { %916 = vperm.xlu2 %1821, %v913_v34   ;;  %vm820_vm5 = vcmp.eq.f32.partialorder %v819_v7, 8.507059e+37  ;;  %v984_v7 = vunpack.c.l.bf16 %v983_v11 }
 0x764   :  { %v1897_v5 = vpop.eup %1896 }
 0x765   :  { %v811_v57 = vmul.f32 %v1897_v5, %v809_v1  ;;  %vm816_vm2 = vweird.f32 %v1897_v5 }
 0x766   :  { %vm817_vm4 = vmor %vm815_vm3, %vm816_vm2  ;;  %vm1773_vm3 = vcmp.gt.s32.totalorder %v2144_v60, 3 }
 0x767   :  { %v812_v39 = vsub.f32 1.0, %v811_v57 }
 0x769   :  { %v813_v40 = vmul.f32 %v1897_v5, %v812_v39 }
 0x76a   :  { %909 = vperm.xlu2 %1821, %v2264_v31  }
 0x76b   :  { %v814_v41 = vadd.f32 %v1897_v5, %v813_v40 }
 0x76d   :  { %v818_v42 = vsel %vm817_vm4, %v1897_v5, %v814_v41 }
 0x76e   :  { %v823_v45 = vsel %vm820_vm5, %v822_v43, %v818_v42 }
 0x76f   :  { %v829_v24 = vmul.f32 %v827_v23, %v823_v45 }
 0x7b4   :  { %v832_v44 = vpop.permute.xlu2 %831 }
 0x7b5   :  { %v834_v46 = vmul.f32 %v832_v44, %v823_v45 }
 0x7b7   :  { %836 = vrot.lane.b32.xlu0 %v834_v46, %s2030_s4 }
 0x7bc   :  { %v917_v47 = vpop.permute.xlu2 %916 }
 0x7bd   :  { %v919_v48 = vmul.f32 %v917_v47, %v747_v26  ;;  %v926_v39 = vmul.f32 %v917_v47, %v2269_v35 }
 0x7bf   :  { %921 = vrot.lane.b32.xlu0 %v919_v48, %s2026_s12  ;;  %v980_v48 = vld [vmem:[#allocation6 + $0x4] sm:$0x1] }
 0x7c0   :  { %v981_v35 = vunpack.c.l.bf16 %v980_v48 }
 0x7c4   :  { %v2288_v8 = vpop.permute.xlu2 %909 }
 0x7d3   :  { %v868_v19 = vpop.permute.xlu0 %867 }
 0x7de   :  { %v793_v53 = vpop.f32.mrf.mxu3 }
 0x7df   :  { %v805_v29 = vadd.f32 %v804_v52, %v793_v53 }
 0x7e1   :  { %1898 = vtanh.f32 %v805_v29  ;;  %v1772_v55 = vmul.f32 -1.442695, %v805_v29 }
 0x7e3   :  { %1900 = vpow2.f32 %v1772_v55 }
 0x7e6   :  { %v795_v30 = vpop.f32.mrf.mxu3 }
 0x7e7   :  { %v1899_v54 = vpop.eup %1898 }
 0x7e8   :  { %872 = vrot.lane.b32.xlu1 %v1899_v54, %s2030_s4 }
 0x7e9   :  { %v1901_v56 = vpop.eup %1900 }
 0x7ea   :  { %v849_v58 = vadd.f32 1.0, %v1901_v56 }
 0x7ec   :  { %1902 = vrcp.f32 %v849_v58  ;;  %v861_v10 = vand.u32 2147483648, %v849_v58  ;;  %vm855_vm7 = vweird.f32 %v849_v58  ;;  %v859_v12 = vand.u32 2147483647, %v849_v58 }
 0x7ee   :  { %v862_v14 = vor.u32 1.1754944e-38, %v861_v10  ;;  %vm860_vm9 = vcmp.eq.f32.partialorder %v859_v12, 8.507059e+37 }
 0x7f2   :  { %v1903_v59 = vpop.eup %1902 }
 0x7f3   :  { %v851_v61 = vmul.f32 %v1903_v59, %v849_v58  ;;  %vm856_vm6 = vweird.f32 %v1903_v59 }
 0x7f4   :  { %vm857_vm8 = vmor %vm855_vm7, %vm856_vm6 }
 0x7f5   :  { %v852_v0 = vsub.f32 1.0, %v851_v61 }
 0x7f7   :  { %v853_v3 = vmul.f32 %v1903_v59, %v852_v0 }
 0x7f9   :  { %v854_v33 = vadd.f32 %v1903_v59, %v853_v3 }
 0x7fb   :  { %v858_v13 = vsel %vm857_vm8, %v1903_v59, %v854_v33 }
 0x7fc   :  { %v863_v16 = vsel %vm860_vm9, %v862_v14, %v858_v13 }
 0x7fd   :  { %v870_v20 = vmul.f32 %v868_v19, %v863_v16 }
 0x829   :  { %v837_v6 = vpop.permute.xlu0 %836 }
 0x82a   :  { %v2283_v9 = vadd.f32 %v837_v6, %v829_v24 }
 0x831   :  { %v922_v32 = vpop.permute.xlu0 %921 }
 0x85a   :  { %v873_v15 = vpop.permute.xlu1 %872 }
 0x85b   :  { %v875_v18 = vmul.f32 %v873_v15, %v863_v16 }
 0x85d   :  { %877 = vrot.lane.b32.xlu1 %v875_v18, %s2030_s4 }
 0x8cf   :  { %v878_v21 = vpop.permute.xlu1 %877 }
 0x8d0   :  { %v2279_v22 = vadd.f32 %v878_v21, %v870_v20 }
 0x8d2   :  { %1904 = vtanh.f32 %v2279_v22  ;;  %v925_v11 = vmul.f32 %v2288_v8, %v2279_v22 }
 0x8d3   :  { %1906 = vtanh.f32 %v2283_v9 }
 0x8d8   :  { %v1905_v26 = vpop.eup %1904 }
 0x8d9   :  { %883 = vrot.lane.b32.xlu1 %v1905_v26, %s2030_s4  ;;  %v1907_v27 = vpop.eup %1906 }
 0x8e1   :  { %842 = vrot.lane.b32.xlu1 %v1907_v27, %s2030_s4 }
 0x94b   :  { %v884_v28 = vpop.permute.xlu1 %883 }
 0x94c   :  { %v886_v50 = vmul.f32 %v884_v28, %v863_v16 }
 0x94e   :  { %v912_v49 = vmul.f32 %v2288_v8, %v886_v50 }
 0x950   :  { %v2291_v34 = vadd.f32 %v922_v32, %v912_v49  ;;  %v2310_v32 = vsel %vm1773_vm3, 1.0, %v2029_v4 }
 0x952   :  { %v960_v36 = vpack.c.bf16 %v2291_v34, %v2291_v34 }
 0x953   :  { %v843_v37 = vpop.permute.xlu1 %842 }
 0x954   :  { %v2295_v1 = vmul.f32 %v843_v37, %v823_v45  ;;  %962 = vrot.lane.b32.xlu2 %v960_v36, %s2026_s12  ;;  %v1099_v37 = vsub.f32 1.0, %v2310_v32 }
 0x956   :  { %v939_v5 = vpack.c.bf16 %v2295_v1, %v2295_v1 }
 0x958   :  { %v941_v57 = vrot.slane %v939_v5, 3  ;;  %v1010_v5 = vrot.slane %v2283_v9, 6 }
 0x95a   :  { %942 = vrot.lane.b32.xlu0 %v941_v57, %s2026_s12 }
 0x962   :  { %928 = vrot.lane.b32.xlu0 %v926_v39, %s2030_s4 }
 0x9ae   :  { %v963_v40 = vpop.permute.xlu2 %962 }
 0x9af   :  { %1778 = vmatmul.msk.bf16.vlgmr.msra.gmra.mxu1 %vm208_vm1, %v963_v40 }
 0x9cc   :  { %v943_v41 = vpop.permute.xlu0 %942 }
 0x9cd   :  { %1777 = vmatmul.msk.bf16.vlgmr.msra.gmra.mxu0 %vm208_vm1, %v943_v41 }
 0x9d4   :  { %v929_v41 = vpop.permute.xlu0 %928 }
 0xa2c   :  { %v976_v42 = vpop.f32.mrf.mxu1 }
 0xa2d   :  { %v986_v43 = vrot.slane %v976_v42, 2 }
 0xa2f   :  { %v988_v44 = vadd.f32 %v986_v43, %v984_v7  ;;  %v931_v7 = vadd.f32 %v929_v41, %v925_v11 }
 0xa31   :  { %1908 = vtanh.f32 %v988_v44  ;;  %v1780_v29 = vmul.f32 -1.442695, %v988_v44  ;;  %v1050_v42 = vrot.slane %v931_v7, 2 }
 0xa34   :  { %v978_v45 = vpop.f32.mrf.mxu1 }
 0xa37   :  { %v1909_v46 = vpop.eup %1908 }
 0xa38   :  { %1054 = vrot.lane.b32.xlu1 %v1909_v46, %s2030_s4 }
 0xa4a   :  { %v956_v47 = vpop.f32.mrf.mxu0 }
 0xa4b   :  { %v982_v51 = vadd.f32 %v981_v35, %v956_v47 }
 0xa4d   :  { %1910 = vtanh.f32 %v982_v51  ;;  %v1779_v30 = vmul.f32 -1.442695, %v982_v51 }
 0xa4e   :  { %1912 = vpow2.f32 %v1780_v29 }
 0xa4f   :  { %1914 = vpow2.f32 %v1779_v30 }
 0xa52   :  { %v958_v52 = vpop.f32.mrf.mxu0 }
 0xa53   :  { %v1911_v53 = vpop.eup %1910 }
 0xa54   :  { %1014 = vrot.lane.b32.xlu2 %v1911_v53, %s2030_s4  ;;  %v1913_v54 = vpop.eup %1912 }
 0xa55   :  { %v1032_v55 = vadd.f32 1.0, %v1913_v54  ;;  %v1915_v56 = vpop.eup %1914 }
 0xa56   :  { %v992_v58 = vadd.f32 1.0, %v1915_v56 }
 0xa57   :  { %1916 = vrcp.f32 %v1032_v55  ;;  %v1044_v15 = vand.u32 2147483648, %v1032_v55  ;;  %vm1038_vm11 = vweird.f32 %v1032_v55  ;;  %v1042_v16 = vand.u32 2147483647, %v1032_v55 }
 0xa58   :  { %1918 = vrcp.f32 %v992_v58  ;;  %v1004_v21 = vand.u32 2147483648, %v992_v58  ;;  %vm998_vm15 = vweird.f32 %v992_v58  ;;  %v1002_v23 = vand.u32 2147483647, %v992_v58 }
 0xa59   :  { %v1045_v20 = vor.u32 1.1754944e-38, %v1044_v15  ;;  %vm1043_vm14 = vcmp.eq.f32.partialorder %v1042_v16, 8.507059e+37 }
 0xa5a   :  { %v1005_v28 = vor.u32 1.1754944e-38, %v1004_v21  ;;  %vm1003_vm4 = vcmp.eq.f32.partialorder %v1002_v23, 8.507059e+37 }
 0xa5d   :  { %v1917_v59 = vpop.eup %1916 }
 0xa5e   :  { %v1034_v61 = vmul.f32 %v1917_v59, %v1032_v55  ;;  %v1919_v0 = vpop.eup %1918  ;;  %vm1039_vm10 = vweird.f32 %v1917_v59 }
 0xa5f   :  { %v994_v33 = vmul.f32 %v1919_v0, %v992_v58  ;;  %vm1040_vm12 = vmor %vm1038_vm11, %vm1039_vm10  ;;  %vm999_vm13 = vweird.f32 %v1919_v0 }
 0xa60   :  { %v1035_v3 = vsub.f32 1.0, %v1034_v61  ;;  %vm1000_vm2 = vmor %vm998_vm15, %vm999_vm13 }
 0xa61   :  { %v995_v12 = vsub.f32 1.0, %v994_v33 }
 0xa62   :  { %v1036_v10 = vmul.f32 %v1917_v59, %v1035_v3 }
 0xa63   :  { %v996_v14 = vmul.f32 %v1919_v0, %v995_v12 }
 0xa64   :  { %v1037_v13 = vadd.f32 %v1917_v59, %v1036_v10 }
 0xa65   :  { %v997_v19 = vadd.f32 %v1919_v0, %v996_v14  ;;  %v1163_v14 = vld [vmem:[#allocation6 + $0x4] sm:$0x2] }
 0xa66   :  { %v1041_v18 = vsel %vm1040_vm12, %v1917_v59, %v1037_v13  ;;  %v1169_v13 = vld [vmem:[#allocation7] sm:$0x4] }
 0xa67   :  { %v1046_v6 = vsel %vm1043_vm14, %v1045_v20, %v1041_v18  ;;  %v1001_v27 = vsel %vm1000_vm2, %v1919_v0, %v997_v19  ;;  %v1170_v15 = vunpack.c.l.bf16 %v1169_v13  ;;  %v1164_v19 = vunpack.c.l.bf16 %v1163_v14 }
 0xa68   :  { %v1006_v49 = vsel %vm1003_vm4, %v1005_v28, %v1001_v27  ;;  %v1052_v43 = vmul.f32 %v1050_v42, %v1046_v6 }
 0xa69   :  { %v1012_v57 = vmul.f32 %v1010_v5, %v1006_v49 }
 0xaaa   :  { %v1055_v24 = vpop.permute.xlu1 %1054 }
 0xaab   :  { %v1057_v26 = vmul.f32 %v1055_v24, %v1046_v6 }
 0xaad   :  { %1059 = vrot.lane.b32.xlu1 %v1057_v26, %s2030_s4 }
 0xaae   :  { %v1015_v50 = vpop.permute.xlu2 %1014 }
 0xaaf   :  { %v1017_v36 = vmul.f32 %v1015_v50, %v1006_v49 }
 0xab1   :  { %1019 = vrot.lane.b32.xlu2 %v1017_v36, %s2030_s4 }
 0xab5   :  { %1102 = vperm.xlu1 %1822, %v1099_v37  }
 0xb0b   :  { %v1020_v39 = vpop.permute.xlu2 %1019 }
 0xb0c   :  { %v2315_v60 = vadd.f32 %v1020_v39, %v1012_v57 }
 0xb0e   :  { %1920 = vtanh.f32 %v2315_v60 }
 0xb14   :  { %v1921_v40 = vpop.eup %1920 }
 0xb15   :  { %1025 = vrot.lane.b32.xlu2 %v1921_v40, %s2030_s4 }
 0xb1f   :  { %v1060_v44 = vpop.permute.xlu1 %1059 }
 0xb20   :  { %v1062_v45 = vadd.f32 %v1060_v44, %v1052_v43 }
 0xb22   :  { %1922 = vtanh.f32 %v1062_v45  ;;  %v1112_v35 = vrot.slane %v1062_v45, 6 }
 0xb27   :  { %v1103_v9 = vpop.permute.xlu1 %1102 }
 0xb28   :  { %v1923_v46 = vpop.eup %1922  ;;  %v1105_v48 = vmul.f32 %v1103_v9, %v2291_v34  ;;  %v1117_v22 = vmul.f32 %v1103_v9, %v931_v7 }
 0xb29   :  { %1065 = vrot.lane.b32.xlu0 %v1923_v46, %s2030_s4 }
 0xb2a   :  { %1107 = vrot.lane.b32.xlu2 %v1105_v48, %s2026_s12 }
 0xb31   :  { %1090 = vperm.xlu0 %1823, %v2310_v32  }
 0xb32   :  { %1113 = vrot.lane.b32.xlu2 %v1112_v35, %s2032_s16 }
 0xb39   :  { %1119 = vrot.lane.b32.xlu0 %v1117_v22, %s2032_s16 }
 0xb6f   :  { %v1026_v8 = vpop.permute.xlu2 %1025 }
 0xb70   :  { %v2328_v29 = vmul.f32 %v1026_v8, %v1006_v49  ;;  %v2354_v8 = vld [vmem:[%s2530_s2] sm:$0x3] }
 0xb71   :  { %vm1765_vm9 = vcmp.gt.s32.totalorder %v2354_v8, 2  ;;  %vm1757_vm4 = vcmp.gt.s32.totalorder %v2354_v8, 1 }
 0xb72   :  { %v1126_v54 = vpack.c.bf16 %v2328_v29, %v2328_v29 }
 0xb84   :  { %v1108_v53 = vpop.permute.xlu2 %1107 }
 0xb8c   :  { %v1114_v55 = vpop.permute.xlu2 %1113 }
 0xb9b   :  { %v1066_v47 = vpop.permute.xlu0 %1065 }
 0xb9c   :  { %v1068_v51 = vmul.f32 %v1066_v47, %v1046_v6 }
 0xb9e   :  { %v1094_v52 = vrot.slane %v1068_v51, 6  ;;  %v2358_v51 = vsel %vm1765_vm9, 1.0, %v2029_v4  ;;  %vm1749_vm9 = vcmp.gt.s32.totalorder %v2354_v8, 0 }
 0xba0   :  { %1095 = vrot.lane.b32.xlu1 %v1094_v52, %s2026_s12 }
 0xba3   :  { %v1091_v30 = vpop.permute.xlu0 %1090 }
 0xba4   :  { %v1116_v56 = vmul.f32 %v1114_v55, %v1091_v30 }
 0xba8   :  { %1128 = vrot.lane.b32.xlu1 %v1126_v54, %s2026_s12 }
 0xbab   :  { %v1120_v58 = vpop.permute.xlu0 %1119 }
 0xbac   :  { %v2333_v59 = vadd.f32 %v1120_v58, %v1116_v56 }
 0xbae   :  { %v1236_v61 = vrot.slane %v2333_v59, 4 }
 0xbb0   :  { %1237 = vrot.lane.b32.xlu0 %v1236_v61, %s2030_s4 }
 0xc12   :  { %v1096_v0 = vpop.permute.xlu1 %1095 }
 0xc13   :  { %v1098_v3 = vmul.f32 %v1096_v0, %v1091_v30 }
 0xc15   :  { %v2337_v33 = vadd.f32 %v1108_v53, %v1098_v3  ;;  %v1196_v3 = vrot.slane %v2315_v60, 6 }
 0xc17   :  { %1123 = vst.msk [vmem:[%s2534_s6 + $0x6] sm:$0x3] %vm175_vm0, %v2337_v33  ;;  %v1146_v10 = vpack.c.bf16 %v2337_v33, %v2337_v33 }
 0xc19   :  { %1786 = vmatmul.msk.bf16.vlgmr.msra.gmra.mxu3 %vm208_vm1, %v1146_v10 }
 0xc1a   :  { %v1129_v12 = vpop.permute.xlu1 %1128 }
 0xc1b   :  { %1785 = vmatmul.msk.bf16.vlgmr.msra.gmra.mxu2 %vm208_vm1, %v1129_v12 }
 0xc9c   :  { %v1159_v16 = vpop.f32.mrf.mxu3 }
 0xc9d   :  { %v1172_v18 = vrot.slane %v1159_v16, 4  ;;  %v1238_v16 = vpop.permute.xlu0 %1237 }
 0xc9e   :  { %v1142_v20 = vpop.f32.mrf.mxu2 }
 0xc9f   :  { %v1174_v21 = vadd.f32 %v1172_v18, %v1170_v15  ;;  %v1166_v23 = vrot.slane %v1142_v20, 6  ;;  %v1288_v15 = vsub.f32 1.0, %v2358_v51 }
 0xca1   :  { %1924 = vtanh.f32 %v1174_v21  ;;  %v1168_v6 = vadd.f32 %v1166_v23, %v1164_v19  ;;  %v1788_v37 = vmul.f32 -1.442695, %v1174_v21 }
 0xca3   :  { %1926 = vtanh.f32 %v1168_v6  ;;  %v1787_v50 = vmul.f32 -1.442695, %v1168_v6 }
 0xca4   :  { %v1161_v24 = vpop.f32.mrf.mxu3 }
 0xca5   :  { %1928 = vpow2.f32 %v1787_v50 }
 0xca6   :  { %v1144_v26 = vpop.f32.mrf.mxu2 }
 0xca7   :  { %v1925_v27 = vpop.eup %1924 }
 0xca8   :  { %1242 = vrot.lane.b32.xlu1 %v1925_v27, %s2030_s4 }
 0xca9   :  { %v1927_v28 = vpop.eup %1926 }
 0xcaa   :  { %1200 = vrot.lane.b32.xlu2 %v1927_v28, %s2030_s4 }
 0xcab   :  { %v1929_v49 = vpop.eup %1928 }
 0xcac   :  { %v1178_v36 = vadd.f32 1.0, %v1929_v49 }
 0xcae   :  { %1930 = vrcp.f32 %v1178_v36  ;;  %v1190_v42 = vand.u32 2147483648, %v1178_v36  ;;  %vm1184_vm6 = vweird.f32 %v1178_v36  ;;  %v1188_v43 = vand.u32 2147483647, %v1178_v36 }
 0xcaf   :  { %1932 = vpow2.f32 %v1788_v37 }
 0xcb0   :  { %v1191_v45 = vor.u32 1.1754944e-38, %v1190_v42  ;;  %vm1189_vm8 = vcmp.eq.f32.partialorder %v1188_v43, 8.507059e+37 }
 0xcb4   :  { %v1931_v5 = vpop.eup %1930 }
 0xcb5   :  { %v1180_v57 = vmul.f32 %v1931_v5, %v1178_v36  ;;  %v1933_v40 = vpop.eup %1932  ;;  %vm1185_vm5 = vweird.f32 %v1931_v5 }
 0xcb6   :  { %v1218_v41 = vadd.f32 1.0, %v1933_v40  ;;  %vm1186_vm7 = vmor %vm1184_vm6, %vm1185_vm5 }
 0xcb7   :  { %v1181_v39 = vsub.f32 1.0, %v1180_v57 }
 0xcb8   :  { %1934 = vrcp.f32 %v1218_v41  ;;  %v1230_v30 = vand.u32 2147483648, %v1218_v41  ;;  %vm1224_vm11 = vweird.f32 %v1218_v41  ;;  %v1228_v54 = vand.u32 2147483647, %v1218_v41 }
 0xcb9   :  { %v1182_v11 = vmul.f32 %v1931_v5, %v1181_v39 }
 0xcba   :  { %v1231_v56 = vor.u32 1.1754944e-38, %v1230_v30  ;;  %vm1229_vm13 = vcmp.eq.f32.partialorder %v1228_v54, 8.507059e+37 }
 0xcbb   :  { %v1183_v7 = vadd.f32 %v1931_v5, %v1182_v11 }
 0xcbd   :  { %v1187_v44 = vsel %vm1186_vm7, %v1931_v5, %v1183_v7 }
 0xcbe   :  { %v1935_v9 = vpop.eup %1934  ;;  %v1192_v46 = vsel %vm1189_vm8, %v1191_v45, %v1187_v44  ;;  %v1345_v44 = vld [vmem:[#allocation6 + $0x4] sm:$0x4] }
 0xcbf   :  { %v1220_v22 = vmul.f32 %v1935_v9, %v1218_v41  ;;  %vm1225_vm10 = vweird.f32 %v1935_v9  ;;  %v1198_v10 = vmul.f32 %v1196_v3, %v1192_v46  ;;  %v1346_v45 = vunpack.c.l.bf16 %v1345_v44 }
 0xcc0   :  { %vm1226_vm12 = vmor %vm1224_vm11, %vm1225_vm10 }
 0xcc1   :  { %v1221_v47 = vsub.f32 1.0, %v1220_v22 }
 0xcc3   :  { %v1222_v52 = vmul.f32 %v1935_v9, %v1221_v47 }
 0xcc5   :  { %v1223_v53 = vadd.f32 %v1935_v9, %v1222_v52  ;;  %v1351_v52 = vld [vmem:[#allocation7] sm:$0x2] }
 0xcc6   :  { %v1352_v30 = vunpack.c.l.bf16 %v1351_v52 }
 0xcc7   :  { %v1227_v55 = vsel %vm1226_vm12, %v1935_v9, %v1223_v53 }
 0xcc8   :  { %v1232_v61 = vsel %vm1229_vm13, %v1231_v56, %v1227_v55 }
 0xcc9   :  { %v1240_v18 = vmul.f32 %v1238_v16, %v1232_v61 }
 0xd04   :  { %v1201_v48 = vpop.permute.xlu2 %1200 }
 0xd05   :  { %v1203_v35 = vmul.f32 %v1201_v48, %v1192_v46 }
 0xd07   :  { %1205 = vrot.lane.b32.xlu2 %v1203_v35, %s2030_s4 }
 0xd0f   :  { %1279 = vperm.xlu2 %1821, %v2358_v51  }
 0xd1a   :  { %v1243_v58 = vpop.permute.xlu1 %1242 }
 0xd1b   :  { %v1245_v0 = vmul.f32 %v1243_v58, %v1232_v61 }
 0xd1d   :  { %1247 = vrot.lane.b32.xlu1 %v1245_v0, %s2030_s4 }
 0xd61   :  { %v1206_v12 = vpop.permute.xlu2 %1205 }
 0xd62   :  { %v2363_v13 = vadd.f32 %v1206_v12, %v1198_v10 }
 0xd64   :  { %1936 = vtanh.f32 %v2363_v13 }
 0xd69   :  { %v1280_v49 = vpop.permute.xlu2 %1279 }
 0xd6a   :  { %v1937_v14 = vpop.eup %1936 }
 0xd6b   :  { %1211 = vrot.lane.b32.xlu1 %v1937_v14, %s2030_s4 }
 0xd73   :  { %1291 = vperm.xlu1 %1822, %v1288_v15  }
 0xd8f   :  { %v1248_v19 = vpop.permute.xlu1 %1247 }
 0xd90   :  { %v1250_v20 = vadd.f32 %v1248_v19, %v1240_v18 }
 0xd92   :  { %1938 = vtanh.f32 %v1250_v20  ;;  %v1297_v50 = vrot.slane %v1250_v20, 4 }
 0xd98   :  { %v1939_v21 = vpop.eup %1938 }
 0xd99   :  { %1253 = vrot.lane.b32.xlu0 %v1939_v21, %s2030_s4 }
 0xddd   :  { %v1212_v60 = vpop.permute.xlu1 %1211 }
 0xdde   :  { %v2369_v23 = vmul.f32 %v1212_v60, %v1192_v46 }
 0xde0   :  { %v1307_v6 = vpack.c.bf16 %v2369_v23, %v2369_v23 }
 0xde2   :  { %v1309_v24 = vrot.slane %v1307_v6, 1  ;;  %v2398_v6 = vsel %vm1757_vm4, 1.0, %v2029_v4 }
 0xde4   :  { %1310 = vrot.lane.b32.xlu2 %v1309_v24, %s2026_s12 }
 0xde5   :  { %v1292_v37 = vpop.permute.xlu1 %1291 }
 0xde6   :  { %v1294_v57 = vmul.f32 %v1292_v37, %v2337_v33  ;;  %v1302_v7 = vmul.f32 %v1292_v37, %v2333_v59 }
 0xe0b   :  { %v1254_v26 = vpop.permute.xlu0 %1253 }
 0xe0c   :  { %v1256_v27 = vmul.f32 %v1254_v26, %v1232_v61 }
 0xe0e   :  { %v1283_v28 = vrot.slane %v1256_v27, 4 }
 0xe10   :  { %1284 = vrot.lane.b32.xlu0 %v1283_v28, %s2026_s12 }
 0xe18   :  { %1298 = vrot.lane.b32.xlu0 %v1297_v50, %s2032_s16 }
 0xe3e   :  { %v1311_v36 = vpop.permute.xlu2 %1310 }
 0xe3f   :  { %1793 = vmatmul.msk.bf16.vlgmr.msrb.gmra.mxu0 %vm208_vm1, %v1311_v36 }
 0xe82   :  { %v1285_v5 = vpop.permute.xlu0 %1284 }
 0xe83   :  { %v1287_v39 = vmul.f32 %v1285_v5, %v1280_v49 }
 0xe85   :  { %v2378_v40 = vadd.f32 %v1294_v57, %v1287_v39  ;;  %v1378_v39 = vrot.slane %v2363_v13, 6  ;;  %v1470_v13 = vsub.f32 1.0, %v2398_v6 }
 0xe87   :  { %1304 = vst.msk [vmem:[%s2534_s6 + $0x4] sm:$0x3] %vm175_vm0, %v2378_v40  ;;  %v1328_v41 = vpack.c.bf16 %v2378_v40, %v2378_v40 }
 0xe89   :  { %1794 = vmatmul.msk.bf16.vlgmr.msrb.gmra.mxu1 %vm208_vm1, %v1328_v41 }
 0xe8a   :  { %v1299_v11 = vpop.permute.xlu0 %1298 }
 0xe8b   :  { %v1301_v42 = vmul.f32 %v1299_v11, %v1280_v49 }
 0xe8d   :  { %v2389_v43 = vadd.f32 %v1302_v7, %v1301_v42 }
 0xe8f   :  { %v1418_v33 = vrot.slane %v2389_v43, 6 }
 0xe91   :  { %1419 = vrot.lane.b32.xlu0 %v1418_v33, %s2030_s4 }
 0xebc   :  { %v1324_v9 = vpop.f32.mrf.mxu0 }
 0xebd   :  { %v1348_v46 = vrot.slane %v1324_v9, 4 }
 0xebf   :  { %v1350_v48 = vadd.f32 %v1348_v46, %v1346_v45 }
 0xec1   :  { %1940 = vtanh.f32 %v1350_v48  ;;  %v1795_v47 = vmul.f32 -1.442695, %v1350_v48 }
 0xec3   :  { %1942 = vpow2.f32 %v1795_v47 }
 0xec4   :  { %v1326_v35 = vpop.f32.mrf.mxu0 }
 0xec7   :  { %v1941_v22 = vpop.eup %1940 }
 0xec8   :  { %1382 = vrot.lane.b32.xlu2 %v1941_v22, %s2030_s4 }
 0xec9   :  { %v1943_v59 = vpop.eup %1942 }
 0xeca   :  { %v1360_v53 = vadd.f32 1.0, %v1943_v59 }
 0xecc   :  { %1944 = vrcp.f32 %v1360_v53  ;;  %v1372_v15 = vand.u32 2147483648, %v1360_v53  ;;  %vm1366_vm15 = vweird.f32 %v1360_v53  ;;  %v1370_v16 = vand.u32 2147483647, %v1360_v53 }
 0xece   :  { %v1373_v19 = vor.u32 1.1754944e-38, %v1372_v15  ;;  %vm1371_vm3 = vcmp.eq.f32.partialorder %v1370_v16, 8.507059e+37 }
 0xed2   :  { %v1945_v58 = vpop.eup %1944 }
 0xed3   :  { %v1362_v0 = vmul.f32 %v1945_v58, %v1360_v53  ;;  %vm1367_vm14 = vweird.f32 %v1945_v58 }
 0xed4   :  { %vm1368_vm2 = vmor %vm1366_vm15, %vm1367_vm14 }
 0xed5   :  { %v1363_v10 = vsub.f32 1.0, %v1362_v0 }
 0xed7   :  { %v1364_v12 = vmul.f32 %v1945_v58, %v1363_v10  ;;  %v1527_v10 = vld [vmem:[#allocation6 + $0x4] sm:$0x8] }
 0xed9   :  { %v1365_v14 = vadd.f32 %v1945_v58, %v1364_v12  ;;  %v1528_v12 = vunpack.c.l.bf16 %v1527_v10 }
 0xedb   :  { %v1369_v18 = vsel %vm1368_vm2, %v1945_v58, %v1365_v14 }
 0xedc   :  { %v1374_v21 = vsel %vm1371_vm3, %v1373_v19, %v1369_v18  ;;  %vm1670_vm3 = vcmask 261126  }
 0xedd   :  { %v1380_v7 = vmul.f32 %v1378_v39, %v1374_v21 }
 0xf03   :  { %v1420_v48 = vpop.permute.xlu0 %1419 }
 0xf06   :  { %v1341_v54 = vpop.f32.mrf.mxu1 }
 0xf07   :  { %v1354_v55 = vrot.slane %v1341_v54, 6 }
 0xf09   :  { %v1356_v56 = vadd.f32 %v1354_v55, %v1352_v30 }
 0xf0b   :  { %1946 = vtanh.f32 %v1356_v56  ;;  %v1796_v24 = vmul.f32 -1.442695, %v1356_v56 }
 0xf0d   :  { %1948 = vpow2.f32 %v1796_v24 }
 0xf0e   :  { %v1343_v61 = vpop.f32.mrf.mxu1 }
 0xf11   :  { %v1947_v3 = vpop.eup %1946 }
 0xf12   :  { %1424 = vrot.lane.b32.xlu1 %v1947_v3, %s2030_s4 }
 0xf13   :  { %v1949_v26 = vpop.eup %1948 }
 0xf14   :  { %v1400_v27 = vadd.f32 1.0, %v1949_v26 }
 0xf16   :  { %1950 = vrcp.f32 %v1400_v27  ;;  %v1412_v5 = vand.u32 2147483648, %v1400_v27  ;;  %vm1406_vm6 = vweird.f32 %v1400_v27  ;;  %v1410_v57 = vand.u32 2147483647, %v1400_v27 }
 0xf18   :  { %v1413_v42 = vor.u32 1.1754944e-38, %v1412_v5  ;;  %vm1411_vm8 = vcmp.eq.f32.partialorder %v1410_v57, 8.507059e+37  ;;  %v541_v5 = vrot.slane %v2201_v38, 2 }
 0xf1c   :  { %v1951_v28 = vpop.eup %1950 }
 0xf1d   :  { %v1402_v50 = vmul.f32 %v1951_v28, %v1400_v27  ;;  %vm1407_vm5 = vweird.f32 %v1951_v28 }
 0xf1e   :  { %vm1408_vm7 = vmor %vm1406_vm6, %vm1407_vm5 }
 0xf1f   :  { %v1403_v49 = vsub.f32 1.0, %v1402_v50 }
 0xf21   :  { %v1404_v36 = vmul.f32 %v1951_v28, %v1403_v49 }
 0xf22   :  { %v1383_v20 = vpop.permute.xlu2 %1382 }
 0xf23   :  { %v1385_v60 = vmul.f32 %v1383_v20, %v1374_v21  ;;  %v1405_v37 = vadd.f32 %v1951_v28, %v1404_v36  ;;  %v1750_v36 = vsel %vm1749_vm9, 1.0, %v2029_v4 }
 0xf25   :  { %1387 = vrot.lane.b32.xlu2 %v1385_v60, %s2030_s4  ;;  %v1409_v11 = vsel %vm1408_vm7, %v1951_v28, %v1405_v37  ;;  %v1643_v37 = vsub.f32 1.0, %v1750_v36 }
 0xf26   :  { %v1414_v45 = vsel %vm1411_vm8, %v1413_v42, %v1409_v11 }
 0xf27   :  { %v1422_v35 = vmul.f32 %v1420_v48, %v1414_v45  ;;  %v1824_v48 = vpack.i.bf16 %v2398_v6, %v1750_v36 }
 0xf2d   :  { %1461 = vperm.xlu2 %1821, %v2398_v6  }
 0xf7f   :  { %v1388_v41 = vpop.permute.xlu2 %1387 }
 0xf80   :  { %v2402_v33 = vadd.f32 %v1388_v41, %v1380_v7 }
 0xf82   :  { %1952 = vtanh.f32 %v2402_v33 }
 0xf84   :  { %v1425_v44 = vpop.permute.xlu1 %1424 }
 0xf85   :  { %v1427_v9 = vmul.f32 %v1425_v44, %v1414_v45 }
 0xf87   :  { %1429 = vrot.lane.b32.xlu1 %v1427_v9, %s2030_s4  ;;  %v1462_v55 = vpop.permute.xlu2 %1461 }
 0xf88   :  { %v1953_v46 = vpop.eup %1952 }
 0xf8f   :  { %1393 = vrot.lane.b32.xlu1 %v1953_v46, %s2030_s4 }
 0xf97   :  { %1473 = vperm.xlu1 %1822, %v1470_v13  }
 0xff9   :  { %v1430_v22 = vpop.permute.xlu1 %1429 }
 0xffa   :  { %v1432_v47 = vadd.f32 %v1430_v22, %v1422_v35  ;;  %v1533_v35 = vld [vmem:[#allocation7] sm:$0x1] }
 0xffb   :  { %v1534_v22 = vunpack.c.l.bf16 %v1533_v35  ;;  %v1271_v35 = vrot.slane %v2369_v23, 2 }
 0xffc   :  { %1954 = vtanh.f32 %v1432_v47  ;;  %v1479_v3 = vrot.slane %v1432_v47, 2  ;;  %v1829_v47 = vpack.i.bf16 %v1750_v36, %v2358_v51 }
0x1001   :  { %v1394_v59 = vpop.permute.xlu1 %1393 }
0x1002   :  { %v1955_v52 = vpop.eup %1954  ;;  %v2408_v53 = vmul.f32 %v1394_v59, %v1374_v21 }
0x1003   :  { %1435 = vrot.lane.b32.xlu0 %v1955_v52, %s2030_s4 }
0x1004   :  { %v1489_v30 = vpack.c.bf16 %v2408_v53, %v2408_v53 }
0x1006   :  { %v1491_v54 = vrot.slane %v1489_v30, 2  ;;  %v1834_v30 = vpack.i.bf16 %v2310_v32, %v2264_v31 }
0x1008   :  { %1492 = vrot.lane.b32.xlu2 %v1491_v54, %s2026_s12 }
0x1009   :  { %v1474_v18 = vpop.permute.xlu1 %1473 }
0x100a   :  { %v1476_v20 = vmul.f32 %v1474_v18, %v2378_v40  ;;  %v1484_v40 = vmul.f32 %v1474_v18, %v2389_v43 }
0x1062   :  { %v1493_v56 = vpop.permute.xlu2 %1492 }
0x1063   :  { %1801 = vmatmul.msk.bf16.vlgmr.msrb.gmra.mxu2 %vm208_vm1, %v1493_v56  ;;  %v723_v56 = vrot.slane %v2244_v63, 4 }
0x1075   :  { %v1436_v58 = vpop.permute.xlu0 %1435 }
0x1076   :  { %v1438_v61 = vmul.f32 %v1436_v58, %v1414_v45 }
0x1078   :  { %v1465_v0 = vrot.slane %v1438_v61, 2 }
0x107a   :  { %1466 = vrot.lane.b32.xlu0 %v1465_v0, %s2026_s12 }
0x1082   :  { %1480 = vrot.lane.b32.xlu0 %v1479_v3, %s2032_s16 }
0x10e6   :  { %v1506_v14 = vpop.f32.mrf.mxu2 }
0x10e7   :  { %v1530_v15 = vrot.slane %v1506_v14, 2 }
0x10e9   :  { %v1532_v16 = vadd.f32 %v1530_v15, %v1528_v12 }
0x10eb   :  { %1956 = vtanh.f32 %v1532_v16  ;;  %v1803_v57 = vmul.f32 -1.442695, %v1532_v16 }
0x10ec   :  { %v1467_v19 = vpop.permute.xlu0 %1466 }
0x10ed   :  { %v1469_v21 = vmul.f32 %v1467_v19, %v1462_v55  ;;  %1958 = vpow2.f32 %v1803_v57 }
0x10ee   :  { %v1508_v60 = vpop.f32.mrf.mxu2 }
0x10ef   :  { %v2418_v24 = vadd.f32 %v1476_v20, %v1469_v21  ;;  %v1557_v60 = vrot.slane %v2402_v33, 6 }
0x10f1   :  { %v1957_v26 = vpop.eup %1956  ;;  %1486 = vst.msk [vmem:[%s2534_s6 + $0x2] sm:$0x3] %vm175_vm0, %v2418_v24  ;;  %v1510_v27 = vpack.c.bf16 %v2418_v24, %v2418_v24 }
0x10f2   :  { %1561 = vrot.lane.b32.xlu1 %v1957_v26, %s2030_s4 }
0x10f3   :  { %1802 = vmatmul.msk.bf16.vlgmr.msrb.gmra.mxu3 %vm208_vm1, %v1510_v27  ;;  %v1959_v39 = vpop.eup %1958 }
0x10f4   :  { %v1481_v28 = vpop.permute.xlu0 %1480  ;;  %v1539_v43 = vadd.f32 1.0, %v1959_v39 }
0x10f5   :  { %v1483_v50 = vmul.f32 %v1481_v28, %v1462_v55 }
0x10f6   :  { %1960 = vrcp.f32 %v1539_v43  ;;  %v1551_v44 = vand.u32 2147483648, %v1539_v43  ;;  %vm1545_vm10 = vweird.f32 %v1539_v43  ;;  %v1549_v4 = vand.u32 2147483647, %v1539_v43 }
0x10f7   :  { %v2430_v49 = vadd.f32 %v1484_v40, %v1483_v50 }
0x10f8   :  { %v1552_v9 = vor.u32 1.1754944e-38, %v1551_v44  ;;  %vm1550_vm12 = vcmp.eq.f32.partialorder %v1549_v4, 8.507059e+37  ;;  %v901_v44 = vrot.slane %v2295_v1, 6 }
0x10f9   :  { %1597 = vrot.lane.b32.xlu0 %v2430_v49, %s2030_s4 }
0x10fc   :  { %v1961_v41 = vpop.eup %1960 }
0x10fd   :  { %v1541_v11 = vmul.f32 %v1961_v41, %v1539_v43  ;;  %vm1546_vm1 = vweird.f32 %v1961_v41 }
0x10fe   :  { %vm1547_vm11 = vmor %vm1545_vm10, %vm1546_vm1 }
0x10ff   :  { %v1542_v7 = vsub.f32 1.0, %v1541_v11 }
0x1101   :  { %1646 = vperm.xlu0 %1823, %v1643_v37   ;;  %v1543_v8 = vmul.f32 %v1961_v41, %v1542_v7 }
0x1103   :  { %v1544_v42 = vadd.f32 %v1961_v41, %v1543_v8 }
0x1105   :  { %v1548_v45 = vsel %vm1547_vm11, %v1961_v41, %v1544_v42  ;;  %v1453_v42 = vrot.slane %v2408_v53, 4 }
0x1106   :  { %v2438_v38 = vsel %vm1550_vm12, %v1552_v9, %v1548_v45 }
0x1107   :  { %v1559_v26 = vmul.f32 %v1557_v60, %v2438_v38 }
0x1109   :  { %542 = vrot.lane.b32.xlu0 %v541_v5, %s2026_s12 }
0x1164   :  { %v1562_v46 = vpop.permute.xlu1 %1561 }
0x1165   :  { %v1564_v13 = vmul.f32 %v1562_v46, %v2438_v38 }
0x1167   :  { %1566 = vrot.lane.b32.xlu1 %v1564_v13, %s2030_s4 }
0x116b   :  { %v1598_v10 = vpop.permute.xlu0 %1597 }
0x116f   :  { %1825 = vperm.xlu1 %1822, %v1824_v48  }
0x1173   :  { %v1647_v16 = vpop.permute.xlu0 %1646 }
0x1174   :  { %v1649_v11 = vmul.f32 %v1647_v16, %v2418_v24 }
0x1176   :  { %v1523_v59 = vpop.f32.mrf.mxu3 }
0x1177   :  { %v1535_v52 = vadd.f32 %v1534_v22, %v1523_v59  ;;  %1830 = vperm.xlu1 %1822, %v1829_v47  }
0x1179   :  { %1962 = vtanh.f32 %v1535_v52  ;;  %v1804_v6 = vmul.f32 -1.442695, %v1535_v52 }
0x117b   :  { %1964 = vpow2.f32 %v1804_v6  ;;  %v543_v50 = vpop.permute.xlu0 %542 }
0x117e   :  { %v1525_v54 = vpop.f32.mrf.mxu3 }
0x117f   :  { %v1963_v55 = vpop.eup %1962  ;;  %1835 = vperm.xlu1 %1822, %v1834_v30  }
0x1180   :  { %1602 = vrot.lane.b32.xlu2 %v1963_v55, %s2030_s4 }
0x1181   :  { %v1965_v58 = vpop.eup %1964 }
0x1182   :  { %v1579_v51 = vadd.f32 1.0, %v1965_v58 }
0x1184   :  { %1966 = vrcp.f32 %v1579_v51  ;;  %v1591_v32 = vand.u32 2147483648, %v1579_v51  ;;  %vm1585_vm14 = vweird.f32 %v1579_v51  ;;  %v1589_v14 = vand.u32 2147483647, %v1579_v51 }
0x1186   :  { %v1592_v63 = vor.u32 1.1754944e-38, %v1591_v32  ;;  %vm1590_vm2 = vcmp.eq.f32.partialorder %v1589_v14, 8.507059e+37 }
0x1187   :  { %724 = vrot.lane.b32.xlu1 %v723_v56, %s2026_s12 }
0x118a   :  { %v1967_v61 = vpop.eup %1966 }
0x118b   :  { %v1581_v0 = vmul.f32 %v1967_v61, %v1579_v51  ;;  %vm1586_vm13 = vweird.f32 %v1967_v61 }
0x118c   :  { %vm1587_vm15 = vmor %vm1585_vm14, %vm1586_vm13 }
0x118d   :  { %v1582_v3 = vsub.f32 1.0, %v1581_v0 }
0x118f   :  { %v1583_v12 = vmul.f32 %v1967_v61, %v1582_v3 }
0x1191   :  { %v1584_v31 = vadd.f32 %v1967_v61, %v1583_v12 }
0x1193   :  { %v1588_v15 = vsel %vm1587_vm15, %v1967_v61, %v1584_v31 }
0x1194   :  { %v2449_v20 = vsel %vm1590_vm2, %v1592_v63, %v1588_v15 }
0x1195   :  { %v1600_v24 = vmul.f32 %v1598_v10, %v2449_v20 }
0x11d9   :  { %v1567_v18 = vpop.permute.xlu1 %1566 }
0x11da   :  { %v1603_v19 = vpop.permute.xlu2 %1602  ;;  %v1569_v36 = vadd.f32 %v1567_v18, %v1559_v26 }
0x11db   :  { %v1605_v21 = vmul.f32 %v1603_v19, %v2449_v20 }
0x11dc   :  { %1968 = vtanh.f32 %v1569_v36 }
0x11dd   :  { %1607 = vrot.lane.b32.xlu2 %v1605_v21, %s2030_s4 }
0x11e1   :  { %v1826_v27 = vpop.permute.xlu1 %1825 }
0x11e2   :  { %v1828_v28 = vunpack.i.h.bf16 %v1826_v27  ;;  %v1827_v40 = vunpack.i.l.bf16 %v1826_v27  ;;  %v1969_v33 = vpop.eup %1968 }
0x11e4   :  { %v545_v37 = vmul.f32 %v1828_v28, %v543_v50  ;;  %v359_v5 = vmul.f32 %v1827_v40, %v2157_v17 }
0x11e6   :  { %546 = vst.msk [vmem:[%s2533_s5 + $0x2] sm:$0x3] %vm175_vm0, %v545_v37  ;;  %361 = vrot.lane.b32.xlu2 %v359_v5, %s2026_s12 }
0x11e9   :  { %v1831_v57 = vpop.permute.xlu1 %1830 }
0x11ea   :  { %v1832_v17 = vunpack.i.l.bf16 %v1831_v57  ;;  %v1833_v45 = vunpack.i.h.bf16 %v1831_v57 }
0x11ee   :  { %1572 = vrot.lane.b32.xlu2 %v1969_v33, %s2030_s4 }
0x11f1   :  { %v1836_v39 = vpop.permute.xlu1 %1835 }
0x11f2   :  { %v1837_v43 = vunpack.i.l.bf16 %v1836_v39  ;;  %v1838_v48 = vunpack.i.h.bf16 %v1836_v39 }
0x11f4   :  { %v1082_v41 = vmul.f32 %v1837_v43, %v2328_v29  ;;  %v1839_v29 = vpack.i.bf16 %v2190_v2, %v2233_v25  ;;  %v1656_v2 = vmul.f32 %v1647_v16, %v2430_v49 }
0x11f6   :  { %1084 = vrot.lane.b32.xlu1 %v1082_v41, %s2026_s12  ;;  %1651 = vrot.lane.b32.xlu2 %v1649_v11, %s2026_s12 }
0x11f9   :  { %v725_v7 = vpop.permute.xlu1 %724 }
0x11fa   :  { %v727_v8 = vmul.f32 %v1832_v17, %v725_v7 }
0x11fc   :  { %728 = vst.msk [vmem:[%s2533_s5 + $0x4] sm:$0x3] %vm175_vm0, %v727_v8 }
0x11fe   :  { %1454 = vrot.lane.b32.xlu1 %v1453_v42, %s2026_s12  ;;  %902 = vrot.lane.b32.xlu2 %v901_v44, %s2026_s12 }
0x1206   :  { %1840 = vperm.xlu2 %1821, %v1839_v29  }
0x120e   :  { %1627 = vperm.xlu2 %1821, %v2148_v62  }
0x1237   :  { %v1608_v4 = vpop.permute.xlu2 %1607 }
0x1238   :  { %v1610_v9 = vadd.f32 %v1608_v4, %v1600_v24 }
0x123a   :  { %1970 = vtanh.f32 %v1610_v9  ;;  %v1655_v46 = vmul.f32 %v1833_v45, %v1610_v9 }
0x1240   :  { %v1971_v53 = vpop.eup %1970  ;;  %v362_v13 = vpop.permute.xlu2 %361 }
0x1241   :  { %365 = vst.msk [vmem:[%s2533_s5] sm:$0x3] %vm175_vm0, %v362_v13  ;;  %1613 = vrot.lane.b32.xlu0 %v1971_v53, %s2030_s4 }
0x1248   :  { %v1573_v25 = vpop.permute.xlu2 %1572 }
0x1249   :  { %v1575_v62 = vmul.f32 %v1573_v25, %v2438_v38  ;;  %1658 = vrot.lane.b32.xlu0 %v1656_v2, %s2030_s4 }
0x124b   :  { %1667 = vrot.lane.b32.xlu2 %v1575_v62, %s2026_s12  ;;  %v1631_v49 = vrot.slane %v1575_v62, 6 }
0x1250   :  { %v1652_v1 = vpop.permute.xlu2 %1651 }
0x1251   :  { %933 = vrot.lane.b32.xlu0 %v2291_v34, %s2026_s12 }
0x1258   :  { %v903_v22 = vpop.permute.xlu2 %902 }
0x1259   :  { %v905_v47 = vmul.f32 %v1838_v48, %v903_v22  ;;  %1272 = vrot.lane.b32.xlu0 %v1271_v35, %s2026_s12 }
0x125b   :  { %906 = vst.msk [vmem:[%s2533_s5 + $0x6] sm:$0x3] %vm175_vm0, %v905_v47 }
0x1260   :  { %v1841_v34 = vpop.permute.xlu2 %1840 }
0x1261   :  { %1632 = vrot.lane.b32.xlu0 %v1631_v49, %s2026_s12  ;;  %v1843_v23 = vunpack.i.h.bf16 %v1841_v34  ;;  %v1842_v3 = vunpack.i.l.bf16 %v1841_v34 }
0x1268   :  { %v1085_v38 = vpop.permute.xlu1 %1084  ;;  %v1628_v30 = vpop.permute.xlu2 %1627 }
0x1269   :  { %1087 = vst.msk [vmem:[%s2533_s5 + $0x8] sm:$0x3] %vm175_vm0, %v1085_v38  ;;  %1673 = vrot.lane.b32.xlu0 %v1569_v36, %s2032_s16 }
0x1270   :  { %v1455_v59 = vpop.permute.xlu1 %1454 }
0x1271   :  { %v1457_v52 = vmul.f32 %v1843_v23, %v1455_v59 }
0x1273   :  { %1458 = vst.msk [vmem:[%s2533_s5 + $0xc] sm:$0x3] %vm175_vm0, %v1457_v52 }
0x12a5   :  { %v1668_v54 = vpop.permute.xlu2 %1667 }
0x12a6   :  { %1671 = vst.msk [vmem:[#allocation2 - $0x6] sm:$0xc0] %vm1670_vm3, %v1668_v54 }
0x12b3   :  { %v1614_v55 = vpop.permute.xlu0 %1613 }
0x12b4   :  { %v1616_v56 = vmul.f32 %v1614_v55, %v2449_v20 }
0x12b6   :  { %v1642_v6 = vmul.f32 %v1833_v45, %v1616_v56 }
0x12b8   :  { %v1654_v58 = vadd.f32 %v1652_v1, %v1642_v6 }
0x12ba   :  { %1663 = vrot.lane.b32.xlu1 %v1654_v58, %s2026_s12 }
0x12bb   :  { %v1659_v51 = vpop.permute.xlu0 %1658 }
0x12bc   :  { %v1661_v61 = vadd.f32 %v1659_v51, %v1655_v46 }
0x12c2   :  { %1679 = vrot.lane.b32.xlu1 %v1661_v61, %s2032_s16 }
0x12c3   :  { %v934_v0 = vpop.permute.xlu0 %933 }
0x12c4   :  { %936 = vst.msk [vmem:[%s2534_s6 + $0x8] sm:$0x3] %vm175_vm0, %v934_v0 }
0x12cb   :  { %v1273_v10 = vpop.permute.xlu0 %1272 }
0x12cc   :  { %v1275_v12 = vmul.f32 %v1842_v3, %v1273_v10 }
0x12ce   :  { %1276 = vst.msk [vmem:[%s2533_s5 + $0xa] sm:$0x3] %vm175_vm0, %v1275_v12 }
0x12d3   :  { %v1633_v31 = vpop.permute.xlu0 %1632 }
0x12d4   :  { %v1635_v32 = vmul.f32 %v1633_v31, %v1628_v30 }
0x12d6   :  { %1636 = vst.msk [vmem:[%s2533_s5 + $0xe] sm:$0x3] %vm175_vm0, %v1635_v32 }
0x12db   :  { %v1674_v14 = vpop.permute.xlu0 %1673 }
0x12dc   :  { %1676 = vst.msk [vmem:[#allocation3 - $0x6] sm:$0xc0] %vm1670_vm3, %v1674_v14 }
0x132c   :  { %v1664_v15 = vpop.permute.xlu1 %1663 }
0x132d   :  { %1666 = vst.msk [vmem:[%s2534_s6] sm:$0x3] %vm175_vm0, %v1664_v15 }
0x132e   :  { %1677 = vst.msk [vmem:[#allocation4] sm:$0x3] %vm175_vm0, %v1664_v15 }
0x1334   :  { %v1680_v63 = vpop.permute.xlu1 %1679 }
0x1335   :  { %1682 = vst.msk [vmem:[#allocation5] sm:$0x3] %vm175_vm0, %v1680_v63 }
0x1336   :  { %1705 = vsyncpa [#allocation9], 1 }
0x1337   :  { %1706 = vsyncpa [#allocation11], 1 }

// kernel: encoder_forward.12
= control target key start
LH: loop header
LB: loop body
LE: loop exit
PB: predicated region body
PF: predicated region fallthrough
CT: control target
= control target key end

     0   :  { %12 = vsyncpa [#allocation7], 0  ;;  %s854_s0 = inlined_call_operand.vmem [shape: bf16[4,256], index: 0, kind: input, shape index: {}, may-alias: {0,1}]   ;;  %s855_s1 = inlined_call_operand.vmem [shape: bf16[4,256], index: 1, kind: input, shape index: {}, may-alias: {0,1}]   ;;  %s856_s2 = inlined_call_operand.vmem [shape: s32[2,1], index: 2, kind: input, shape index: {}]   ;;  %s857_s3 = inlined_call_operand.hbm [shape: bf16[32,128], index: 3, kind: input, shape index: {}]   ;;  %s858_s4 = inlined_call_operand.hbm [shape: bf16[32,128], index: 4, kind: input, shape index: {}]   ;;  %s859_s5 = inlined_call_operand.vmem [shape: f32[4,32], index: 5, kind: output, shape index: {0}]   ;;  %s860_s6 = inlined_call_operand.vmem [shape: f32[4,32], index: 6, kind: output, shape index: {1}]  }
   0x1   :  { %s32_s23 = sshll.u32 %s857_s3, 4  ;;  %s33_s23 = int_to_ptr.hbm [resolvable:$true] %s32_s23 }
   0x2   :  { %13 = vsyncpa [#allocation9], 0  ;;  %s693_s24 = smov [#allocation6]   ;;  %s45_s28 = sshll.u32 %s858_s4, 4  ;;  %s46_s28 = int_to_ptr.hbm [resolvable:$true] %s45_s28 }
   0x3   :  { %s34_s25 = sshll.u32 %s693_s24, 4  ;;  %s694_s29 = smov 64   ;;  %s35_s25 = int_to_ptr.vmem [resolvable:$true] %s34_s25 }
   0x4   :  { %s695_s30 = smov 4   ;;  %s696_s7 = smov [#allocation8]  }
   0x5   :  { %40 = dma.hbm_to_vmem [thread:$0]  %s33_s23, 256, %s35_s25, [#allocation7], %s694_s29, %s694_s29, %s695_s30  }
   0x6   :  { %s47_s8 = sshll.u32 %s696_s7, 4  ;;  %s48_s8 = int_to_ptr.vmem [resolvable:$true] %s47_s8 }
   0x7   :  { %53 = dma.hbm_to_vmem [thread:$0]  %s46_s28, 256, %s48_s8, [#allocation9], %s694_s29, %s694_s29, %s695_s30  }
   0x8   :  { %689 = dma.done.wait [#allocation7], 256  }
   0x9   :  { %690 = vsyncadd [#allocation7], 4294967040 }
   0xa   :  { %691 = dma.done.wait [#allocation9], 256  }
   0xb   :  { %692 = vsyncadd [#allocation9], 4294967040  ;;  %vm93_vm0 = vcmask 254976   ;;  %v697_v0 = vmov 0.0   ;;  %v591_v1 = vld [vmem:[#allocation6 + $0x8] sm:$0xff]  ;;  %v593_v2 = vld [vmem:[#allocation8 + $0x8] sm:$0xff] }
   0xc   :  { %94 = vst.msk [vmem:[#allocation2] sm:$0x3] %vm93_vm0, %v697_v0  ;;  %v590_v3 = vld [vmem:[#allocation6] sm:$0xff]  ;;  %136 = vmatpush.bf16.msra.mxu0 %v591_v1  ;;  %165 = vmatpush.bf16.msra.mxu1 %v593_v2  ;;  %v592_v5 = vld [vmem:[#allocation8] sm:$0xff]  ;;  %s698_s3 = smov 32   ;;  %vm126_vm1 = vcmask 261120  }
   0xd   :  { %95 = vst.msk [vmem:[#allocation3] sm:$0x3] %vm93_vm0, %v697_v0  ;;  %333 = vmatpush.bf16.msra.mxu2 %v591_v1  ;;  %350 = vmatpush.bf16.msra.mxu3 %v593_v2  ;;  %v172_v12 = vld [vmem:[%s854_s0] sm:$0x1]  ;;  %v574_v14 = vld [vmem:[%s855_s1 + $0x2] sm:$0x2] }
   0xe   :  { %96 = vst.msk [vmem:[#allocation4] sm:$0x3] %vm93_vm0, %v697_v0  ;;  %v173_v13 = vunpack.c.l.bf16 %v172_v12  ;;  %v176_v18 = vunpack.c.l.bf16 %v574_v14  ;;  %v783_v2 = vld [vmem:[%s856_s2] sm:$0x3]  ;;  %s700_s2 = smov 96  }
   0xf   :  { %97 = vst.msk [vmem:[#allocation5] sm:$0x3] %vm93_vm0, %v697_v0  ;;  %vm579_vm10 = vcmp.gt.s32.totalorder %v783_v2, 1 }
  0x10   :  { %137 = vmatpush.bf16.msra.mxu0 %v590_v3  ;;  %166 = vmatpush.bf16.msra.mxu1 %v592_v5 }
  0x11   :  { %334 = vmatpush.bf16.msra.mxu2 %v590_v3  ;;  %351 = vmatpush.bf16.msra.mxu3 %v592_v5  ;;  %v699_v3 = vmov 0  }
  0x12   :  { %602 = vset.pattern.permute.xlu0 %v699_v3  ;;  %603 = vset.pattern.permute.xlu2 %v699_v3 }
  0x13   :  { %v107_v4 = vld [vmem:[#allocation2] sm:$0x3] }
  0x14   :  { %v108_v6 = vld [vmem:[#allocation3] sm:$0x3]  ;;  %v113_v9 = vpack.c.bf16 %v107_v4, %v107_v4  ;;  %v787_v4 = vsel %vm579_vm10, 1.0, %v697_v0 }
  0x15   :  { %v754_v7 = vld [vmem:[#allocation4] sm:$0x3]  ;;  %202 = vrot.lane.b32.xlu1 %v108_v6, %s698_s3  ;;  %v299_v12 = vsub.f32 1.0, %v787_v4 }
  0x16   :  { %v757_v8 = vld [vmem:[#allocation5] sm:$0x3]  ;;  %v143_v10 = vpack.c.bf16 %v754_v7, %v754_v7  ;;  %564 = vmatmul.msk.bf16.vlgmr.msra.gmra.mxu0 %vm126_vm1, %v113_v9 }
  0x17   :  { %v243_v11 = vrot.slane %v757_v8, 6 }
  0x18   :  { %573 = vmatmul.msk.bf16.vlgmr.msra.gmra.mxu1 %vm126_vm1, %v143_v10 }
  0x19   :  { %244 = vrot.lane.b32.xlu2 %v243_v11, %s698_s3 }
  0x73   :  { %v245_v55 = vpop.permute.xlu2 %244 }
  0x87   :  { %v203_v59 = vpop.permute.xlu1 %202 }
  0x93   :  { %v139_v15 = vpop.f32.mrf.mxu0 }
  0x94   :  { %v174_v17 = vadd.f32 %v173_v13, %v139_v15 }
  0x95   :  { %v168_v16 = vpop.f32.mrf.mxu1 }
  0x96   :  { %v178_v19 = vrot.slane %v168_v16, 6  ;;  %609 = vtanh.f32 %v174_v17  ;;  %v575_v25 = vmul.f32 -1.442695, %v174_v17 }
  0x98   :  { %v180_v20 = vadd.f32 %v178_v19, %v176_v18 }
  0x9a   :  { %611 = vtanh.f32 %v180_v20  ;;  %v576_v26 = vmul.f32 -1.442695, %v180_v20 }
  0x9b   :  { %v141_v21 = vpop.f32.mrf.mxu0  ;;  %613 = vpow2.f32 %v575_v25 }
  0x9c   :  { %v610_v23 = vpop.eup %609  ;;  %615 = vpow2.f32 %v576_v26 }
  0x9d   :  { %v170_v22 = vpop.f32.mrf.mxu1  ;;  %207 = vrot.lane.b32.xlu0 %v610_v23, %s698_s3 }
  0xa0   :  { %v612_v24 = vpop.eup %611 }
  0xa1   :  { %v614_v27 = vpop.eup %613 }
  0xa2   :  { %v184_v28 = vadd.f32 1.0, %v614_v27  ;;  %v616_v29 = vpop.eup %615 }
  0xa3   :  { %v225_v30 = vadd.f32 1.0, %v616_v29  ;;  %v357_v29 = vld [vmem:[%s854_s0] sm:$0x2] }
  0xa4   :  { %617 = vrcp.f32 %v184_v28  ;;  %v196_v39 = vand.u32 2147483648, %v184_v28  ;;  %vm190_vm3 = vweird.f32 %v184_v28  ;;  %v194_v40 = vand.u32 2147483647, %v184_v28 }
  0xa5   :  { %249 = vrot.lane.b32.xlu0 %v612_v24, %s698_s3  ;;  %619 = vrcp.f32 %v225_v30  ;;  %vm231_vm6 = vweird.f32 %v225_v30  ;;  %v237_v45 = vand.u32 2147483648, %v225_v30  ;;  %v235_v48 = vand.u32 2147483647, %v225_v30 }
  0xa6   :  { %v197_v43 = vor.u32 1.1754944e-38, %v196_v39  ;;  %vm195_vm5 = vcmp.eq.f32.partialorder %v194_v40, 8.507059e+37 }
  0xa7   :  { %v238_v50 = vor.u32 1.1754944e-38, %v237_v45  ;;  %vm236_vm9 = vcmp.eq.f32.partialorder %v235_v48, 8.507059e+37 }
  0xaa   :  { %v618_v31 = vpop.eup %617 }
  0xab   :  { %v186_v32 = vmul.f32 %v618_v31, %v184_v28  ;;  %v620_v34 = vpop.eup %619  ;;  %vm191_vm2 = vweird.f32 %v618_v31 }
  0xac   :  { %v227_v36 = vmul.f32 %v620_v34, %v225_v30  ;;  %vm192_vm4 = vmor %vm190_vm3, %vm191_vm2  ;;  %vm232_vm7 = vweird.f32 %v620_v34 }
  0xad   :  { %v187_v33 = vsub.f32 1.0, %v186_v32  ;;  %vm233_vm8 = vmor %vm231_vm6, %vm232_vm7 }
  0xae   :  { %v228_v38 = vsub.f32 1.0, %v227_v36 }
  0xaf   :  { %v188_v35 = vmul.f32 %v618_v31, %v187_v33 }
  0xb0   :  { %v229_v42 = vmul.f32 %v620_v34, %v228_v38 }
  0xb1   :  { %v189_v37 = vadd.f32 %v618_v31, %v188_v35  ;;  %v583_v35 = vld [vmem:[%s855_s1 + $0x2] sm:$0x1] }
  0xb2   :  { %v230_v47 = vadd.f32 %v620_v34, %v229_v42  ;;  %v364_v36 = vunpack.c.l.bf16 %v583_v35 }
  0xb3   :  { %v193_v41 = vsel %vm192_vm4, %v618_v31, %v189_v37  ;;  %vm577_vm4 = vcmp.gt.s32.totalorder %v783_v2, 0 }
  0xb4   :  { %v198_v44 = vsel %vm195_vm5, %v197_v43, %v193_v41  ;;  %v234_v51 = vsel %vm233_vm8, %v620_v34, %v230_v47  ;;  %vm504_vm5 = vcmask 257026  }
  0xb5   :  { %v239_v52 = vsel %vm236_vm9, %v238_v50, %v234_v51  ;;  %v205_v61 = vmul.f32 %v203_v59, %v198_v44 }
  0xb6   :  { %v247_v56 = vmul.f32 %v245_v55, %v239_v52 }
 0x10f   :  { %v208_v46 = vpop.permute.xlu0 %207 }
 0x110   :  { %v210_v49 = vmul.f32 %v208_v46, %v198_v44 }
 0x112   :  { %212 = vrot.lane.b32.xlu1 %v210_v49, %s698_s3 }
 0x117   :  { %v250_v53 = vpop.permute.xlu0 %249 }
 0x118   :  { %v252_v54 = vmul.f32 %v250_v53, %v239_v52 }
 0x11a   :  { %254 = vrot.lane.b32.xlu2 %v252_v54, %s698_s3 }
 0x174   :  { %v255_v57 = vpop.permute.xlu2 %254 }
 0x175   :  { %v257_v58 = vadd.f32 %v255_v57, %v247_v56 }
 0x177   :  { %621 = vtanh.f32 %v257_v58 }
 0x17d   :  { %v622_v60 = vpop.eup %621 }
 0x17e   :  { %260 = vrot.lane.b32.xlu1 %v622_v60, %s698_s3 }
 0x184   :  { %v213_v62 = vpop.permute.xlu1 %212 }
 0x185   :  { %v776_v63 = vadd.f32 %v213_v62, %v205_v61 }
 0x187   :  { %623 = vtanh.f32 %v776_v63 }
 0x18d   :  { %v624_v1 = vpop.eup %623 }
 0x18e   :  { %218 = vrot.lane.b32.xlu0 %v624_v1, %s698_s3 }
 0x196   :  { %288 = vperm.xlu0 %602, %v787_v4  }
 0x1f0   :  { %v261_v10 = vpop.permute.xlu1 %260 }
 0x1f1   :  { %v263_v11 = vmul.f32 %v261_v10, %v239_v52 }
 0x200   :  { %v219_v5 = vpop.permute.xlu0 %218 }
 0x201   :  { %v221_v6 = vmul.f32 %v219_v5, %v198_v44 }
 0x203   :  { %278 = vst [vmem:[#allocation1] ss:$2 sm:$0xff] %v221_v6  ;;  %v320_v9 = vpack.c.bf16 %v221_v6, %v221_v6 }
 0x205   :  { %322 = vrot.lane.b32.xlu2 %v320_v9, %s694_s29 }
 0x208   :  { %v289_v20 = vpop.permute.xlu0 %288 }
 0x20a   :  { %v792_v13 = vld.sshfl [vmem:[#allocation1] sm:$0xff pattern:$0x75316420] }
 0x20b   :  { %292 = vst [vmem:[#allocation1] ss:$2 sm:$0xff] %v263_v11 }
 0x20d   :  { %302 = vperm.xlu2 %603, %v299_v12  }
 0x212   :  { %v293_v14 = vld.sshfl [vmem:[#allocation1] sm:$0xff pattern:$0x75316420] }
 0x213   :  { %308 = vst [vmem:[#allocation1] ss:$2 sm:$0xff] %v257_v58  ;;  %v294_v15 = vrot.slane %v293_v14, 2  ;;  %v578_v14 = vsel %vm577_vm4, 1.0, %v697_v0 }
 0x215   :  { %295 = vrot.lane.b32.xlu1 %v294_v15, %s694_s29  ;;  %v604_v15 = vpack.i.bf16 %v578_v14, %v578_v14 }
 0x21a   :  { %v309_v16 = vld.sshfl [vmem:[#allocation1] sm:$0xff pattern:$0x75316420] }
 0x21b   :  { %v310_v17 = vrot.slane %v309_v16, 2  ;;  %v387_v16 = vrot.slane %v776_v63, 6 }
 0x21d   :  { %311 = vrot.lane.b32.xlu2 %v310_v17, %s700_s2 }
 0x25f   :  { %v323_v18 = vpop.permute.xlu2 %322 }
 0x260   :  { %581 = vmatmul.msk.bf16.vlgmr.msra.gmra.mxu2 %vm126_vm1, %v323_v18 }
 0x267   :  { %v303_v19 = vpop.permute.xlu2 %302 }
 0x268   :  { %v315_v21 = vmul.f32 %v303_v19, %v757_v8  ;;  %v305_v25 = vmul.f32 %v303_v19, %v754_v7  ;;  %v358_v7 = vunpack.c.l.bf16 %v357_v29 }
 0x277   :  { %v312_v22 = vpop.permute.xlu2 %311 }
 0x278   :  { %v314_v23 = vmul.f32 %v312_v22, %v289_v20 }
 0x27a   :  { %v798_v24 = vadd.f32 %v315_v21, %v314_v23 }
 0x27c   :  { %427 = vrot.lane.b32.xlu2 %v798_v24, %s698_s3 }
 0x287   :  { %v296_v26 = vpop.permute.xlu1 %295 }
 0x288   :  { %v298_v27 = vmul.f32 %v296_v26, %v289_v20 }
 0x28a   :  { %v803_v28 = vadd.f32 %v305_v25, %v298_v27  ;;  %v481_v25 = vsub.f32 1.0, %v578_v14 }
 0x28c   :  { %317 = vst.msk [vmem:[%s860_s6 + $0x2] sm:$0x3] %vm93_vm0, %v803_v28  ;;  %v340_v8 = vpack.c.bf16 %v803_v28, %v803_v28 }
 0x28e   :  { %582 = vmatmul.msk.bf16.vlgmr.msra.gmra.mxu3 %vm126_vm1, %v340_v8 }
 0x2d6   :  { %v428_v2 = vpop.permute.xlu2 %427 }
 0x2e3   :  { %v336_v30 = vpop.f32.mrf.mxu2 }
 0x2e4   :  { %v360_v31 = vrot.slane %v336_v30, 6 }
 0x2e6   :  { %v362_v32 = vadd.f32 %v360_v31, %v358_v7 }
 0x2e8   :  { %625 = vtanh.f32 %v362_v32  ;;  %v584_v41 = vmul.f32 -1.442695, %v362_v32 }
 0x2eb   :  { %v338_v33 = vpop.f32.mrf.mxu2 }
 0x2ee   :  { %v626_v34 = vpop.eup %625 }
 0x2ef   :  { %391 = vrot.lane.b32.xlu1 %v626_v34, %s698_s3 }
 0x311   :  { %v353_v37 = vpop.f32.mrf.mxu3 }
 0x312   :  { %v365_v38 = vadd.f32 %v364_v36, %v353_v37 }
 0x314   :  { %627 = vtanh.f32 %v365_v38  ;;  %v585_v53 = vmul.f32 -1.442695, %v365_v38 }
 0x315   :  { %629 = vpow2.f32 %v584_v41 }
 0x319   :  { %v355_v39 = vpop.f32.mrf.mxu3 }
 0x31a   :  { %v628_v40 = vpop.eup %627 }
 0x31b   :  { %432 = vrot.lane.b32.xlu0 %v628_v40, %s698_s3  ;;  %v630_v42 = vpop.eup %629 }
 0x31c   :  { %v369_v43 = vadd.f32 1.0, %v630_v42 }
 0x31e   :  { %631 = vrcp.f32 %v369_v43  ;;  %v381_v49 = vand.u32 2147483648, %v369_v43  ;;  %vm375_vm12 = vweird.f32 %v369_v43  ;;  %v379_v50 = vand.u32 2147483647, %v369_v43 }
 0x31f   :  { %633 = vpow2.f32 %v585_v53 }
 0x320   :  { %v382_v52 = vor.u32 1.1754944e-38, %v381_v49  ;;  %vm380_vm14 = vcmp.eq.f32.partialorder %v379_v50, 8.507059e+37 }
 0x324   :  { %v632_v44 = vpop.eup %631 }
 0x325   :  { %v371_v45 = vmul.f32 %v632_v44, %v369_v43  ;;  %vm376_vm11 = vweird.f32 %v632_v44  ;;  %v634_v57 = vpop.eup %633 }
 0x326   :  { %vm377_vm13 = vmor %vm375_vm12, %vm376_vm11  ;;  %v409_v58 = vadd.f32 1.0, %v634_v57 }
 0x327   :  { %v372_v46 = vsub.f32 1.0, %v371_v45 }
 0x328   :  { %635 = vrcp.f32 %v409_v58  ;;  %v421_v3 = vand.u32 2147483648, %v409_v58  ;;  %vm415_vm1 = vweird.f32 %v409_v58  ;;  %v419_v5 = vand.u32 2147483647, %v409_v58 }
 0x329   :  { %v373_v47 = vmul.f32 %v632_v44, %v372_v46 }
 0x32a   :  { %v422_v9 = vor.u32 1.1754944e-38, %v421_v3  ;;  %vm420_vm3 = vcmp.eq.f32.partialorder %v419_v5, 8.507059e+37 }
 0x32b   :  { %v374_v48 = vadd.f32 %v632_v44, %v373_v47 }
 0x32d   :  { %v378_v51 = vsel %vm377_vm13, %v632_v44, %v374_v48 }
 0x32e   :  { %v383_v54 = vsel %vm380_vm14, %v382_v52, %v378_v51  ;;  %v636_v59 = vpop.eup %635 }
 0x32f   :  { %v411_v60 = vmul.f32 %v636_v59, %v409_v58  ;;  %vm416_vm15 = vweird.f32 %v636_v59  ;;  %v389_v17 = vmul.f32 %v387_v16, %v383_v54 }
 0x330   :  { %vm417_vm2 = vmor %vm415_vm1, %vm416_vm15 }
 0x331   :  { %v412_v61 = vsub.f32 1.0, %v411_v60 }
 0x333   :  { %v413_v62 = vmul.f32 %v636_v59, %v412_v61 }
 0x335   :  { %v414_v1 = vadd.f32 %v636_v59, %v413_v62 }
 0x337   :  { %v418_v6 = vsel %vm417_vm2, %v636_v59, %v414_v1 }
 0x338   :  { %v423_v11 = vsel %vm420_vm3, %v422_v9, %v418_v6 }
 0x339   :  { %v430_v21 = vmul.f32 %v428_v2, %v423_v11 }
 0x361   :  { %v392_v55 = vpop.permute.xlu1 %391 }
 0x362   :  { %v394_v56 = vmul.f32 %v392_v55, %v383_v54 }
 0x364   :  { %396 = vrot.lane.b32.xlu1 %v394_v56, %s698_s3 }
 0x38d   :  { %v433_v10 = vpop.permute.xlu0 %432 }
 0x38e   :  { %v435_v12 = vmul.f32 %v433_v10, %v423_v11 }
 0x390   :  { %437 = vrot.lane.b32.xlu0 %v435_v12, %s698_s3 }
 0x398   :  { %605 = vperm.xlu0 %602, %v604_v15  }
 0x3d6   :  { %v397_v18 = vpop.permute.xlu1 %396 }
 0x3d7   :  { %v399_v19 = vadd.f32 %v397_v18, %v389_v17 }
 0x3d9   :  { %637 = vtanh.f32 %v399_v19 }
 0x3df   :  { %v638_v20 = vpop.eup %637 }
 0x3e0   :  { %402 = vrot.lane.b32.xlu1 %v638_v20, %s698_s3 }
 0x3e8   :  { %280 = vrot.lane.b32.xlu1 %v792_v13, %s694_s29 }
 0x402   :  { %v438_v22 = vpop.permute.xlu0 %437 }
 0x403   :  { %v440_v23 = vadd.f32 %v438_v22, %v430_v21 }
 0x405   :  { %639 = vtanh.f32 %v440_v23 }
 0x40a   :  { %v606_v27 = vpop.permute.xlu0 %605 }
 0x40b   :  { %v640_v0 = vpop.eup %639  ;;  %v608_v8 = vunpack.i.h.bf16 %v606_v27  ;;  %v607_v38 = vunpack.i.l.bf16 %v606_v27 }
 0x40c   :  { %443 = vrot.lane.b32.xlu2 %v640_v0, %s698_s3 }
 0x414   :  { %484 = vperm.xlu2 %603, %v481_v25  }
 0x41c   :  { %457 = vperm.xlu2 %603, %v787_v4  }
 0x452   :  { %v403_v63 = vpop.permute.xlu1 %402 }
 0x453   :  { %v405_v26 = vmul.f32 %v403_v63, %v383_v54 }
 0x455   :  { %461 = vst [vmem:[#allocation1] ss:$2 sm:$0xff] %v405_v26 }
 0x45a   :  { %v281_v29 = vpop.permute.xlu1 %280 }
 0x45b   :  { %v283_v7 = vmul.f32 %v608_v8, %v281_v29 }
 0x45c   :  { %v462_v31 = vld.sshfl [vmem:[#allocation1] sm:$0xff pattern:$0x75316420] }
 0x45d   :  { %285 = vst.msk [vmem:[%s859_s5] sm:$0x3] %vm93_vm0, %v283_v7  ;;  %v463_v33 = vrot.slane %v462_v31, 2 }
 0x466   :  { %v444_v13 = vpop.permute.xlu2 %443 }
 0x467   :  { %v446_v30 = vmul.f32 %v444_v13, %v423_v11 }
 0x469   :  { %475 = vst [vmem:[#allocation1] ss:$2 sm:$0xff] %v446_v30 }
 0x46e   :  { %v485_v36 = vpop.permute.xlu2 %484 }
 0x46f   :  { %v487_v41 = vmul.f32 %v485_v36, %v803_v28  ;;  %v496_v45 = vmul.f32 %v485_v36, %v798_v24 }
 0x470   :  { %v476_v32 = vld.sshfl [vmem:[#allocation1] sm:$0xff pattern:$0x75316420] }
 0x471   :  { %477 = vrot.lane.b32.xlu1 %v476_v32, %s694_s29  ;;  %490 = vst [vmem:[#allocation1] ss:$2 sm:$0xff] %v440_v23 }
 0x476   :  { %v458_v37 = vpop.permute.xlu2 %457 }
 0x478   :  { %v491_v4 = vld.sshfl [vmem:[#allocation1] sm:$0xff pattern:$0x75316420] }
 0x479   :  { %492 = vrot.lane.b32.xlu0 %v491_v4, %s700_s2  ;;  %499 = vst [vmem:[#allocation1] ss:$2 sm:$0xff] %v405_v26 }
 0x480   :  { %v500_v34 = vld.sshfl [vmem:[#allocation1] sm:$0xff pattern:$0x75316420] }
 0x481   :  { %464 = vrot.lane.b32.xlu0 %v463_v33, %s694_s29  ;;  %501 = vrot.lane.b32.xlu1 %v500_v34, %s694_s29  ;;  %507 = vst [vmem:[#allocation1] ss:$2 sm:$0xff] %v399_v19 }
 0x488   :  { %v508_v35 = vld.sshfl [vmem:[#allocation1] sm:$0xff pattern:$0x75316420] }
 0x489   :  { %509 = vrot.lane.b32.xlu2 %v508_v35, %s700_s2 }
 0x4e3   :  { %v478_v39 = vpop.permute.xlu1 %477  ;;  %v510_v40 = vpop.permute.xlu2 %509 }
 0x4e4   :  { %v480_v42 = vmul.f32 %v607_v38, %v478_v39  ;;  %512 = vst.msk [vmem:[#allocation3 - $0x2] sm:$0xc] %vm504_vm5, %v510_v40 }
 0x4e6   :  { %v488_v43 = vadd.f32 %v487_v41, %v480_v42 }
 0x4e8   :  { %498 = vst.msk [vmem:[%s860_s6] sm:$0x3] %vm93_vm0, %v488_v43 }
 0x4e9   :  { %513 = vst.msk [vmem:[#allocation4] sm:$0x3] %vm93_vm0, %v488_v43 }
 0x4eb   :  { %v493_v44 = vpop.permute.xlu0 %492 }
 0x4ec   :  { %v495_v46 = vmul.f32 %v607_v38, %v493_v44 }
 0x4ee   :  { %v497_v47 = vadd.f32 %v496_v45, %v495_v46 }
 0x4f0   :  { %514 = vst.msk [vmem:[#allocation5] sm:$0x3] %vm93_vm0, %v497_v47 }
 0x4f3   :  { %v465_v48 = vpop.permute.xlu0 %464  ;;  %v502_v28 = vpop.permute.xlu1 %501 }
 0x4f4   :  { %v467_v49 = vmul.f32 %v465_v48, %v458_v37  ;;  %505 = vst.msk [vmem:[#allocation2 - $0x2] sm:$0xc] %vm504_vm5, %v502_v28 }
 0x4f6   :  { %468 = vst.msk [vmem:[%s859_s5 + $0x2] sm:$0x3] %vm93_vm0, %v467_v49 }
 0x4f7   :  { %534 = vsyncpa [#allocation7], 1 }
 0x4f8   :  { %535 = vsyncpa [#allocation9], 1 }

// kernel: encoder_forward.13
= control target key start
LH: loop header
LB: loop body
LE: loop exit
PB: predicated region body
PF: predicated region fallthrough
CT: control target
= control target key end

     0   :  { %10 = vsyncpa [#allocation3], 0  ;;  %s266_s0 = inlined_call_operand.vmem [shape: f32[4,32], index: 0, kind: input, shape index: {}]   ;;  %s267_s1 = inlined_call_operand.vmem [shape: f32[4,32], index: 1, kind: input, shape index: {}]   ;;  %s268_s2 = inlined_call_operand.hbm [shape: bf16[32,32], index: 2, kind: input, shape index: {}]   ;;  %s269_s3 = inlined_call_operand.hbm [shape: bf16[32,32], index: 3, kind: input, shape index: {}]   ;;  %s270_s4 = inlined_call_operand.vmem [shape: f32[1,32], index: 4, kind: input, shape index: {}]   ;;  %s271_s5 = inlined_call_operand.vmem [shape: f32[4,32], index: 5, kind: output, shape index: {}]  }
   0x1   :  { %s20_s20 = sshll.u32 %s268_s2, 4  ;;  %s21_s20 = int_to_ptr.hbm [resolvable:$true] %s20_s20 }
   0x2   :  { %11 = vsyncpa [#allocation5], 0  ;;  %s214_s21 = smov [#allocation2]   ;;  %s33_s25 = sshll.u32 %s269_s3, 4  ;;  %s34_s25 = int_to_ptr.hbm [resolvable:$true] %s33_s25 }
   0x3   :  { %s22_s22 = sshll.u32 %s214_s21, 4  ;;  %s215_s26 = smov 64   ;;  %s23_s22 = int_to_ptr.vmem [resolvable:$true] %s22_s22 }
   0x4   :  { %s216_s27 = smov 4   ;;  %s217_s28 = smov [#allocation4]  }
   0x5   :  { %28 = dma.hbm_to_vmem [thread:$0]  %s21_s20, 256, %s23_s22, [#allocation3], %s215_s26, %s215_s26, %s216_s27  }
   0x6   :  { %s35_s29 = sshll.u32 %s217_s28, 4  ;;  %s36_s29 = int_to_ptr.vmem [resolvable:$true] %s35_s29 }
   0x7   :  { %41 = dma.hbm_to_vmem [thread:$0]  %s34_s25, 256, %s36_s29, [#allocation5], %s215_s26, %s215_s26, %s216_s27  }
   0x8   :  { %210 = dma.done.wait [#allocation3], 256  }
   0x9   :  { %211 = vsyncadd [#allocation3], 4294967040 }
   0xa   :  { %212 = dma.done.wait [#allocation5], 256  }
   0xb   :  { %213 = vsyncadd [#allocation5], 4294967040  ;;  %v156_v0 = vld [vmem:[#allocation4 + $0x8] sm:$0xff]  ;;  %v154_v1 = vld [vmem:[#allocation2 + $0x8] sm:$0xff]  ;;  %vm77_vm0 = vcmask 261120   ;;  %vm127_vm1 = vcmask 257024  }
   0xc   :  { %v155_v2 = vld [vmem:[#allocation4] sm:$0xff]  ;;  %v153_v3 = vld [vmem:[#allocation2] sm:$0xff]  ;;  %87 = vmatpush.bf16.msra.mxu0 %v156_v0  ;;  %115 = vmatpush.bf16.msra.mxu1 %v154_v1 }
   0xd   :  { %v59_v4 = vld [vmem:[%s267_s1] sm:$0xf] }
   0xe   :  { %v53_v5 = vld [vmem:[%s266_s0] sm:$0xf]  ;;  %v60_v6 = vpack.c.bf16 %v59_v4, %v59_v4 }
   0xf   :  { %v54_v7 = vpack.c.bf16 %v53_v5, %v53_v5  ;;  %v161_v8 = vld [vmem:[%s270_s4] ss:$0 sm:$0xff] }
  0x10   :  { %88 = vmatpush.bf16.msra.mxu0 %v155_v2  ;;  %116 = vmatpush.bf16.msra.mxu1 %v153_v3 }
  0x13   :  { %143 = vmatmul.msk.bf16.vlgmr.msra.gmra.mxu0 %vm77_vm0, %v60_v6  ;;  %152 = vmatmul.msk.bf16.vlgmr.msra.gmra.mxu1 %vm77_vm0, %v54_v7 }
  0x90   :  { %v90_v9 = vpop.f32.mrf.mxu0  ;;  %v118_v10 = vpop.f32.mrf.mxu1 }
  0x91   :  { %v119_v11 = vadd.f32 %v118_v10, %v90_v9 }
  0x93   :  { %v126_v12 = vadd.f32 %v161_v8, %v119_v11 }
  0x95   :  { %128 = vst.msk [vmem:[%s271_s5] sm:$0xf] %vm127_vm1, %v126_v12 }
  0x98   :  { %v92_v13 = vpop.f32.mrf.mxu0  ;;  %v120_v14 = vpop.f32.mrf.mxu1 }
  0x99   :  { %133 = vsyncpa [#allocation3], 1 }
  0x9a   :  { %134 = vsyncpa [#allocation5], 1 }

</bundles_post_ra>
